<compile_context>
chip_gen: v7x
topology: tpu7x:2x2x1
jax: 0.10.0
libtpu: 0.0.40
codegen_flags: <defaults>
</compile_context>

<pallas_src>
import math

import jax
import jax.numpy as jnp
from jax import lax
from jax.experimental import pallas as pl
from jax.experimental.pallas import tpu as pltpu

# ---- synthetic small BERT config (deterministic init, no checkpoint) --------
HIDDEN = 32
LAYERS = 2
HEADS = 4
HEAD_DIM = HIDDEN // HEADS
INTERMEDIATE = 64
VOCAB = 50
TYPE_VOCAB = 2
MAX_POS = 16
LN_EPS = 1e-12
NEG_INF = -10000.0


# ----------------------------- in-kernel helpers ------------------------------
def _layernorm(x, g, b):
    mu = jnp.mean(x, axis=-1, keepdims=True)
    xc = x - mu
    var = jnp.mean(xc * xc, axis=-1, keepdims=True)
    return xc * lax.rsqrt(var + LN_EPS) * g + b


def _gelu(x):
    # TODO(synk): HF BertModel's default "gelu" is the exact erf variant; the
    # tanh approximation (google-research/bert) is used here (~1e-3 diff).
    return 0.5 * x * (1.0 + jnp.tanh(0.7978845608028654 * (x + 0.044715 * x * x * x)))


# ----------------------------- fused encoder kernel ---------------------------
def _encoder_kernel(emb_ref, mask_ref, eg_ref, eb_ref,
                    wq_ref, bq_ref, wk_ref, bk_ref, wv_ref, bv_ref,
                    wo_ref, bo_ref, l1g_ref, l1b_ref,
                    wi_ref, bi_ref, wf_ref, bf_ref, l2g_ref, l2b_ref,
                    pw_ref, pb_ref, pooled_ref):
    """One grid step = one batch row: embeddings-LN -> L layers -> pooler."""
    n_layers = wq_ref.shape[0]
    n_heads = wq_ref.shape[1]
    head_dim = wq_ref.shape[3]
    scale = 1.0 / math.sqrt(head_dim)

    add_mask = mask_ref[0]                                        # [1, S]
    hidden = _layernorm(emb_ref[0], eg_ref[...], eb_ref[...])     # [S, H]
    seq, hid = hidden.shape

    for l in range(n_layers):
        # --- self-attention: all heads of this batch row, fully in VMEM ------
        attn = jnp.zeros((seq, hid), jnp.float32)
        for h in range(n_heads):
            q = jnp.dot(hidden, wq_ref[l, h],
                        preferred_element_type=jnp.float32) + bq_ref[l, h]   # [S, dH]
            k = jnp.dot(hidden, wk_ref[l, h],
                        preferred_element_type=jnp.float32) + bk_ref[l, h]
            v = jnp.dot(hidden, wv_ref[l, h],
                        preferred_element_type=jnp.float32) + bv_ref[l, h]
            # scores: contract the last dims of q and k (no explicit transpose)
            s = lax.dot_general(q, k, (((1,), (1,)), ((), ())),
                                preferred_element_type=jnp.float32) * scale   # [S, S]
            s = s + add_mask                                       # key mask
            m = jnp.max(s, axis=-1, keepdims=True)
            p = jnp.exp(s - m)
            p = p * pl.reciprocal(jnp.sum(p, axis=-1, keepdims=True), approx=True)
            ctx = jnp.dot(p, v, preferred_element_type=jnp.float32)          # [S, dH]
            # per-head rows of the output projection accumulate into [S, H]
            attn = attn + jnp.dot(ctx, wo_ref[l, h],
                                  preferred_element_type=jnp.float32)
        attn = attn + bo_ref[l]
        hidden = _layernorm(attn + hidden, l1g_ref[l], l1b_ref[l])

        # --- feed-forward -----------------------------------------------------
        inter = jnp.dot(hidden, wi_ref[l],
                        preferred_element_type=jnp.float32) + bi_ref[l]
        inter = _gelu(inter)
        ffn = jnp.dot(inter, wf_ref[l],
                      preferred_element_type=jnp.float32) + bf_ref[l]
        hidden = _layernorm(ffn + hidden, l2g_ref[l], l2b_ref[l])

    # --- pooler: CLS token -> dense -> tanh -----------------------------------
    cls = hidden[0:1, :]                                           # [1, H]
    pooled = jnp.tanh(jnp.dot(cls, pw_ref[...],
                              preferred_element_type=jnp.float32) + pb_ref[...])
    pooled_ref[0] = pooled


def _resident(shape):
    """Full-array block, same block every grid step (weights stay in VMEM)."""
    rank = len(shape)
    return pl.BlockSpec(shape, lambda b, _r=rank: (0,) * _r)


# ---------------------------- BERT forward (glue) -----------------------------
def bert_forward(packed, input_ids, token_type_ids, attention_mask):
    B, S = input_ids.shape
    if S > MAX_POS:
        raise ValueError(f"sequence length {S} exceeds MAX_POS={MAX_POS}")

    # Embedding gathers + mask construction: tiny plain-JAX glue (one fusion).
    emb = (jnp.take(packed["word_emb"], input_ids, axis=0)
           + packed["pos_emb"][:S][None, :, :]
           + jnp.take(packed["type_emb"], token_type_ids, axis=0))            # [B, S, H]
    add_mask = ((1.0 - attention_mask.astype(jnp.float32))
                * NEG_INF)[:, None, :]                                        # [B, 1, S]

    weights = [
        packed["emb_ln_g"], packed["emb_ln_b"],
        packed["wq"], packed["bq"], packed["wk"], packed["bk"],
        packed["wv"], packed["bv"], packed["wo"], packed["bo"],
        packed["ln1_g"], packed["ln1_b"],
        packed["wi"], packed["bi"], packed["wf"], packed["bf"],
        packed["ln2_g"], packed["ln2_b"],
        packed["pool_w"], packed["pool_b"],
    ]
    in_specs = [
        pl.BlockSpec((1, S, HIDDEN), lambda b: (b, 0, 0)),   # embeddings
        pl.BlockSpec((1, 1, S), lambda b: (b, 0, 0)),        # additive mask
    ] + [_resident(w.shape) for w in weights]

    pooled = pl.pallas_call(
        _encoder_kernel,
        out_shape=jax.ShapeDtypeStruct((B, 1, HIDDEN), jnp.float32),
        grid=(B,),
        in_specs=in_specs,
        out_specs=pl.BlockSpec((1, 1, HIDDEN), lambda b: (b, 0, 0)),
        compiler_params=pltpu.CompilerParams(
            dimension_semantics=("parallel",)),
    )(emb, add_mask, *weights)
    return pooled.reshape(B, HIDDEN)


def bert_encoder_forward(packed, tokens, index="bert"):
    """Mirrors BertEncoder.forward: returns (pooled, utter_mask)."""
    input_ids = tokens[index]
    token_type_ids = tokens[f"{index}-type-ids"]
    input_mask = (input_ids != 0).astype(jnp.int32)
    if input_ids.ndim > 2:
        shape = input_ids.shape
        word_dim = shape[-1]
        pooled = bert_forward(
            packed,
            input_ids.reshape(-1, word_dim),
            token_type_ids.reshape(-1, word_dim),
            input_mask.reshape(-1, word_dim),
        )
        pooled = pooled.reshape(shape[:-1] + (-1,))
    else:
        pooled = bert_forward(packed, input_ids, token_type_ids, input_mask)
    utter_mask = (input_mask.sum(axis=-1) != 0).astype(jnp.int32)
    return pooled, utter_mask


# ---------------------------- deterministic params ----------------------------
def init_params(key):
    def dense(k, fan_in, fan_out):
        return jax.random.normal(k, (fan_in, fan_out), jnp.float32) * 0.02

    keys = jax.random.split(key, 4 + LAYERS)
    params = {
        "word_emb": jax.random.normal(keys[0], (VOCAB, HIDDEN), jnp.float32) * 0.02,
        "pos_emb": jax.random.normal(keys[1], (MAX_POS, HIDDEN), jnp.float32) * 0.02,
        "type_emb": jax.random.normal(keys[2], (TYPE_VOCAB, HIDDEN), jnp.float32) * 0.02,
        "emb_ln_g": jnp.ones((HIDDEN,), jnp.float32),
        "emb_ln_b": jnp.zeros((HIDDEN,), jnp.float32),
        "pool_w": dense(keys[3], HIDDEN, HIDDEN),
        "pool_b": jnp.zeros((HIDDEN,), jnp.float32),
        "layers": [],
    }
    for l in range(LAYERS):
        lk = jax.random.split(keys[4 + l], 6)
        params["layers"].append({
            "q_w": dense(lk[0], HIDDEN, HIDDEN), "q_b": jnp.zeros((HIDDEN,), jnp.float32),
            "k_w": dense(lk[1], HIDDEN, HIDDEN), "k_b": jnp.zeros((HIDDEN,), jnp.float32),
            "v_w": dense(lk[2], HIDDEN, HIDDEN), "v_b": jnp.zeros((HIDDEN,), jnp.float32),
            "ao_w": dense(lk[3], HIDDEN, HIDDEN), "ao_b": jnp.zeros((HIDDEN,), jnp.float32),
            "attn_ln_g": jnp.ones((HIDDEN,), jnp.float32),
            "attn_ln_b": jnp.zeros((HIDDEN,), jnp.float32),
            "i_w": dense(lk[4], HIDDEN, INTERMEDIATE),
            "i_b": jnp.zeros((INTERMEDIATE,), jnp.float32),
            "o_w": dense(lk[5], INTERMEDIATE, HIDDEN),
            "o_b": jnp.zeros((HIDDEN,), jnp.float32),
            "out_ln_g": jnp.ones((HIDDEN,), jnp.float32),
            "out_ln_b": jnp.zeros((HIDDEN,), jnp.float32),
        })
    return params


def pack_params(params):
    """Repack per-layer weights into stacked, per-head, kernel-friendly layouts."""
    layers = params["layers"]

    def stack(fn):
        return jnp.stack([fn(l) for l in layers], axis=0)

    return {
        "word_emb": params["word_emb"],
        "pos_emb": params["pos_emb"],
        "type_emb": params["type_emb"],
        "emb_ln_g": params["emb_ln_g"].reshape(1, HIDDEN),
        "emb_ln_b": params["emb_ln_b"].reshape(1, HIDDEN),
        # per-head projections: weights [L, nH, H, dH], biases [L, nH, 1, dH]
        "wq": stack(lambda l: l["q_w"].reshape(HIDDEN, HEADS, HEAD_DIM).transpose(1, 0, 2)),
        "bq": stack(lambda l: l["q_b"].reshape(HEADS, 1, HEAD_DIM)),
        "wk": stack(lambda l: l["k_w"].reshape(HIDDEN, HEADS, HEAD_DIM).transpose(1, 0, 2)),
        "bk": stack(lambda l: l["k_b"].reshape(HEADS, 1, HEAD_DIM)),
        "wv": stack(lambda l: l["v_w"].reshape(HIDDEN, HEADS, HEAD_DIM).transpose(1, 0, 2)),
        "bv": stack(lambda l: l["v_b"].reshape(HEADS, 1, HEAD_DIM)),
        # per-head rows of the attention output projection: [L, nH, dH, H]
        "wo": stack(lambda l: l["ao_w"].reshape(HEADS, HEAD_DIM, HIDDEN)),
        "bo": stack(lambda l: l["ao_b"].reshape(1, HIDDEN)),
        "ln1_g": stack(lambda l: l["attn_ln_g"].reshape(1, HIDDEN)),
        "ln1_b": stack(lambda l: l["attn_ln_b"].reshape(1, HIDDEN)),
        "wi": stack(lambda l: l["i_w"]),                       # [L, H, I]
        "bi": stack(lambda l: l["i_b"].reshape(1, INTERMEDIATE)),
        "wf": stack(lambda l: l["o_w"]),                       # [L, I, H]
        "bf": stack(lambda l: l["o_b"].reshape(1, HIDDEN)),
        "ln2_g": stack(lambda l: l["out_ln_g"].reshape(1, HIDDEN)),
        "ln2_b": stack(lambda l: l["out_ln_b"].reshape(1, HIDDEN)),
        "pool_w": params["pool_w"],
        "pool_b": params["pool_b"].reshape(1, HIDDEN),
    }


if __name__ == "__main__":
    key = jax.random.PRNGKey(0)
    pkey, ikey = jax.random.split(key)
    params = init_params(pkey)
    packed = pack_params(params)

    B, S = 2, 8
    input_ids = jax.random.randint(ikey, (B, S), 1, VOCAB).astype(jnp.int32)
    # introduce padding (id 0) to exercise the attention / utterance masks
    input_ids = input_ids.at[1, 5:].set(0)
    token_type_ids = jnp.zeros((B, S), jnp.int32)

    tokens = {"bert": input_ids, "bert-type-ids": token_type_ids}
    pooled, utter_mask = bert_encoder_forward(packed, tokens)
    jax.block_until_ready(pooled)
    jax.block_until_ready(utter_mask)

    assert pooled.shape == (B, HIDDEN) and pooled.dtype == jnp.float32
    assert utter_mask.shape == (B,) and utter_mask.dtype == jnp.int32
    print("KERNEL_OK")
</pallas_src>

<mosaic_0001>
module attributes {stable_mosaic.version = 11 : i64} {
  func.func @_encoder_kernel(%arg0: i32, %arg1: memref<1x8x32xf32, #tpu.memory_space<vmem>>, %arg2: memref<1x1x8xf32, #tpu.memory_space<vmem>>, %arg3: memref<1x32xf32, #tpu.memory_space<vmem>>, %arg4: memref<1x32xf32, #tpu.memory_space<vmem>>, %arg5: memref<2x4x32x8xf32, #tpu.memory_space<vmem>>, %arg6: memref<2x4x1x8xf32, #tpu.memory_space<vmem>>, %arg7: memref<2x4x32x8xf32, #tpu.memory_space<vmem>>, %arg8: memref<2x4x1x8xf32, #tpu.memory_space<vmem>>, %arg9: memref<2x4x32x8xf32, #tpu.memory_space<vmem>>, %arg10: memref<2x4x1x8xf32, #tpu.memory_space<vmem>>, %arg11: memref<2x4x8x32xf32, #tpu.memory_space<vmem>>, %arg12: memref<2x1x32xf32, #tpu.memory_space<vmem>>, %arg13: memref<2x1x32xf32, #tpu.memory_space<vmem>>, %arg14: memref<2x1x32xf32, #tpu.memory_space<vmem>>, %arg15: memref<2x32x64xf32, #tpu.memory_space<vmem>>, %arg16: memref<2x1x64xf32, #tpu.memory_space<vmem>>, %arg17: memref<2x64x32xf32, #tpu.memory_space<vmem>>, %arg18: memref<2x1x32xf32, #tpu.memory_space<vmem>>, %arg19: memref<2x1x32xf32, #tpu.memory_space<vmem>>, %arg20: memref<2x1x32xf32, #tpu.memory_space<vmem>>, %arg21: memref<32x32xf32, #tpu.memory_space<vmem>>, %arg22: memref<1x32xf32, #tpu.memory_space<vmem>>, %arg23: memref<1x1x32xf32, #tpu.memory_space<vmem>>) attributes {dimension_semantics = [#tpu.dimension_semantics<parallel>], iteration_bounds = array<i64: 2>, scalar_prefetch = 0 : i64, scratch_operands = 0 : i64, tpu.core_type = #tpu.core_type<tc>, window_params = [{transform_indices = @transform_0, window_bounds = array<i64: 1, 8, 32>}, {transform_indices = @transform_1, window_bounds = array<i64: 1, 1, 8>}, {pipeline_mode = #tpu.pipeline_mode<synchronous>, transform_indices = @transform_2, window_bounds = array<i64: 1, 32>}, {pipeline_mode = #tpu.pipeline_mode<synchronous>, transform_indices = @transform_3, window_bounds = array<i64: 1, 32>}, {pipeline_mode = #tpu.pipeline_mode<synchronous>, transform_indices = @transform_4, window_bounds = array<i64: 2, 4, 32, 8>}, {pipeline_mode = #tpu.pipeline_mode<synchronous>, transform_indices = @transform_5, window_bounds = array<i64: 2, 4, 1, 8>}, {pipeline_mode = #tpu.pipeline_mode<synchronous>, transform_indices = @transform_6, window_bounds = array<i64: 2, 4, 32, 8>}, {pipeline_mode = #tpu.pipeline_mode<synchronous>, transform_indices = @transform_7, window_bounds = array<i64: 2, 4, 1, 8>}, {pipeline_mode = #tpu.pipeline_mode<synchronous>, transform_indices = @transform_8, window_bounds = array<i64: 2, 4, 32, 8>}, {pipeline_mode = #tpu.pipeline_mode<synchronous>, transform_indices = @transform_9, window_bounds = array<i64: 2, 4, 1, 8>}, {pipeline_mode = #tpu.pipeline_mode<synchronous>, transform_indices = @transform_10, window_bounds = array<i64: 2, 4, 8, 32>}, {pipeline_mode = #tpu.pipeline_mode<synchronous>, transform_indices = @transform_11, window_bounds = array<i64: 2, 1, 32>}, {pipeline_mode = #tpu.pipeline_mode<synchronous>, transform_indices = @transform_12, window_bounds = array<i64: 2, 1, 32>}, {pipeline_mode = #tpu.pipeline_mode<synchronous>, transform_indices = @transform_13, window_bounds = array<i64: 2, 1, 32>}, {pipeline_mode = #tpu.pipeline_mode<synchronous>, transform_indices = @transform_14, window_bounds = array<i64: 2, 32, 64>}, {pipeline_mode = #tpu.pipeline_mode<synchronous>, transform_indices = @transform_15, window_bounds = array<i64: 2, 1, 64>}, {pipeline_mode = #tpu.pipeline_mode<synchronous>, transform_indices = @transform_16, window_bounds = array<i64: 2, 64, 32>}, {pipeline_mode = #tpu.pipeline_mode<synchronous>, transform_indices = @transform_17, window_bounds = array<i64: 2, 1, 32>}, {pipeline_mode = #tpu.pipeline_mode<synchronous>, transform_indices = @transform_18, window_bounds = array<i64: 2, 1, 32>}, {pipeline_mode = #tpu.pipeline_mode<synchronous>, transform_indices = @transform_19, window_bounds = array<i64: 2, 1, 32>}, {pipeline_mode = #tpu.pipeline_mode<synchronous>, transform_indices = @transform_20, window_bounds = array<i64: 32, 32>}, {pipeline_mode = #tpu.pipeline_mode<synchronous>, transform_indices = @transform_21, window_bounds = array<i64: 1, 32>}, {transform_indices = @transform_22, window_bounds = array<i64: 1, 1, 32>}]} {
    %c0 = arith.constant 0 : index
    %c0_0 = arith.constant 0 : index
    %c0_1 = arith.constant 0 : index
    %0 = vector.load %arg2[%c0, %c0_0, %c0_1] : memref<1x1x8xf32, #tpu.memory_space<vmem>>, vector<1x1x8xf32>
    %1 = vector.shape_cast %0 : vector<1x1x8xf32> to vector<1x8xf32>
    %c0_2 = arith.constant 0 : index
    %c0_3 = arith.constant 0 : index
    %c0_4 = arith.constant 0 : index
    %2 = vector.load %arg1[%c0_2, %c0_3, %c0_4] : memref<1x8x32xf32, #tpu.memory_space<vmem>>, vector<1x8x32xf32>
    %3 = vector.shape_cast %2 : vector<1x8x32xf32> to vector<8x32xf32>
    %c0_5 = arith.constant 0 : index
    %c0_6 = arith.constant 0 : index
    %4 = vector.load %arg3[%c0_5, %c0_6] : memref<1x32xf32, #tpu.memory_space<vmem>>, vector<1x32xf32>
    %c0_7 = arith.constant 0 : index
    %c0_8 = arith.constant 0 : index
    %5 = vector.load %arg4[%c0_7, %c0_8] : memref<1x32xf32, #tpu.memory_space<vmem>>, vector<1x32xf32>
    %cst = arith.constant dense<0.000000e+00> : vector<8xf32>
    %6 = vector.multi_reduction <add>, %3, %cst [1] : vector<8x32xf32> to vector<8xf32>
    %7 = vector.shape_cast %6 : vector<8xf32> to vector<8x1xf32>
    %cst_9 = arith.constant 3.200000e+01 : f32
    %8 = vector.broadcast %cst_9 : f32 to vector<8x1xf32>
    %9 = arith.divf %7, %8 : vector<8x1xf32>
    %10 = vector.broadcast %9 : vector<8x1xf32> to vector<8x32xf32>
    %11 = arith.subf %3, %10 : vector<8x32xf32>
    %12 = arith.mulf %11, %11 : vector<8x32xf32>
    %cst_10 = arith.constant dense<0.000000e+00> : vector<8xf32>
    %13 = vector.multi_reduction <add>, %12, %cst_10 [1] : vector<8x32xf32> to vector<8xf32>
    %14 = vector.shape_cast %13 : vector<8xf32> to vector<8x1xf32>
    %cst_11 = arith.constant 3.200000e+01 : f32
    %15 = vector.broadcast %cst_11 : f32 to vector<8x1xf32>
    %16 = arith.divf %14, %15 : vector<8x1xf32>
    %cst_12 = arith.constant 9.99999996E-13 : f32
    %17 = vector.broadcast %cst_12 : f32 to vector<8x1xf32>
    %18 = arith.addf %16, %17 : vector<8x1xf32>
    %19 = math.rsqrt %18 : vector<8x1xf32>
    %20 = vector.broadcast %19 : vector<8x1xf32> to vector<8x32xf32>
    %21 = arith.mulf %11, %20 : vector<8x32xf32>
    %22 = vector.broadcast %4 : vector<1x32xf32> to vector<8x32xf32>
    %23 = arith.mulf %21, %22 : vector<8x32xf32>
    %24 = vector.broadcast %5 : vector<1x32xf32> to vector<8x32xf32>
    %25 = arith.addf %23, %24 : vector<8x32xf32>
    %cst_13 = arith.constant 0.000000e+00 : f32
    %26 = vector.broadcast %cst_13 : f32 to vector<8x32xf32>
    %c0_14 = arith.constant 0 : index
    %c0_15 = arith.constant 0 : index
    %c0_16 = arith.constant 0 : index
    %c0_17 = arith.constant 0 : index
    %27 = vector.load %arg5[%c0_14, %c0_15, %c0_16, %c0_17] : memref<2x4x32x8xf32, #tpu.memory_space<vmem>>, vector<1x1x32x8xf32>
    %28 = vector.shape_cast %27 : vector<1x1x32x8xf32> to vector<32x8xf32>
    %cst_18 = arith.constant dense<0.000000e+00> : vector<8x8xf32>
    %29 = tpu.matmul %25, %28, %cst_18 {dimension_numbers = #tpu.dot_dimension_numbers<[1], [0], [0], [1], [0, 0, 1, 1], [], []>} : vector<8x32xf32>, vector<32x8xf32>, vector<8x8xf32> -> vector<8x8xf32>
    %c0_19 = arith.constant 0 : index
    %c0_20 = arith.constant 0 : index
    %c0_21 = arith.constant 0 : index
    %c0_22 = arith.constant 0 : index
    %30 = vector.load %arg6[%c0_19, %c0_20, %c0_21, %c0_22] : memref<2x4x1x8xf32, #tpu.memory_space<vmem>>, vector<1x1x1x8xf32>
    %31 = vector.shape_cast %30 : vector<1x1x1x8xf32> to vector<1x8xf32>
    %32 = vector.broadcast %31 : vector<1x8xf32> to vector<8x8xf32>
    %33 = arith.addf %29, %32 : vector<8x8xf32>
    %c0_23 = arith.constant 0 : index
    %c0_24 = arith.constant 0 : index
    %c0_25 = arith.constant 0 : index
    %c0_26 = arith.constant 0 : index
    %34 = vector.load %arg7[%c0_23, %c0_24, %c0_25, %c0_26] : memref<2x4x32x8xf32, #tpu.memory_space<vmem>>, vector<1x1x32x8xf32>
    %35 = vector.shape_cast %34 : vector<1x1x32x8xf32> to vector<32x8xf32>
    %cst_27 = arith.constant dense<0.000000e+00> : vector<8x8xf32>
    %36 = tpu.matmul %25, %35, %cst_27 {dimension_numbers = #tpu.dot_dimension_numbers<[1], [0], [0], [1], [0, 0, 1, 1], [], []>} : vector<8x32xf32>, vector<32x8xf32>, vector<8x8xf32> -> vector<8x8xf32>
    %c0_28 = arith.constant 0 : index
    %c0_29 = arith.constant 0 : index
    %c0_30 = arith.constant 0 : index
    %c0_31 = arith.constant 0 : index
    %37 = vector.load %arg8[%c0_28, %c0_29, %c0_30, %c0_31] : memref<2x4x1x8xf32, #tpu.memory_space<vmem>>, vector<1x1x1x8xf32>
    %38 = vector.shape_cast %37 : vector<1x1x1x8xf32> to vector<1x8xf32>
    %39 = vector.broadcast %38 : vector<1x8xf32> to vector<8x8xf32>
    %40 = arith.addf %36, %39 : vector<8x8xf32>
    %c0_32 = arith.constant 0 : index
    %c0_33 = arith.constant 0 : index
    %c0_34 = arith.constant 0 : index
    %c0_35 = arith.constant 0 : index
    %41 = vector.load %arg9[%c0_32, %c0_33, %c0_34, %c0_35] : memref<2x4x32x8xf32, #tpu.memory_space<vmem>>, vector<1x1x32x8xf32>
    %42 = vector.shape_cast %41 : vector<1x1x32x8xf32> to vector<32x8xf32>
    %cst_36 = arith.constant dense<0.000000e+00> : vector<8x8xf32>
    %43 = tpu.matmul %25, %42, %cst_36 {dimension_numbers = #tpu.dot_dimension_numbers<[1], [0], [0], [1], [0, 0, 1, 1], [], []>} : vector<8x32xf32>, vector<32x8xf32>, vector<8x8xf32> -> vector<8x8xf32>
    %c0_37 = arith.constant 0 : index
    %c0_38 = arith.constant 0 : index
    %c0_39 = arith.constant 0 : index
    %c0_40 = arith.constant 0 : index
    %44 = vector.load %arg10[%c0_37, %c0_38, %c0_39, %c0_40] : memref<2x4x1x8xf32, #tpu.memory_space<vmem>>, vector<1x1x1x8xf32>
    %45 = vector.shape_cast %44 : vector<1x1x1x8xf32> to vector<1x8xf32>
    %46 = vector.broadcast %45 : vector<1x8xf32> to vector<8x8xf32>
    %47 = arith.addf %43, %46 : vector<8x8xf32>
    %cst_41 = arith.constant dense<0.000000e+00> : vector<8x8xf32>
    %48 = tpu.matmul %33, %40, %cst_41 {dimension_numbers = #tpu.dot_dimension_numbers<[1], [1], [0], [0], [0, 0, 1, 0], [], []>} : vector<8x8xf32>, vector<8x8xf32>, vector<8x8xf32> -> vector<8x8xf32>
    %cst_42 = arith.constant 0.353553385 : f32
    %49 = vector.broadcast %cst_42 : f32 to vector<8x8xf32>
    %50 = arith.mulf %48, %49 : vector<8x8xf32>
    %51 = vector.broadcast %1 : vector<1x8xf32> to vector<8x8xf32>
    %52 = arith.addf %50, %51 : vector<8x8xf32>
    %cst_43 = arith.constant dense<0xFF800000> : vector<8xf32>
    %53 = vector.multi_reduction <maximumf>, %52, %cst_43 [1] : vector<8x8xf32> to vector<8xf32>
    %54 = vector.shape_cast %53 : vector<8xf32> to vector<8x1xf32>
    %55 = vector.broadcast %54 : vector<8x1xf32> to vector<8x8xf32>
    %56 = arith.subf %52, %55 : vector<8x8xf32>
    %57 = math.exp %56 : vector<8x8xf32>
    %cst_44 = arith.constant dense<0.000000e+00> : vector<8xf32>
    %58 = vector.multi_reduction <add>, %57, %cst_44 [1] : vector<8x8xf32> to vector<8xf32>
    %59 = vector.shape_cast %58 : vector<8xf32> to vector<8x1xf32>
    %60 = tpu.reciprocal %59 {approx = true} : vector<8x1xf32> -> vector<8x1xf32>
    %61 = vector.broadcast %60 : vector<8x1xf32> to vector<8x8xf32>
    %62 = arith.mulf %57, %61 : vector<8x8xf32>
    %cst_45 = arith.constant dense<0.000000e+00> : vector<8x8xf32>
    %63 = tpu.matmul %62, %47, %cst_45 {dimension_numbers = #tpu.dot_dimension_numbers<[1], [0], [0], [1], [0, 0, 1, 1], [], []>} : vector<8x8xf32>, vector<8x8xf32>, vector<8x8xf32> -> vector<8x8xf32>
    %c0_46 = arith.constant 0 : index
    %c0_47 = arith.constant 0 : index
    %c0_48 = arith.constant 0 : index
    %c0_49 = arith.constant 0 : index
    %64 = vector.load %arg11[%c0_46, %c0_47, %c0_48, %c0_49] : memref<2x4x8x32xf32, #tpu.memory_space<vmem>>, vector<1x1x8x32xf32>
    %65 = vector.shape_cast %64 : vector<1x1x8x32xf32> to vector<8x32xf32>
    %cst_50 = arith.constant dense<0.000000e+00> : vector<8x32xf32>
    %66 = tpu.matmul %63, %65, %cst_50 {dimension_numbers = #tpu.dot_dimension_numbers<[1], [0], [0], [1], [0, 0, 1, 1], [], []>} : vector<8x8xf32>, vector<8x32xf32>, vector<8x32xf32> -> vector<8x32xf32>
    %67 = arith.addf %26, %66 : vector<8x32xf32>
    %c0_51 = arith.constant 0 : index
    %c1 = arith.constant 1 : index
    %c0_52 = arith.constant 0 : index
    %c0_53 = arith.constant 0 : index
    %68 = vector.load %arg5[%c0_51, %c1, %c0_52, %c0_53] : memref<2x4x32x8xf32, #tpu.memory_space<vmem>>, vector<1x1x32x8xf32>
    %69 = vector.shape_cast %68 : vector<1x1x32x8xf32> to vector<32x8xf32>
    %cst_54 = arith.constant dense<0.000000e+00> : vector<8x8xf32>
    %70 = tpu.matmul %25, %69, %cst_54 {dimension_numbers = #tpu.dot_dimension_numbers<[1], [0], [0], [1], [0, 0, 1, 1], [], []>} : vector<8x32xf32>, vector<32x8xf32>, vector<8x8xf32> -> vector<8x8xf32>
    %c0_55 = arith.constant 0 : index
    %c1_56 = arith.constant 1 : index
    %c0_57 = arith.constant 0 : index
    %c0_58 = arith.constant 0 : index
    %71 = vector.load %arg6[%c0_55, %c1_56, %c0_57, %c0_58] : memref<2x4x1x8xf32, #tpu.memory_space<vmem>>, vector<1x1x1x8xf32>
    %72 = vector.shape_cast %71 : vector<1x1x1x8xf32> to vector<1x8xf32>
    %73 = vector.broadcast %72 : vector<1x8xf32> to vector<8x8xf32>
    %74 = arith.addf %70, %73 : vector<8x8xf32>
    %c0_59 = arith.constant 0 : index
    %c1_60 = arith.constant 1 : index
    %c0_61 = arith.constant 0 : index
    %c0_62 = arith.constant 0 : index
    %75 = vector.load %arg7[%c0_59, %c1_60, %c0_61, %c0_62] : memref<2x4x32x8xf32, #tpu.memory_space<vmem>>, vector<1x1x32x8xf32>
    %76 = vector.shape_cast %75 : vector<1x1x32x8xf32> to vector<32x8xf32>
    %cst_63 = arith.constant dense<0.000000e+00> : vector<8x8xf32>
    %77 = tpu.matmul %25, %76, %cst_63 {dimension_numbers = #tpu.dot_dimension_numbers<[1], [0], [0], [1], [0, 0, 1, 1], [], []>} : vector<8x32xf32>, vector<32x8xf32>, vector<8x8xf32> -> vector<8x8xf32>
    %c0_64 = arith.constant 0 : index
    %c1_65 = arith.constant 1 : index
    %c0_66 = arith.constant 0 : index
    %c0_67 = arith.constant 0 : index
    %78 = vector.load %arg8[%c0_64, %c1_65, %c0_66, %c0_67] : memref<2x4x1x8xf32, #tpu.memory_space<vmem>>, vector<1x1x1x8xf32>
    %79 = vector.shape_cast %78 : vector<1x1x1x8xf32> to vector<1x8xf32>
    %80 = vector.broadcast %79 : vector<1x8xf32> to vector<8x8xf32>
    %81 = arith.addf %77, %80 : vector<8x8xf32>
    %c0_68 = arith.constant 0 : index
    %c1_69 = arith.constant 1 : index
    %c0_70 = arith.constant 0 : index
    %c0_71 = arith.constant 0 : index
    %82 = vector.load %arg9[%c0_68, %c1_69, %c0_70, %c0_71] : memref<2x4x32x8xf32, #tpu.memory_space<vmem>>, vector<1x1x32x8xf32>
    %83 = vector.shape_cast %82 : vector<1x1x32x8xf32> to vector<32x8xf32>
    %cst_72 = arith.constant dense<0.000000e+00> : vector<8x8xf32>
    %84 = tpu.matmul %25, %83, %cst_72 {dimension_numbers = #tpu.dot_dimension_numbers<[1], [0], [0], [1], [0, 0, 1, 1], [], []>} : vector<8x32xf32>, vector<32x8xf32>, vector<8x8xf32> -> vector<8x8xf32>
    %c0_73 = arith.constant 0 : index
    %c1_74 = arith.constant 1 : index
    %c0_75 = arith.constant 0 : index
    %c0_76 = arith.constant 0 : index
    %85 = vector.load %arg10[%c0_73, %c1_74, %c0_75, %c0_76] : memref<2x4x1x8xf32, #tpu.memory_space<vmem>>, vector<1x1x1x8xf32>
    %86 = vector.shape_cast %85 : vector<1x1x1x8xf32> to vector<1x8xf32>
    %87 = vector.broadcast %86 : vector<1x8xf32> to vector<8x8xf32>
    %88 = arith.addf %84, %87 : vector<8x8xf32>
    %cst_77 = arith.constant dense<0.000000e+00> : vector<8x8xf32>
    %89 = tpu.matmul %74, %81, %cst_77 {dimension_numbers = #tpu.dot_dimension_numbers<[1], [1], [0], [0], [0, 0, 1, 0], [], []>} : vector<8x8xf32>, vector<8x8xf32>, vector<8x8xf32> -> vector<8x8xf32>
    %cst_78 = arith.constant 0.353553385 : f32
    %90 = vector.broadcast %cst_78 : f32 to vector<8x8xf32>
    %91 = arith.mulf %89, %90 : vector<8x8xf32>
    %92 = vector.broadcast %1 : vector<1x8xf32> to vector<8x8xf32>
    %93 = arith.addf %91, %92 : vector<8x8xf32>
    %cst_79 = arith.constant dense<0xFF800000> : vector<8xf32>
    %94 = vector.multi_reduction <maximumf>, %93, %cst_79 [1] : vector<8x8xf32> to vector<8xf32>
    %95 = vector.shape_cast %94 : vector<8xf32> to vector<8x1xf32>
    %96 = vector.broadcast %95 : vector<8x1xf32> to vector<8x8xf32>
    %97 = arith.subf %93, %96 : vector<8x8xf32>
    %98 = math.exp %97 : vector<8x8xf32>
    %cst_80 = arith.constant dense<0.000000e+00> : vector<8xf32>
    %99 = vector.multi_reduction <add>, %98, %cst_80 [1] : vector<8x8xf32> to vector<8xf32>
    %100 = vector.shape_cast %99 : vector<8xf32> to vector<8x1xf32>
    %101 = tpu.reciprocal %100 {approx = true} : vector<8x1xf32> -> vector<8x1xf32>
    %102 = vector.broadcast %101 : vector<8x1xf32> to vector<8x8xf32>
    %103 = arith.mulf %98, %102 : vector<8x8xf32>
    %cst_81 = arith.constant dense<0.000000e+00> : vector<8x8xf32>
    %104 = tpu.matmul %103, %88, %cst_81 {dimension_numbers = #tpu.dot_dimension_numbers<[1], [0], [0], [1], [0, 0, 1, 1], [], []>} : vector<8x8xf32>, vector<8x8xf32>, vector<8x8xf32> -> vector<8x8xf32>
    %c0_82 = arith.constant 0 : index
    %c1_83 = arith.constant 1 : index
    %c0_84 = arith.constant 0 : index
    %c0_85 = arith.constant 0 : index
    %105 = vector.load %arg11[%c0_82, %c1_83, %c0_84, %c0_85] : memref<2x4x8x32xf32, #tpu.memory_space<vmem>>, vector<1x1x8x32xf32>
    %106 = vector.shape_cast %105 : vector<1x1x8x32xf32> to vector<8x32xf32>
    %cst_86 = arith.constant dense<0.000000e+00> : vector<8x32xf32>
    %107 = tpu.matmul %104, %106, %cst_86 {dimension_numbers = #tpu.dot_dimension_numbers<[1], [0], [0], [1], [0, 0, 1, 1], [], []>} : vector<8x8xf32>, vector<8x32xf32>, vector<8x32xf32> -> vector<8x32xf32>
    %108 = arith.addf %67, %107 : vector<8x32xf32>
    %c0_87 = arith.constant 0 : index
    %c2 = arith.constant 2 : index
    %c0_88 = arith.constant 0 : index
    %c0_89 = arith.constant 0 : index
    %109 = vector.load %arg5[%c0_87, %c2, %c0_88, %c0_89] : memref<2x4x32x8xf32, #tpu.memory_space<vmem>>, vector<1x1x32x8xf32>
    %110 = vector.shape_cast %109 : vector<1x1x32x8xf32> to vector<32x8xf32>
    %cst_90 = arith.constant dense<0.000000e+00> : vector<8x8xf32>
    %111 = tpu.matmul %25, %110, %cst_90 {dimension_numbers = #tpu.dot_dimension_numbers<[1], [0], [0], [1], [0, 0, 1, 1], [], []>} : vector<8x32xf32>, vector<32x8xf32>, vector<8x8xf32> -> vector<8x8xf32>
    %c0_91 = arith.constant 0 : index
    %c2_92 = arith.constant 2 : index
    %c0_93 = arith.constant 0 : index
    %c0_94 = arith.constant 0 : index
    %112 = vector.load %arg6[%c0_91, %c2_92, %c0_93, %c0_94] : memref<2x4x1x8xf32, #tpu.memory_space<vmem>>, vector<1x1x1x8xf32>
    %113 = vector.shape_cast %112 : vector<1x1x1x8xf32> to vector<1x8xf32>
    %114 = vector.broadcast %113 : vector<1x8xf32> to vector<8x8xf32>
    %115 = arith.addf %111, %114 : vector<8x8xf32>
    %c0_95 = arith.constant 0 : index
    %c2_96 = arith.constant 2 : index
    %c0_97 = arith.constant 0 : index
    %c0_98 = arith.constant 0 : index
    %116 = vector.load %arg7[%c0_95, %c2_96, %c0_97, %c0_98] : memref<2x4x32x8xf32, #tpu.memory_space<vmem>>, vector<1x1x32x8xf32>
    %117 = vector.shape_cast %116 : vector<1x1x32x8xf32> to vector<32x8xf32>
    %cst_99 = arith.constant dense<0.000000e+00> : vector<8x8xf32>
    %118 = tpu.matmul %25, %117, %cst_99 {dimension_numbers = #tpu.dot_dimension_numbers<[1], [0], [0], [1], [0, 0, 1, 1], [], []>} : vector<8x32xf32>, vector<32x8xf32>, vector<8x8xf32> -> vector<8x8xf32>
    %c0_100 = arith.constant 0 : index
    %c2_101 = arith.constant 2 : index
    %c0_102 = arith.constant 0 : index
    %c0_103 = arith.constant 0 : index
    %119 = vector.load %arg8[%c0_100, %c2_101, %c0_102, %c0_103] : memref<2x4x1x8xf32, #tpu.memory_space<vmem>>, vector<1x1x1x8xf32>
    %120 = vector.shape_cast %119 : vector<1x1x1x8xf32> to vector<1x8xf32>
    %121 = vector.broadcast %120 : vector<1x8xf32> to vector<8x8xf32>
    %122 = arith.addf %118, %121 : vector<8x8xf32>
    %c0_104 = arith.constant 0 : index
    %c2_105 = arith.constant 2 : index
    %c0_106 = arith.constant 0 : index
    %c0_107 = arith.constant 0 : index
    %123 = vector.load %arg9[%c0_104, %c2_105, %c0_106, %c0_107] : memref<2x4x32x8xf32, #tpu.memory_space<vmem>>, vector<1x1x32x8xf32>
    %124 = vector.shape_cast %123 : vector<1x1x32x8xf32> to vector<32x8xf32>
    %cst_108 = arith.constant dense<0.000000e+00> : vector<8x8xf32>
    %125 = tpu.matmul %25, %124, %cst_108 {dimension_numbers = #tpu.dot_dimension_numbers<[1], [0], [0], [1], [0, 0, 1, 1], [], []>} : vector<8x32xf32>, vector<32x8xf32>, vector<8x8xf32> -> vector<8x8xf32>
    %c0_109 = arith.constant 0 : index
    %c2_110 = arith.constant 2 : index
    %c0_111 = arith.constant 0 : index
    %c0_112 = arith.constant 0 : index
    %126 = vector.load %arg10[%c0_109, %c2_110, %c0_111, %c0_112] : memref<2x4x1x8xf32, #tpu.memory_space<vmem>>, vector<1x1x1x8xf32>
    %127 = vector.shape_cast %126 : vector<1x1x1x8xf32> to vector<1x8xf32>
    %128 = vector.broadcast %127 : vector<1x8xf32> to vector<8x8xf32>
    %129 = arith.addf %125, %128 : vector<8x8xf32>
    %cst_113 = arith.constant dense<0.000000e+00> : vector<8x8xf32>
    %130 = tpu.matmul %115, %122, %cst_113 {dimension_numbers = #tpu.dot_dimension_numbers<[1], [1], [0], [0], [0, 0, 1, 0], [], []>} : vector<8x8xf32>, vector<8x8xf32>, vector<8x8xf32> -> vector<8x8xf32>
    %cst_114 = arith.constant 0.353553385 : f32
    %131 = vector.broadcast %cst_114 : f32 to vector<8x8xf32>
    %132 = arith.mulf %130, %131 : vector<8x8xf32>
    %133 = vector.broadcast %1 : vector<1x8xf32> to vector<8x8xf32>
    %134 = arith.addf %132, %133 : vector<8x8xf32>
    %cst_115 = arith.constant dense<0xFF800000> : vector<8xf32>
    %135 = vector.multi_reduction <maximumf>, %134, %cst_115 [1] : vector<8x8xf32> to vector<8xf32>
    %136 = vector.shape_cast %135 : vector<8xf32> to vector<8x1xf32>
    %137 = vector.broadcast %136 : vector<8x1xf32> to vector<8x8xf32>
    %138 = arith.subf %134, %137 : vector<8x8xf32>
    %139 = math.exp %138 : vector<8x8xf32>
    %cst_116 = arith.constant dense<0.000000e+00> : vector<8xf32>
    %140 = vector.multi_reduction <add>, %139, %cst_116 [1] : vector<8x8xf32> to vector<8xf32>
    %141 = vector.shape_cast %140 : vector<8xf32> to vector<8x1xf32>
    %142 = tpu.reciprocal %141 {approx = true} : vector<8x1xf32> -> vector<8x1xf32>
    %143 = vector.broadcast %142 : vector<8x1xf32> to vector<8x8xf32>
    %144 = arith.mulf %139, %143 : vector<8x8xf32>
    %cst_117 = arith.constant dense<0.000000e+00> : vector<8x8xf32>
    %145 = tpu.matmul %144, %129, %cst_117 {dimension_numbers = #tpu.dot_dimension_numbers<[1], [0], [0], [1], [0, 0, 1, 1], [], []>} : vector<8x8xf32>, vector<8x8xf32>, vector<8x8xf32> -> vector<8x8xf32>
    %c0_118 = arith.constant 0 : index
    %c2_119 = arith.constant 2 : index
    %c0_120 = arith.constant 0 : index
    %c0_121 = arith.constant 0 : index
    %146 = vector.load %arg11[%c0_118, %c2_119, %c0_120, %c0_121] : memref<2x4x8x32xf32, #tpu.memory_space<vmem>>, vector<1x1x8x32xf32>
    %147 = vector.shape_cast %146 : vector<1x1x8x32xf32> to vector<8x32xf32>
    %cst_122 = arith.constant dense<0.000000e+00> : vector<8x32xf32>
    %148 = tpu.matmul %145, %147, %cst_122 {dimension_numbers = #tpu.dot_dimension_numbers<[1], [0], [0], [1], [0, 0, 1, 1], [], []>} : vector<8x8xf32>, vector<8x32xf32>, vector<8x32xf32> -> vector<8x32xf32>
    %149 = arith.addf %108, %148 : vector<8x32xf32>
    %c0_123 = arith.constant 0 : index
    %c3 = arith.constant 3 : index
    %c0_124 = arith.constant 0 : index
    %c0_125 = arith.constant 0 : index
    %150 = vector.load %arg5[%c0_123, %c3, %c0_124, %c0_125] : memref<2x4x32x8xf32, #tpu.memory_space<vmem>>, vector<1x1x32x8xf32>
    %151 = vector.shape_cast %150 : vector<1x1x32x8xf32> to vector<32x8xf32>
    %cst_126 = arith.constant dense<0.000000e+00> : vector<8x8xf32>
    %152 = tpu.matmul %25, %151, %cst_126 {dimension_numbers = #tpu.dot_dimension_numbers<[1], [0], [0], [1], [0, 0, 1, 1], [], []>} : vector<8x32xf32>, vector<32x8xf32>, vector<8x8xf32> -> vector<8x8xf32>
    %c0_127 = arith.constant 0 : index
    %c3_128 = arith.constant 3 : index
    %c0_129 = arith.constant 0 : index
    %c0_130 = arith.constant 0 : index
    %153 = vector.load %arg6[%c0_127, %c3_128, %c0_129, %c0_130] : memref<2x4x1x8xf32, #tpu.memory_space<vmem>>, vector<1x1x1x8xf32>
    %154 = vector.shape_cast %153 : vector<1x1x1x8xf32> to vector<1x8xf32>
    %155 = vector.broadcast %154 : vector<1x8xf32> to vector<8x8xf32>
    %156 = arith.addf %152, %155 : vector<8x8xf32>
    %c0_131 = arith.constant 0 : index
    %c3_132 = arith.constant 3 : index
    %c0_133 = arith.constant 0 : index
    %c0_134 = arith.constant 0 : index
    %157 = vector.load %arg7[%c0_131, %c3_132, %c0_133, %c0_134] : memref<2x4x32x8xf32, #tpu.memory_space<vmem>>, vector<1x1x32x8xf32>
    %158 = vector.shape_cast %157 : vector<1x1x32x8xf32> to vector<32x8xf32>
    %cst_135 = arith.constant dense<0.000000e+00> : vector<8x8xf32>
    %159 = tpu.matmul %25, %158, %cst_135 {dimension_numbers = #tpu.dot_dimension_numbers<[1], [0], [0], [1], [0, 0, 1, 1], [], []>} : vector<8x32xf32>, vector<32x8xf32>, vector<8x8xf32> -> vector<8x8xf32>
    %c0_136 = arith.constant 0 : index
    %c3_137 = arith.constant 3 : index
    %c0_138 = arith.constant 0 : index
    %c0_139 = arith.constant 0 : index
    %160 = vector.load %arg8[%c0_136, %c3_137, %c0_138, %c0_139] : memref<2x4x1x8xf32, #tpu.memory_space<vmem>>, vector<1x1x1x8xf32>
    %161 = vector.shape_cast %160 : vector<1x1x1x8xf32> to vector<1x8xf32>
    %162 = vector.broadcast %161 : vector<1x8xf32> to vector<8x8xf32>
    %163 = arith.addf %159, %162 : vector<8x8xf32>
    %c0_140 = arith.constant 0 : index
    %c3_141 = arith.constant 3 : index
    %c0_142 = arith.constant 0 : index
    %c0_143 = arith.constant 0 : index
    %164 = vector.load %arg9[%c0_140, %c3_141, %c0_142, %c0_143] : memref<2x4x32x8xf32, #tpu.memory_space<vmem>>, vector<1x1x32x8xf32>
    %165 = vector.shape_cast %164 : vector<1x1x32x8xf32> to vector<32x8xf32>
    %cst_144 = arith.constant dense<0.000000e+00> : vector<8x8xf32>
    %166 = tpu.matmul %25, %165, %cst_144 {dimension_numbers = #tpu.dot_dimension_numbers<[1], [0], [0], [1], [0, 0, 1, 1], [], []>} : vector<8x32xf32>, vector<32x8xf32>, vector<8x8xf32> -> vector<8x8xf32>
    %c0_145 = arith.constant 0 : index
    %c3_146 = arith.constant 3 : index
    %c0_147 = arith.constant 0 : index
    %c0_148 = arith.constant 0 : index
    %167 = vector.load %arg10[%c0_145, %c3_146, %c0_147, %c0_148] : memref<2x4x1x8xf32, #tpu.memory_space<vmem>>, vector<1x1x1x8xf32>
    %168 = vector.shape_cast %167 : vector<1x1x1x8xf32> to vector<1x8xf32>
    %169 = vector.broadcast %168 : vector<1x8xf32> to vector<8x8xf32>
    %170 = arith.addf %166, %169 : vector<8x8xf32>
    %cst_149 = arith.constant dense<0.000000e+00> : vector<8x8xf32>
    %171 = tpu.matmul %156, %163, %cst_149 {dimension_numbers = #tpu.dot_dimension_numbers<[1], [1], [0], [0], [0, 0, 1, 0], [], []>} : vector<8x8xf32>, vector<8x8xf32>, vector<8x8xf32> -> vector<8x8xf32>
    %cst_150 = arith.constant 0.353553385 : f32
    %172 = vector.broadcast %cst_150 : f32 to vector<8x8xf32>
    %173 = arith.mulf %171, %172 : vector<8x8xf32>
    %174 = vector.broadcast %1 : vector<1x8xf32> to vector<8x8xf32>
    %175 = arith.addf %173, %174 : vector<8x8xf32>
    %cst_151 = arith.constant dense<0xFF800000> : vector<8xf32>
    %176 = vector.multi_reduction <maximumf>, %175, %cst_151 [1] : vector<8x8xf32> to vector<8xf32>
    %177 = vector.shape_cast %176 : vector<8xf32> to vector<8x1xf32>
    %178 = vector.broadcast %177 : vector<8x1xf32> to vector<8x8xf32>
    %179 = arith.subf %175, %178 : vector<8x8xf32>
    %180 = math.exp %179 : vector<8x8xf32>
    %cst_152 = arith.constant dense<0.000000e+00> : vector<8xf32>
    %181 = vector.multi_reduction <add>, %180, %cst_152 [1] : vector<8x8xf32> to vector<8xf32>
    %182 = vector.shape_cast %181 : vector<8xf32> to vector<8x1xf32>
    %183 = tpu.reciprocal %182 {approx = true} : vector<8x1xf32> -> vector<8x1xf32>
    %184 = vector.broadcast %183 : vector<8x1xf32> to vector<8x8xf32>
    %185 = arith.mulf %180, %184 : vector<8x8xf32>
    %cst_153 = arith.constant dense<0.000000e+00> : vector<8x8xf32>
    %186 = tpu.matmul %185, %170, %cst_153 {dimension_numbers = #tpu.dot_dimension_numbers<[1], [0], [0], [1], [0, 0, 1, 1], [], []>} : vector<8x8xf32>, vector<8x8xf32>, vector<8x8xf32> -> vector<8x8xf32>
    %c0_154 = arith.constant 0 : index
    %c3_155 = arith.constant 3 : index
    %c0_156 = arith.constant 0 : index
    %c0_157 = arith.constant 0 : index
    %187 = vector.load %arg11[%c0_154, %c3_155, %c0_156, %c0_157] : memref<2x4x8x32xf32, #tpu.memory_space<vmem>>, vector<1x1x8x32xf32>
    %188 = vector.shape_cast %187 : vector<1x1x8x32xf32> to vector<8x32xf32>
    %cst_158 = arith.constant dense<0.000000e+00> : vector<8x32xf32>
    %189 = tpu.matmul %186, %188, %cst_158 {dimension_numbers = #tpu.dot_dimension_numbers<[1], [0], [0], [1], [0, 0, 1, 1], [], []>} : vector<8x8xf32>, vector<8x32xf32>, vector<8x32xf32> -> vector<8x32xf32>
    %190 = arith.addf %149, %189 : vector<8x32xf32>
    %c0_159 = arith.constant 0 : index
    %c0_160 = arith.constant 0 : index
    %c0_161 = arith.constant 0 : index
    %191 = vector.load %arg12[%c0_159, %c0_160, %c0_161] : memref<2x1x32xf32, #tpu.memory_space<vmem>>, vector<1x1x32xf32>
    %192 = vector.shape_cast %191 : vector<1x1x32xf32> to vector<1x32xf32>
    %193 = vector.broadcast %192 : vector<1x32xf32> to vector<8x32xf32>
    %194 = arith.addf %190, %193 : vector<8x32xf32>
    %195 = arith.addf %194, %25 : vector<8x32xf32>
    %c0_162 = arith.constant 0 : index
    %c0_163 = arith.constant 0 : index
    %c0_164 = arith.constant 0 : index
    %196 = vector.load %arg13[%c0_162, %c0_163, %c0_164] : memref<2x1x32xf32, #tpu.memory_space<vmem>>, vector<1x1x32xf32>
    %197 = vector.shape_cast %196 : vector<1x1x32xf32> to vector<1x32xf32>
    %c0_165 = arith.constant 0 : index
    %c0_166 = arith.constant 0 : index
    %c0_167 = arith.constant 0 : index
    %198 = vector.load %arg14[%c0_165, %c0_166, %c0_167] : memref<2x1x32xf32, #tpu.memory_space<vmem>>, vector<1x1x32xf32>
    %199 = vector.shape_cast %198 : vector<1x1x32xf32> to vector<1x32xf32>
    %cst_168 = arith.constant dense<0.000000e+00> : vector<8xf32>
    %200 = vector.multi_reduction <add>, %195, %cst_168 [1] : vector<8x32xf32> to vector<8xf32>
    %201 = vector.shape_cast %200 : vector<8xf32> to vector<8x1xf32>
    %cst_169 = arith.constant 3.200000e+01 : f32
    %202 = vector.broadcast %cst_169 : f32 to vector<8x1xf32>
    %203 = arith.divf %201, %202 : vector<8x1xf32>
    %204 = vector.broadcast %203 : vector<8x1xf32> to vector<8x32xf32>
    %205 = arith.subf %195, %204 : vector<8x32xf32>
    %206 = arith.mulf %205, %205 : vector<8x32xf32>
    %cst_170 = arith.constant dense<0.000000e+00> : vector<8xf32>
    %207 = vector.multi_reduction <add>, %206, %cst_170 [1] : vector<8x32xf32> to vector<8xf32>
    %208 = vector.shape_cast %207 : vector<8xf32> to vector<8x1xf32>
    %cst_171 = arith.constant 3.200000e+01 : f32
    %209 = vector.broadcast %cst_171 : f32 to vector<8x1xf32>
    %210 = arith.divf %208, %209 : vector<8x1xf32>
    %cst_172 = arith.constant 9.99999996E-13 : f32
    %211 = vector.broadcast %cst_172 : f32 to vector<8x1xf32>
    %212 = arith.addf %210, %211 : vector<8x1xf32>
    %213 = math.rsqrt %212 : vector<8x1xf32>
    %214 = vector.broadcast %213 : vector<8x1xf32> to vector<8x32xf32>
    %215 = arith.mulf %205, %214 : vector<8x32xf32>
    %216 = vector.broadcast %197 : vector<1x32xf32> to vector<8x32xf32>
    %217 = arith.mulf %215, %216 : vector<8x32xf32>
    %218 = vector.broadcast %199 : vector<1x32xf32> to vector<8x32xf32>
    %219 = arith.addf %217, %218 : vector<8x32xf32>
    %c0_173 = arith.constant 0 : index
    %c0_174 = arith.constant 0 : index
    %c0_175 = arith.constant 0 : index
    %220 = vector.load %arg15[%c0_173, %c0_174, %c0_175] : memref<2x32x64xf32, #tpu.memory_space<vmem>>, vector<1x32x64xf32>
    %221 = vector.shape_cast %220 : vector<1x32x64xf32> to vector<32x64xf32>
    %cst_176 = arith.constant dense<0.000000e+00> : vector<8x64xf32>
    %222 = tpu.matmul %219, %221, %cst_176 {dimension_numbers = #tpu.dot_dimension_numbers<[1], [0], [0], [1], [0, 0, 1, 1], [], []>} : vector<8x32xf32>, vector<32x64xf32>, vector<8x64xf32> -> vector<8x64xf32>
    %c0_177 = arith.constant 0 : index
    %c0_178 = arith.constant 0 : index
    %c0_179 = arith.constant 0 : index
    %223 = vector.load %arg16[%c0_177, %c0_178, %c0_179] : memref<2x1x64xf32, #tpu.memory_space<vmem>>, vector<1x1x64xf32>
    %224 = vector.shape_cast %223 : vector<1x1x64xf32> to vector<1x64xf32>
    %225 = vector.broadcast %224 : vector<1x64xf32> to vector<8x64xf32>
    %226 = arith.addf %222, %225 : vector<8x64xf32>
    %cst_180 = arith.constant 5.000000e-01 : f32
    %227 = vector.broadcast %cst_180 : f32 to vector<8x64xf32>
    %228 = arith.mulf %227, %226 : vector<8x64xf32>
    %cst_181 = arith.constant 4.471500e-02 : f32
    %229 = vector.broadcast %cst_181 : f32 to vector<8x64xf32>
    %230 = arith.mulf %229, %226 : vector<8x64xf32>
    %231 = arith.mulf %230, %226 : vector<8x64xf32>
    %232 = arith.mulf %231, %226 : vector<8x64xf32>
    %233 = arith.addf %226, %232 : vector<8x64xf32>
    %cst_182 = arith.constant 0.797884583 : f32
    %234 = vector.broadcast %cst_182 : f32 to vector<8x64xf32>
    %235 = arith.mulf %234, %233 : vector<8x64xf32>
    %236 = math.tanh %235 : vector<8x64xf32>
    %cst_183 = arith.constant 1.000000e+00 : f32
    %237 = vector.broadcast %cst_183 : f32 to vector<8x64xf32>
    %238 = arith.addf %237, %236 : vector<8x64xf32>
    %239 = arith.mulf %228, %238 : vector<8x64xf32>
    %c0_184 = arith.constant 0 : index
    %c0_185 = arith.constant 0 : index
    %c0_186 = arith.constant 0 : index
    %240 = vector.load %arg17[%c0_184, %c0_185, %c0_186] : memref<2x64x32xf32, #tpu.memory_space<vmem>>, vector<1x64x32xf32>
    %241 = vector.shape_cast %240 : vector<1x64x32xf32> to vector<64x32xf32>
    %cst_187 = arith.constant dense<0.000000e+00> : vector<8x32xf32>
    %242 = tpu.matmul %239, %241, %cst_187 {dimension_numbers = #tpu.dot_dimension_numbers<[1], [0], [0], [1], [0, 0, 1, 1], [], []>} : vector<8x64xf32>, vector<64x32xf32>, vector<8x32xf32> -> vector<8x32xf32>
    %c0_188 = arith.constant 0 : index
    %c0_189 = arith.constant 0 : index
    %c0_190 = arith.constant 0 : index
    %243 = vector.load %arg18[%c0_188, %c0_189, %c0_190] : memref<2x1x32xf32, #tpu.memory_space<vmem>>, vector<1x1x32xf32>
    %244 = vector.shape_cast %243 : vector<1x1x32xf32> to vector<1x32xf32>
    %245 = vector.broadcast %244 : vector<1x32xf32> to vector<8x32xf32>
    %246 = arith.addf %242, %245 : vector<8x32xf32>
    %247 = arith.addf %246, %219 : vector<8x32xf32>
    %c0_191 = arith.constant 0 : index
    %c0_192 = arith.constant 0 : index
    %c0_193 = arith.constant 0 : index
    %248 = vector.load %arg19[%c0_191, %c0_192, %c0_193] : memref<2x1x32xf32, #tpu.memory_space<vmem>>, vector<1x1x32xf32>
    %249 = vector.shape_cast %248 : vector<1x1x32xf32> to vector<1x32xf32>
    %c0_194 = arith.constant 0 : index
    %c0_195 = arith.constant 0 : index
    %c0_196 = arith.constant 0 : index
    %250 = vector.load %arg20[%c0_194, %c0_195, %c0_196] : memref<2x1x32xf32, #tpu.memory_space<vmem>>, vector<1x1x32xf32>
    %251 = vector.shape_cast %250 : vector<1x1x32xf32> to vector<1x32xf32>
    %cst_197 = arith.constant dense<0.000000e+00> : vector<8xf32>
    %252 = vector.multi_reduction <add>, %247, %cst_197 [1] : vector<8x32xf32> to vector<8xf32>
    %253 = vector.shape_cast %252 : vector<8xf32> to vector<8x1xf32>
    %cst_198 = arith.constant 3.200000e+01 : f32
    %254 = vector.broadcast %cst_198 : f32 to vector<8x1xf32>
    %255 = arith.divf %253, %254 : vector<8x1xf32>
    %256 = vector.broadcast %255 : vector<8x1xf32> to vector<8x32xf32>
    %257 = arith.subf %247, %256 : vector<8x32xf32>
    %258 = arith.mulf %257, %257 : vector<8x32xf32>
    %cst_199 = arith.constant dense<0.000000e+00> : vector<8xf32>
    %259 = vector.multi_reduction <add>, %258, %cst_199 [1] : vector<8x32xf32> to vector<8xf32>
    %260 = vector.shape_cast %259 : vector<8xf32> to vector<8x1xf32>
    %cst_200 = arith.constant 3.200000e+01 : f32
    %261 = vector.broadcast %cst_200 : f32 to vector<8x1xf32>
    %262 = arith.divf %260, %261 : vector<8x1xf32>
    %cst_201 = arith.constant 9.99999996E-13 : f32
    %263 = vector.broadcast %cst_201 : f32 to vector<8x1xf32>
    %264 = arith.addf %262, %263 : vector<8x1xf32>
    %265 = math.rsqrt %264 : vector<8x1xf32>
    %266 = vector.broadcast %265 : vector<8x1xf32> to vector<8x32xf32>
    %267 = arith.mulf %257, %266 : vector<8x32xf32>
    %268 = vector.broadcast %249 : vector<1x32xf32> to vector<8x32xf32>
    %269 = arith.mulf %267, %268 : vector<8x32xf32>
    %270 = vector.broadcast %251 : vector<1x32xf32> to vector<8x32xf32>
    %271 = arith.addf %269, %270 : vector<8x32xf32>
    %cst_202 = arith.constant 0.000000e+00 : f32
    %272 = vector.broadcast %cst_202 : f32 to vector<8x32xf32>
    %c1_203 = arith.constant 1 : index
    %c0_204 = arith.constant 0 : index
    %c0_205 = arith.constant 0 : index
    %c0_206 = arith.constant 0 : index
    %273 = vector.load %arg5[%c1_203, %c0_204, %c0_205, %c0_206] : memref<2x4x32x8xf32, #tpu.memory_space<vmem>>, vector<1x1x32x8xf32>
    %274 = vector.shape_cast %273 : vector<1x1x32x8xf32> to vector<32x8xf32>
    %cst_207 = arith.constant dense<0.000000e+00> : vector<8x8xf32>
    %275 = tpu.matmul %271, %274, %cst_207 {dimension_numbers = #tpu.dot_dimension_numbers<[1], [0], [0], [1], [0, 0, 1, 1], [], []>} : vector<8x32xf32>, vector<32x8xf32>, vector<8x8xf32> -> vector<8x8xf32>
    %c1_208 = arith.constant 1 : index
    %c0_209 = arith.constant 0 : index
    %c0_210 = arith.constant 0 : index
    %c0_211 = arith.constant 0 : index
    %276 = vector.load %arg6[%c1_208, %c0_209, %c0_210, %c0_211] : memref<2x4x1x8xf32, #tpu.memory_space<vmem>>, vector<1x1x1x8xf32>
    %277 = vector.shape_cast %276 : vector<1x1x1x8xf32> to vector<1x8xf32>
    %278 = vector.broadcast %277 : vector<1x8xf32> to vector<8x8xf32>
    %279 = arith.addf %275, %278 : vector<8x8xf32>
    %c1_212 = arith.constant 1 : index
    %c0_213 = arith.constant 0 : index
    %c0_214 = arith.constant 0 : index
    %c0_215 = arith.constant 0 : index
    %280 = vector.load %arg7[%c1_212, %c0_213, %c0_214, %c0_215] : memref<2x4x32x8xf32, #tpu.memory_space<vmem>>, vector<1x1x32x8xf32>
    %281 = vector.shape_cast %280 : vector<1x1x32x8xf32> to vector<32x8xf32>
    %cst_216 = arith.constant dense<0.000000e+00> : vector<8x8xf32>
    %282 = tpu.matmul %271, %281, %cst_216 {dimension_numbers = #tpu.dot_dimension_numbers<[1], [0], [0], [1], [0, 0, 1, 1], [], []>} : vector<8x32xf32>, vector<32x8xf32>, vector<8x8xf32> -> vector<8x8xf32>
    %c1_217 = arith.constant 1 : index
    %c0_218 = arith.constant 0 : index
    %c0_219 = arith.constant 0 : index
    %c0_220 = arith.constant 0 : index
    %283 = vector.load %arg8[%c1_217, %c0_218, %c0_219, %c0_220] : memref<2x4x1x8xf32, #tpu.memory_space<vmem>>, vector<1x1x1x8xf32>
    %284 = vector.shape_cast %283 : vector<1x1x1x8xf32> to vector<1x8xf32>
    %285 = vector.broadcast %284 : vector<1x8xf32> to vector<8x8xf32>
    %286 = arith.addf %282, %285 : vector<8x8xf32>
    %c1_221 = arith.constant 1 : index
    %c0_222 = arith.constant 0 : index
    %c0_223 = arith.constant 0 : index
    %c0_224 = arith.constant 0 : index
    %287 = vector.load %arg9[%c1_221, %c0_222, %c0_223, %c0_224] : memref<2x4x32x8xf32, #tpu.memory_space<vmem>>, vector<1x1x32x8xf32>
    %288 = vector.shape_cast %287 : vector<1x1x32x8xf32> to vector<32x8xf32>
    %cst_225 = arith.constant dense<0.000000e+00> : vector<8x8xf32>
    %289 = tpu.matmul %271, %288, %cst_225 {dimension_numbers = #tpu.dot_dimension_numbers<[1], [0], [0], [1], [0, 0, 1, 1], [], []>} : vector<8x32xf32>, vector<32x8xf32>, vector<8x8xf32> -> vector<8x8xf32>
    %c1_226 = arith.constant 1 : index
    %c0_227 = arith.constant 0 : index
    %c0_228 = arith.constant 0 : index
    %c0_229 = arith.constant 0 : index
    %290 = vector.load %arg10[%c1_226, %c0_227, %c0_228, %c0_229] : memref<2x4x1x8xf32, #tpu.memory_space<vmem>>, vector<1x1x1x8xf32>
    %291 = vector.shape_cast %290 : vector<1x1x1x8xf32> to vector<1x8xf32>
    %292 = vector.broadcast %291 : vector<1x8xf32> to vector<8x8xf32>
    %293 = arith.addf %289, %292 : vector<8x8xf32>
    %cst_230 = arith.constant dense<0.000000e+00> : vector<8x8xf32>
    %294 = tpu.matmul %279, %286, %cst_230 {dimension_numbers = #tpu.dot_dimension_numbers<[1], [1], [0], [0], [0, 0, 1, 0], [], []>} : vector<8x8xf32>, vector<8x8xf32>, vector<8x8xf32> -> vector<8x8xf32>
    %cst_231 = arith.constant 0.353553385 : f32
    %295 = vector.broadcast %cst_231 : f32 to vector<8x8xf32>
    %296 = arith.mulf %294, %295 : vector<8x8xf32>
    %297 = vector.broadcast %1 : vector<1x8xf32> to vector<8x8xf32>
    %298 = arith.addf %296, %297 : vector<8x8xf32>
    %cst_232 = arith.constant dense<0xFF800000> : vector<8xf32>
    %299 = vector.multi_reduction <maximumf>, %298, %cst_232 [1] : vector<8x8xf32> to vector<8xf32>
    %300 = vector.shape_cast %299 : vector<8xf32> to vector<8x1xf32>
    %301 = vector.broadcast %300 : vector<8x1xf32> to vector<8x8xf32>
    %302 = arith.subf %298, %301 : vector<8x8xf32>
    %303 = math.exp %302 : vector<8x8xf32>
    %cst_233 = arith.constant dense<0.000000e+00> : vector<8xf32>
    %304 = vector.multi_reduction <add>, %303, %cst_233 [1] : vector<8x8xf32> to vector<8xf32>
    %305 = vector.shape_cast %304 : vector<8xf32> to vector<8x1xf32>
    %306 = tpu.reciprocal %305 {approx = true} : vector<8x1xf32> -> vector<8x1xf32>
    %307 = vector.broadcast %306 : vector<8x1xf32> to vector<8x8xf32>
    %308 = arith.mulf %303, %307 : vector<8x8xf32>
    %cst_234 = arith.constant dense<0.000000e+00> : vector<8x8xf32>
    %309 = tpu.matmul %308, %293, %cst_234 {dimension_numbers = #tpu.dot_dimension_numbers<[1], [0], [0], [1], [0, 0, 1, 1], [], []>} : vector<8x8xf32>, vector<8x8xf32>, vector<8x8xf32> -> vector<8x8xf32>
    %c1_235 = arith.constant 1 : index
    %c0_236 = arith.constant 0 : index
    %c0_237 = arith.constant 0 : index
    %c0_238 = arith.constant 0 : index
    %310 = vector.load %arg11[%c1_235, %c0_236, %c0_237, %c0_238] : memref<2x4x8x32xf32, #tpu.memory_space<vmem>>, vector<1x1x8x32xf32>
    %311 = vector.shape_cast %310 : vector<1x1x8x32xf32> to vector<8x32xf32>
    %cst_239 = arith.constant dense<0.000000e+00> : vector<8x32xf32>
    %312 = tpu.matmul %309, %311, %cst_239 {dimension_numbers = #tpu.dot_dimension_numbers<[1], [0], [0], [1], [0, 0, 1, 1], [], []>} : vector<8x8xf32>, vector<8x32xf32>, vector<8x32xf32> -> vector<8x32xf32>
    %313 = arith.addf %272, %312 : vector<8x32xf32>
    %c1_240 = arith.constant 1 : index
    %c1_241 = arith.constant 1 : index
    %c0_242 = arith.constant 0 : index
    %c0_243 = arith.constant 0 : index
    %314 = vector.load %arg5[%c1_240, %c1_241, %c0_242, %c0_243] : memref<2x4x32x8xf32, #tpu.memory_space<vmem>>, vector<1x1x32x8xf32>
    %315 = vector.shape_cast %314 : vector<1x1x32x8xf32> to vector<32x8xf32>
    %cst_244 = arith.constant dense<0.000000e+00> : vector<8x8xf32>
    %316 = tpu.matmul %271, %315, %cst_244 {dimension_numbers = #tpu.dot_dimension_numbers<[1], [0], [0], [1], [0, 0, 1, 1], [], []>} : vector<8x32xf32>, vector<32x8xf32>, vector<8x8xf32> -> vector<8x8xf32>
    %c1_245 = arith.constant 1 : index
    %c1_246 = arith.constant 1 : index
    %c0_247 = arith.constant 0 : index
    %c0_248 = arith.constant 0 : index
    %317 = vector.load %arg6[%c1_245, %c1_246, %c0_247, %c0_248] : memref<2x4x1x8xf32, #tpu.memory_space<vmem>>, vector<1x1x1x8xf32>
    %318 = vector.shape_cast %317 : vector<1x1x1x8xf32> to vector<1x8xf32>
    %319 = vector.broadcast %318 : vector<1x8xf32> to vector<8x8xf32>
    %320 = arith.addf %316, %319 : vector<8x8xf32>
    %c1_249 = arith.constant 1 : index
    %c1_250 = arith.constant 1 : index
    %c0_251 = arith.constant 0 : index
    %c0_252 = arith.constant 0 : index
    %321 = vector.load %arg7[%c1_249, %c1_250, %c0_251, %c0_252] : memref<2x4x32x8xf32, #tpu.memory_space<vmem>>, vector<1x1x32x8xf32>
    %322 = vector.shape_cast %321 : vector<1x1x32x8xf32> to vector<32x8xf32>
    %cst_253 = arith.constant dense<0.000000e+00> : vector<8x8xf32>
    %323 = tpu.matmul %271, %322, %cst_253 {dimension_numbers = #tpu.dot_dimension_numbers<[1], [0], [0], [1], [0, 0, 1, 1], [], []>} : vector<8x32xf32>, vector<32x8xf32>, vector<8x8xf32> -> vector<8x8xf32>
    %c1_254 = arith.constant 1 : index
    %c1_255 = arith.constant 1 : index
    %c0_256 = arith.constant 0 : index
    %c0_257 = arith.constant 0 : index
    %324 = vector.load %arg8[%c1_254, %c1_255, %c0_256, %c0_257] : memref<2x4x1x8xf32, #tpu.memory_space<vmem>>, vector<1x1x1x8xf32>
    %325 = vector.shape_cast %324 : vector<1x1x1x8xf32> to vector<1x8xf32>
    %326 = vector.broadcast %325 : vector<1x8xf32> to vector<8x8xf32>
    %327 = arith.addf %323, %326 : vector<8x8xf32>
    %c1_258 = arith.constant 1 : index
    %c1_259 = arith.constant 1 : index
    %c0_260 = arith.constant 0 : index
    %c0_261 = arith.constant 0 : index
    %328 = vector.load %arg9[%c1_258, %c1_259, %c0_260, %c0_261] : memref<2x4x32x8xf32, #tpu.memory_space<vmem>>, vector<1x1x32x8xf32>
    %329 = vector.shape_cast %328 : vector<1x1x32x8xf32> to vector<32x8xf32>
    %cst_262 = arith.constant dense<0.000000e+00> : vector<8x8xf32>
    %330 = tpu.matmul %271, %329, %cst_262 {dimension_numbers = #tpu.dot_dimension_numbers<[1], [0], [0], [1], [0, 0, 1, 1], [], []>} : vector<8x32xf32>, vector<32x8xf32>, vector<8x8xf32> -> vector<8x8xf32>
    %c1_263 = arith.constant 1 : index
    %c1_264 = arith.constant 1 : index
    %c0_265 = arith.constant 0 : index
    %c0_266 = arith.constant 0 : index
    %331 = vector.load %arg10[%c1_263, %c1_264, %c0_265, %c0_266] : memref<2x4x1x8xf32, #tpu.memory_space<vmem>>, vector<1x1x1x8xf32>
    %332 = vector.shape_cast %331 : vector<1x1x1x8xf32> to vector<1x8xf32>
    %333 = vector.broadcast %332 : vector<1x8xf32> to vector<8x8xf32>
    %334 = arith.addf %330, %333 : vector<8x8xf32>
    %cst_267 = arith.constant dense<0.000000e+00> : vector<8x8xf32>
    %335 = tpu.matmul %320, %327, %cst_267 {dimension_numbers = #tpu.dot_dimension_numbers<[1], [1], [0], [0], [0, 0, 1, 0], [], []>} : vector<8x8xf32>, vector<8x8xf32>, vector<8x8xf32> -> vector<8x8xf32>
    %cst_268 = arith.constant 0.353553385 : f32
    %336 = vector.broadcast %cst_268 : f32 to vector<8x8xf32>
    %337 = arith.mulf %335, %336 : vector<8x8xf32>
    %338 = vector.broadcast %1 : vector<1x8xf32> to vector<8x8xf32>
    %339 = arith.addf %337, %338 : vector<8x8xf32>
    %cst_269 = arith.constant dense<0xFF800000> : vector<8xf32>
    %340 = vector.multi_reduction <maximumf>, %339, %cst_269 [1] : vector<8x8xf32> to vector<8xf32>
    %341 = vector.shape_cast %340 : vector<8xf32> to vector<8x1xf32>
    %342 = vector.broadcast %341 : vector<8x1xf32> to vector<8x8xf32>
    %343 = arith.subf %339, %342 : vector<8x8xf32>
    %344 = math.exp %343 : vector<8x8xf32>
    %cst_270 = arith.constant dense<0.000000e+00> : vector<8xf32>
    %345 = vector.multi_reduction <add>, %344, %cst_270 [1] : vector<8x8xf32> to vector<8xf32>
    %346 = vector.shape_cast %345 : vector<8xf32> to vector<8x1xf32>
    %347 = tpu.reciprocal %346 {approx = true} : vector<8x1xf32> -> vector<8x1xf32>
    %348 = vector.broadcast %347 : vector<8x1xf32> to vector<8x8xf32>
    %349 = arith.mulf %344, %348 : vector<8x8xf32>
    %cst_271 = arith.constant dense<0.000000e+00> : vector<8x8xf32>
    %350 = tpu.matmul %349, %334, %cst_271 {dimension_numbers = #tpu.dot_dimension_numbers<[1], [0], [0], [1], [0, 0, 1, 1], [], []>} : vector<8x8xf32>, vector<8x8xf32>, vector<8x8xf32> -> vector<8x8xf32>
    %c1_272 = arith.constant 1 : index
    %c1_273 = arith.constant 1 : index
    %c0_274 = arith.constant 0 : index
    %c0_275 = arith.constant 0 : index
    %351 = vector.load %arg11[%c1_272, %c1_273, %c0_274, %c0_275] : memref<2x4x8x32xf32, #tpu.memory_space<vmem>>, vector<1x1x8x32xf32>
    %352 = vector.shape_cast %351 : vector<1x1x8x32xf32> to vector<8x32xf32>
    %cst_276 = arith.constant dense<0.000000e+00> : vector<8x32xf32>
    %353 = tpu.matmul %350, %352, %cst_276 {dimension_numbers = #tpu.dot_dimension_numbers<[1], [0], [0], [1], [0, 0, 1, 1], [], []>} : vector<8x8xf32>, vector<8x32xf32>, vector<8x32xf32> -> vector<8x32xf32>
    %354 = arith.addf %313, %353 : vector<8x32xf32>
    %c1_277 = arith.constant 1 : index
    %c2_278 = arith.constant 2 : index
    %c0_279 = arith.constant 0 : index
    %c0_280 = arith.constant 0 : index
    %355 = vector.load %arg5[%c1_277, %c2_278, %c0_279, %c0_280] : memref<2x4x32x8xf32, #tpu.memory_space<vmem>>, vector<1x1x32x8xf32>
    %356 = vector.shape_cast %355 : vector<1x1x32x8xf32> to vector<32x8xf32>
    %cst_281 = arith.constant dense<0.000000e+00> : vector<8x8xf32>
    %357 = tpu.matmul %271, %356, %cst_281 {dimension_numbers = #tpu.dot_dimension_numbers<[1], [0], [0], [1], [0, 0, 1, 1], [], []>} : vector<8x32xf32>, vector<32x8xf32>, vector<8x8xf32> -> vector<8x8xf32>
    %c1_282 = arith.constant 1 : index
    %c2_283 = arith.constant 2 : index
    %c0_284 = arith.constant 0 : index
    %c0_285 = arith.constant 0 : index
    %358 = vector.load %arg6[%c1_282, %c2_283, %c0_284, %c0_285] : memref<2x4x1x8xf32, #tpu.memory_space<vmem>>, vector<1x1x1x8xf32>
    %359 = vector.shape_cast %358 : vector<1x1x1x8xf32> to vector<1x8xf32>
    %360 = vector.broadcast %359 : vector<1x8xf32> to vector<8x8xf32>
    %361 = arith.addf %357, %360 : vector<8x8xf32>
    %c1_286 = arith.constant 1 : index
    %c2_287 = arith.constant 2 : index
    %c0_288 = arith.constant 0 : index
    %c0_289 = arith.constant 0 : index
    %362 = vector.load %arg7[%c1_286, %c2_287, %c0_288, %c0_289] : memref<2x4x32x8xf32, #tpu.memory_space<vmem>>, vector<1x1x32x8xf32>
    %363 = vector.shape_cast %362 : vector<1x1x32x8xf32> to vector<32x8xf32>
    %cst_290 = arith.constant dense<0.000000e+00> : vector<8x8xf32>
    %364 = tpu.matmul %271, %363, %cst_290 {dimension_numbers = #tpu.dot_dimension_numbers<[1], [0], [0], [1], [0, 0, 1, 1], [], []>} : vector<8x32xf32>, vector<32x8xf32>, vector<8x8xf32> -> vector<8x8xf32>
    %c1_291 = arith.constant 1 : index
    %c2_292 = arith.constant 2 : index
    %c0_293 = arith.constant 0 : index
    %c0_294 = arith.constant 0 : index
    %365 = vector.load %arg8[%c1_291, %c2_292, %c0_293, %c0_294] : memref<2x4x1x8xf32, #tpu.memory_space<vmem>>, vector<1x1x1x8xf32>
    %366 = vector.shape_cast %365 : vector<1x1x1x8xf32> to vector<1x8xf32>
    %367 = vector.broadcast %366 : vector<1x8xf32> to vector<8x8xf32>
    %368 = arith.addf %364, %367 : vector<8x8xf32>
    %c1_295 = arith.constant 1 : index
    %c2_296 = arith.constant 2 : index
    %c0_297 = arith.constant 0 : index
    %c0_298 = arith.constant 0 : index
    %369 = vector.load %arg9[%c1_295, %c2_296, %c0_297, %c0_298] : memref<2x4x32x8xf32, #tpu.memory_space<vmem>>, vector<1x1x32x8xf32>
    %370 = vector.shape_cast %369 : vector<1x1x32x8xf32> to vector<32x8xf32>
    %cst_299 = arith.constant dense<0.000000e+00> : vector<8x8xf32>
    %371 = tpu.matmul %271, %370, %cst_299 {dimension_numbers = #tpu.dot_dimension_numbers<[1], [0], [0], [1], [0, 0, 1, 1], [], []>} : vector<8x32xf32>, vector<32x8xf32>, vector<8x8xf32> -> vector<8x8xf32>
    %c1_300 = arith.constant 1 : index
    %c2_301 = arith.constant 2 : index
    %c0_302 = arith.constant 0 : index
    %c0_303 = arith.constant 0 : index
    %372 = vector.load %arg10[%c1_300, %c2_301, %c0_302, %c0_303] : memref<2x4x1x8xf32, #tpu.memory_space<vmem>>, vector<1x1x1x8xf32>
    %373 = vector.shape_cast %372 : vector<1x1x1x8xf32> to vector<1x8xf32>
    %374 = vector.broadcast %373 : vector<1x8xf32> to vector<8x8xf32>
    %375 = arith.addf %371, %374 : vector<8x8xf32>
    %cst_304 = arith.constant dense<0.000000e+00> : vector<8x8xf32>
    %376 = tpu.matmul %361, %368, %cst_304 {dimension_numbers = #tpu.dot_dimension_numbers<[1], [1], [0], [0], [0, 0, 1, 0], [], []>} : vector<8x8xf32>, vector<8x8xf32>, vector<8x8xf32> -> vector<8x8xf32>
    %cst_305 = arith.constant 0.353553385 : f32
    %377 = vector.broadcast %cst_305 : f32 to vector<8x8xf32>
    %378 = arith.mulf %376, %377 : vector<8x8xf32>
    %379 = vector.broadcast %1 : vector<1x8xf32> to vector<8x8xf32>
    %380 = arith.addf %378, %379 : vector<8x8xf32>
    %cst_306 = arith.constant dense<0xFF800000> : vector<8xf32>
    %381 = vector.multi_reduction <maximumf>, %380, %cst_306 [1] : vector<8x8xf32> to vector<8xf32>
    %382 = vector.shape_cast %381 : vector<8xf32> to vector<8x1xf32>
    %383 = vector.broadcast %382 : vector<8x1xf32> to vector<8x8xf32>
    %384 = arith.subf %380, %383 : vector<8x8xf32>
    %385 = math.exp %384 : vector<8x8xf32>
    %cst_307 = arith.constant dense<0.000000e+00> : vector<8xf32>
    %386 = vector.multi_reduction <add>, %385, %cst_307 [1] : vector<8x8xf32> to vector<8xf32>
    %387 = vector.shape_cast %386 : vector<8xf32> to vector<8x1xf32>
    %388 = tpu.reciprocal %387 {approx = true} : vector<8x1xf32> -> vector<8x1xf32>
    %389 = vector.broadcast %388 : vector<8x1xf32> to vector<8x8xf32>
    %390 = arith.mulf %385, %389 : vector<8x8xf32>
    %cst_308 = arith.constant dense<0.000000e+00> : vector<8x8xf32>
    %391 = tpu.matmul %390, %375, %cst_308 {dimension_numbers = #tpu.dot_dimension_numbers<[1], [0], [0], [1], [0, 0, 1, 1], [], []>} : vector<8x8xf32>, vector<8x8xf32>, vector<8x8xf32> -> vector<8x8xf32>
    %c1_309 = arith.constant 1 : index
    %c2_310 = arith.constant 2 : index
    %c0_311 = arith.constant 0 : index
    %c0_312 = arith.constant 0 : index
    %392 = vector.load %arg11[%c1_309, %c2_310, %c0_311, %c0_312] : memref<2x4x8x32xf32, #tpu.memory_space<vmem>>, vector<1x1x8x32xf32>
    %393 = vector.shape_cast %392 : vector<1x1x8x32xf32> to vector<8x32xf32>
    %cst_313 = arith.constant dense<0.000000e+00> : vector<8x32xf32>
    %394 = tpu.matmul %391, %393, %cst_313 {dimension_numbers = #tpu.dot_dimension_numbers<[1], [0], [0], [1], [0, 0, 1, 1], [], []>} : vector<8x8xf32>, vector<8x32xf32>, vector<8x32xf32> -> vector<8x32xf32>
    %395 = arith.addf %354, %394 : vector<8x32xf32>
    %c1_314 = arith.constant 1 : index
    %c3_315 = arith.constant 3 : index
    %c0_316 = arith.constant 0 : index
    %c0_317 = arith.constant 0 : index
    %396 = vector.load %arg5[%c1_314, %c3_315, %c0_316, %c0_317] : memref<2x4x32x8xf32, #tpu.memory_space<vmem>>, vector<1x1x32x8xf32>
    %397 = vector.shape_cast %396 : vector<1x1x32x8xf32> to vector<32x8xf32>
    %cst_318 = arith.constant dense<0.000000e+00> : vector<8x8xf32>
    %398 = tpu.matmul %271, %397, %cst_318 {dimension_numbers = #tpu.dot_dimension_numbers<[1], [0], [0], [1], [0, 0, 1, 1], [], []>} : vector<8x32xf32>, vector<32x8xf32>, vector<8x8xf32> -> vector<8x8xf32>
    %c1_319 = arith.constant 1 : index
    %c3_320 = arith.constant 3 : index
    %c0_321 = arith.constant 0 : index
    %c0_322 = arith.constant 0 : index
    %399 = vector.load %arg6[%c1_319, %c3_320, %c0_321, %c0_322] : memref<2x4x1x8xf32, #tpu.memory_space<vmem>>, vector<1x1x1x8xf32>
    %400 = vector.shape_cast %399 : vector<1x1x1x8xf32> to vector<1x8xf32>
    %401 = vector.broadcast %400 : vector<1x8xf32> to vector<8x8xf32>
    %402 = arith.addf %398, %401 : vector<8x8xf32>
    %c1_323 = arith.constant 1 : index
    %c3_324 = arith.constant 3 : index
    %c0_325 = arith.constant 0 : index
    %c0_326 = arith.constant 0 : index
    %403 = vector.load %arg7[%c1_323, %c3_324, %c0_325, %c0_326] : memref<2x4x32x8xf32, #tpu.memory_space<vmem>>, vector<1x1x32x8xf32>
    %404 = vector.shape_cast %403 : vector<1x1x32x8xf32> to vector<32x8xf32>
    %cst_327 = arith.constant dense<0.000000e+00> : vector<8x8xf32>
    %405 = tpu.matmul %271, %404, %cst_327 {dimension_numbers = #tpu.dot_dimension_numbers<[1], [0], [0], [1], [0, 0, 1, 1], [], []>} : vector<8x32xf32>, vector<32x8xf32>, vector<8x8xf32> -> vector<8x8xf32>
    %c1_328 = arith.constant 1 : index
    %c3_329 = arith.constant 3 : index
    %c0_330 = arith.constant 0 : index
    %c0_331 = arith.constant 0 : index
    %406 = vector.load %arg8[%c1_328, %c3_329, %c0_330, %c0_331] : memref<2x4x1x8xf32, #tpu.memory_space<vmem>>, vector<1x1x1x8xf32>
    %407 = vector.shape_cast %406 : vector<1x1x1x8xf32> to vector<1x8xf32>
    %408 = vector.broadcast %407 : vector<1x8xf32> to vector<8x8xf32>
    %409 = arith.addf %405, %408 : vector<8x8xf32>
    %c1_332 = arith.constant 1 : index
    %c3_333 = arith.constant 3 : index
    %c0_334 = arith.constant 0 : index
    %c0_335 = arith.constant 0 : index
    %410 = vector.load %arg9[%c1_332, %c3_333, %c0_334, %c0_335] : memref<2x4x32x8xf32, #tpu.memory_space<vmem>>, vector<1x1x32x8xf32>
    %411 = vector.shape_cast %410 : vector<1x1x32x8xf32> to vector<32x8xf32>
    %cst_336 = arith.constant dense<0.000000e+00> : vector<8x8xf32>
    %412 = tpu.matmul %271, %411, %cst_336 {dimension_numbers = #tpu.dot_dimension_numbers<[1], [0], [0], [1], [0, 0, 1, 1], [], []>} : vector<8x32xf32>, vector<32x8xf32>, vector<8x8xf32> -> vector<8x8xf32>
    %c1_337 = arith.constant 1 : index
    %c3_338 = arith.constant 3 : index
    %c0_339 = arith.constant 0 : index
    %c0_340 = arith.constant 0 : index
    %413 = vector.load %arg10[%c1_337, %c3_338, %c0_339, %c0_340] : memref<2x4x1x8xf32, #tpu.memory_space<vmem>>, vector<1x1x1x8xf32>
    %414 = vector.shape_cast %413 : vector<1x1x1x8xf32> to vector<1x8xf32>
    %415 = vector.broadcast %414 : vector<1x8xf32> to vector<8x8xf32>
    %416 = arith.addf %412, %415 : vector<8x8xf32>
    %cst_341 = arith.constant dense<0.000000e+00> : vector<8x8xf32>
    %417 = tpu.matmul %402, %409, %cst_341 {dimension_numbers = #tpu.dot_dimension_numbers<[1], [1], [0], [0], [0, 0, 1, 0], [], []>} : vector<8x8xf32>, vector<8x8xf32>, vector<8x8xf32> -> vector<8x8xf32>
    %cst_342 = arith.constant 0.353553385 : f32
    %418 = vector.broadcast %cst_342 : f32 to vector<8x8xf32>
    %419 = arith.mulf %417, %418 : vector<8x8xf32>
    %420 = vector.broadcast %1 : vector<1x8xf32> to vector<8x8xf32>
    %421 = arith.addf %419, %420 : vector<8x8xf32>
    %cst_343 = arith.constant dense<0xFF800000> : vector<8xf32>
    %422 = vector.multi_reduction <maximumf>, %421, %cst_343 [1] : vector<8x8xf32> to vector<8xf32>
    %423 = vector.shape_cast %422 : vector<8xf32> to vector<8x1xf32>
    %424 = vector.broadcast %423 : vector<8x1xf32> to vector<8x8xf32>
    %425 = arith.subf %421, %424 : vector<8x8xf32>
    %426 = math.exp %425 : vector<8x8xf32>
    %cst_344 = arith.constant dense<0.000000e+00> : vector<8xf32>
    %427 = vector.multi_reduction <add>, %426, %cst_344 [1] : vector<8x8xf32> to vector<8xf32>
    %428 = vector.shape_cast %427 : vector<8xf32> to vector<8x1xf32>
    %429 = tpu.reciprocal %428 {approx = true} : vector<8x1xf32> -> vector<8x1xf32>
    %430 = vector.broadcast %429 : vector<8x1xf32> to vector<8x8xf32>
    %431 = arith.mulf %426, %430 : vector<8x8xf32>
    %cst_345 = arith.constant dense<0.000000e+00> : vector<8x8xf32>
    %432 = tpu.matmul %431, %416, %cst_345 {dimension_numbers = #tpu.dot_dimension_numbers<[1], [0], [0], [1], [0, 0, 1, 1], [], []>} : vector<8x8xf32>, vector<8x8xf32>, vector<8x8xf32> -> vector<8x8xf32>
    %c1_346 = arith.constant 1 : index
    %c3_347 = arith.constant 3 : index
    %c0_348 = arith.constant 0 : index
    %c0_349 = arith.constant 0 : index
    %433 = vector.load %arg11[%c1_346, %c3_347, %c0_348, %c0_349] : memref<2x4x8x32xf32, #tpu.memory_space<vmem>>, vector<1x1x8x32xf32>
    %434 = vector.shape_cast %433 : vector<1x1x8x32xf32> to vector<8x32xf32>
    %cst_350 = arith.constant dense<0.000000e+00> : vector<8x32xf32>
    %435 = tpu.matmul %432, %434, %cst_350 {dimension_numbers = #tpu.dot_dimension_numbers<[1], [0], [0], [1], [0, 0, 1, 1], [], []>} : vector<8x8xf32>, vector<8x32xf32>, vector<8x32xf32> -> vector<8x32xf32>
    %436 = arith.addf %395, %435 : vector<8x32xf32>
    %c1_351 = arith.constant 1 : index
    %c0_352 = arith.constant 0 : index
    %c0_353 = arith.constant 0 : index
    %437 = vector.load %arg12[%c1_351, %c0_352, %c0_353] : memref<2x1x32xf32, #tpu.memory_space<vmem>>, vector<1x1x32xf32>
    %438 = vector.shape_cast %437 : vector<1x1x32xf32> to vector<1x32xf32>
    %439 = vector.broadcast %438 : vector<1x32xf32> to vector<8x32xf32>
    %440 = arith.addf %436, %439 : vector<8x32xf32>
    %441 = arith.addf %440, %271 : vector<8x32xf32>
    %c1_354 = arith.constant 1 : index
    %c0_355 = arith.constant 0 : index
    %c0_356 = arith.constant 0 : index
    %442 = vector.load %arg13[%c1_354, %c0_355, %c0_356] : memref<2x1x32xf32, #tpu.memory_space<vmem>>, vector<1x1x32xf32>
    %443 = vector.shape_cast %442 : vector<1x1x32xf32> to vector<1x32xf32>
    %c1_357 = arith.constant 1 : index
    %c0_358 = arith.constant 0 : index
    %c0_359 = arith.constant 0 : index
    %444 = vector.load %arg14[%c1_357, %c0_358, %c0_359] : memref<2x1x32xf32, #tpu.memory_space<vmem>>, vector<1x1x32xf32>
    %445 = vector.shape_cast %444 : vector<1x1x32xf32> to vector<1x32xf32>
    %cst_360 = arith.constant dense<0.000000e+00> : vector<8xf32>
    %446 = vector.multi_reduction <add>, %441, %cst_360 [1] : vector<8x32xf32> to vector<8xf32>
    %447 = vector.shape_cast %446 : vector<8xf32> to vector<8x1xf32>
    %cst_361 = arith.constant 3.200000e+01 : f32
    %448 = vector.broadcast %cst_361 : f32 to vector<8x1xf32>
    %449 = arith.divf %447, %448 : vector<8x1xf32>
    %450 = vector.broadcast %449 : vector<8x1xf32> to vector<8x32xf32>
    %451 = arith.subf %441, %450 : vector<8x32xf32>
    %452 = arith.mulf %451, %451 : vector<8x32xf32>
    %cst_362 = arith.constant dense<0.000000e+00> : vector<8xf32>
    %453 = vector.multi_reduction <add>, %452, %cst_362 [1] : vector<8x32xf32> to vector<8xf32>
    %454 = vector.shape_cast %453 : vector<8xf32> to vector<8x1xf32>
    %cst_363 = arith.constant 3.200000e+01 : f32
    %455 = vector.broadcast %cst_363 : f32 to vector<8x1xf32>
    %456 = arith.divf %454, %455 : vector<8x1xf32>
    %cst_364 = arith.constant 9.99999996E-13 : f32
    %457 = vector.broadcast %cst_364 : f32 to vector<8x1xf32>
    %458 = arith.addf %456, %457 : vector<8x1xf32>
    %459 = math.rsqrt %458 : vector<8x1xf32>
    %460 = vector.broadcast %459 : vector<8x1xf32> to vector<8x32xf32>
    %461 = arith.mulf %451, %460 : vector<8x32xf32>
    %462 = vector.broadcast %443 : vector<1x32xf32> to vector<8x32xf32>
    %463 = arith.mulf %461, %462 : vector<8x32xf32>
    %464 = vector.broadcast %445 : vector<1x32xf32> to vector<8x32xf32>
    %465 = arith.addf %463, %464 : vector<8x32xf32>
    %c1_365 = arith.constant 1 : index
    %c0_366 = arith.constant 0 : index
    %c0_367 = arith.constant 0 : index
    %466 = vector.load %arg15[%c1_365, %c0_366, %c0_367] : memref<2x32x64xf32, #tpu.memory_space<vmem>>, vector<1x32x64xf32>
    %467 = vector.shape_cast %466 : vector<1x32x64xf32> to vector<32x64xf32>
    %cst_368 = arith.constant dense<0.000000e+00> : vector<8x64xf32>
    %468 = tpu.matmul %465, %467, %cst_368 {dimension_numbers = #tpu.dot_dimension_numbers<[1], [0], [0], [1], [0, 0, 1, 1], [], []>} : vector<8x32xf32>, vector<32x64xf32>, vector<8x64xf32> -> vector<8x64xf32>
    %c1_369 = arith.constant 1 : index
    %c0_370 = arith.constant 0 : index
    %c0_371 = arith.constant 0 : index
    %469 = vector.load %arg16[%c1_369, %c0_370, %c0_371] : memref<2x1x64xf32, #tpu.memory_space<vmem>>, vector<1x1x64xf32>
    %470 = vector.shape_cast %469 : vector<1x1x64xf32> to vector<1x64xf32>
    %471 = vector.broadcast %470 : vector<1x64xf32> to vector<8x64xf32>
    %472 = arith.addf %468, %471 : vector<8x64xf32>
    %cst_372 = arith.constant 5.000000e-01 : f32
    %473 = vector.broadcast %cst_372 : f32 to vector<8x64xf32>
    %474 = arith.mulf %473, %472 : vector<8x64xf32>
    %cst_373 = arith.constant 4.471500e-02 : f32
    %475 = vector.broadcast %cst_373 : f32 to vector<8x64xf32>
    %476 = arith.mulf %475, %472 : vector<8x64xf32>
    %477 = arith.mulf %476, %472 : vector<8x64xf32>
    %478 = arith.mulf %477, %472 : vector<8x64xf32>
    %479 = arith.addf %472, %478 : vector<8x64xf32>
    %cst_374 = arith.constant 0.797884583 : f32
    %480 = vector.broadcast %cst_374 : f32 to vector<8x64xf32>
    %481 = arith.mulf %480, %479 : vector<8x64xf32>
    %482 = math.tanh %481 : vector<8x64xf32>
    %cst_375 = arith.constant 1.000000e+00 : f32
    %483 = vector.broadcast %cst_375 : f32 to vector<8x64xf32>
    %484 = arith.addf %483, %482 : vector<8x64xf32>
    %485 = arith.mulf %474, %484 : vector<8x64xf32>
    %c1_376 = arith.constant 1 : index
    %c0_377 = arith.constant 0 : index
    %c0_378 = arith.constant 0 : index
    %486 = vector.load %arg17[%c1_376, %c0_377, %c0_378] : memref<2x64x32xf32, #tpu.memory_space<vmem>>, vector<1x64x32xf32>
    %487 = vector.shape_cast %486 : vector<1x64x32xf32> to vector<64x32xf32>
    %cst_379 = arith.constant dense<0.000000e+00> : vector<8x32xf32>
    %488 = tpu.matmul %485, %487, %cst_379 {dimension_numbers = #tpu.dot_dimension_numbers<[1], [0], [0], [1], [0, 0, 1, 1], [], []>} : vector<8x64xf32>, vector<64x32xf32>, vector<8x32xf32> -> vector<8x32xf32>
    %c1_380 = arith.constant 1 : index
    %c0_381 = arith.constant 0 : index
    %c0_382 = arith.constant 0 : index
    %489 = vector.load %arg18[%c1_380, %c0_381, %c0_382] : memref<2x1x32xf32, #tpu.memory_space<vmem>>, vector<1x1x32xf32>
    %490 = vector.shape_cast %489 : vector<1x1x32xf32> to vector<1x32xf32>
    %491 = vector.broadcast %490 : vector<1x32xf32> to vector<8x32xf32>
    %492 = arith.addf %488, %491 : vector<8x32xf32>
    %493 = arith.addf %492, %465 : vector<8x32xf32>
    %c1_383 = arith.constant 1 : index
    %c0_384 = arith.constant 0 : index
    %c0_385 = arith.constant 0 : index
    %494 = vector.load %arg19[%c1_383, %c0_384, %c0_385] : memref<2x1x32xf32, #tpu.memory_space<vmem>>, vector<1x1x32xf32>
    %495 = vector.shape_cast %494 : vector<1x1x32xf32> to vector<1x32xf32>
    %c1_386 = arith.constant 1 : index
    %c0_387 = arith.constant 0 : index
    %c0_388 = arith.constant 0 : index
    %496 = vector.load %arg20[%c1_386, %c0_387, %c0_388] : memref<2x1x32xf32, #tpu.memory_space<vmem>>, vector<1x1x32xf32>
    %497 = vector.shape_cast %496 : vector<1x1x32xf32> to vector<1x32xf32>
    %cst_389 = arith.constant dense<0.000000e+00> : vector<8xf32>
    %498 = vector.multi_reduction <add>, %493, %cst_389 [1] : vector<8x32xf32> to vector<8xf32>
    %499 = vector.shape_cast %498 : vector<8xf32> to vector<8x1xf32>
    %cst_390 = arith.constant 3.200000e+01 : f32
    %500 = vector.broadcast %cst_390 : f32 to vector<8x1xf32>
    %501 = arith.divf %499, %500 : vector<8x1xf32>
    %502 = vector.broadcast %501 : vector<8x1xf32> to vector<8x32xf32>
    %503 = arith.subf %493, %502 : vector<8x32xf32>
    %504 = arith.mulf %503, %503 : vector<8x32xf32>
    %cst_391 = arith.constant dense<0.000000e+00> : vector<8xf32>
    %505 = vector.multi_reduction <add>, %504, %cst_391 [1] : vector<8x32xf32> to vector<8xf32>
    %506 = vector.shape_cast %505 : vector<8xf32> to vector<8x1xf32>
    %cst_392 = arith.constant 3.200000e+01 : f32
    %507 = vector.broadcast %cst_392 : f32 to vector<8x1xf32>
    %508 = arith.divf %506, %507 : vector<8x1xf32>
    %cst_393 = arith.constant 9.99999996E-13 : f32
    %509 = vector.broadcast %cst_393 : f32 to vector<8x1xf32>
    %510 = arith.addf %508, %509 : vector<8x1xf32>
    %511 = math.rsqrt %510 : vector<8x1xf32>
    %512 = vector.broadcast %511 : vector<8x1xf32> to vector<8x32xf32>
    %513 = arith.mulf %503, %512 : vector<8x32xf32>
    %514 = vector.broadcast %495 : vector<1x32xf32> to vector<8x32xf32>
    %515 = arith.mulf %513, %514 : vector<8x32xf32>
    %516 = vector.broadcast %497 : vector<1x32xf32> to vector<8x32xf32>
    %517 = arith.addf %515, %516 : vector<8x32xf32>
    %518 = vector.extract_strided_slice %517 {offsets = [0, 0], sizes = [1, 32], strides = [1, 1]} : vector<8x32xf32> to vector<1x32xf32>
    %c0_394 = arith.constant 0 : index
    %c0_395 = arith.constant 0 : index
    %519 = vector.load %arg21[%c0_394, %c0_395] : memref<32x32xf32, #tpu.memory_space<vmem>>, vector<32x32xf32>
    %cst_396 = arith.constant dense<0.000000e+00> : vector<1x32xf32>
    %520 = tpu.matmul %518, %519, %cst_396 {dimension_numbers = #tpu.dot_dimension_numbers<[1], [0], [0], [1], [0, 0, 1, 1], [], []>} : vector<1x32xf32>, vector<32x32xf32>, vector<1x32xf32> -> vector<1x32xf32>
    %c0_397 = arith.constant 0 : index
    %c0_398 = arith.constant 0 : index
    %521 = vector.load %arg22[%c0_397, %c0_398] : memref<1x32xf32, #tpu.memory_space<vmem>>, vector<1x32xf32>
    %522 = arith.addf %520, %521 : vector<1x32xf32>
    %523 = math.tanh %522 : vector<1x32xf32>
    %c0_399 = arith.constant 0 : index
    %c0_400 = arith.constant 0 : index
    %c0_401 = arith.constant 0 : index
    %524 = vector.load %arg23[%c0_399, %c0_400, %c0_401] : memref<1x1x32xf32, #tpu.memory_space<vmem>>, vector<1x1x32xf32>
    %525 = vector.shape_cast %524 : vector<1x1x32xf32> to vector<1x32xf32>
    %526 = vector.shape_cast %523 : vector<1x32xf32> to vector<1x1x32xf32>
    tpu.vector_store %arg23[%c0_399, %c0_400, %c0_401], %526 {strides = array<i32>} : memref<1x1x32xf32, #tpu.memory_space<vmem>>, vector<1x1x32xf32>,
    return
  }
  func.func @transform_0(%arg0: i32) -> (i32, i32, i32) {
    %c0_i32 = arith.constant 0 : i32
    %c0_i32_0 = arith.constant 0 : i32
    %c0_i32_1 = arith.constant 0 : i32
    return %arg0, %c0_i32, %c0_i32_0 : i32, i32, i32
  }
  func.func @transform_1(%arg0: i32) -> (i32, i32, i32) {
    %c0_i32 = arith.constant 0 : i32
    %c0_i32_0 = arith.constant 0 : i32
    %c0_i32_1 = arith.constant 0 : i32
    return %arg0, %c0_i32, %c0_i32_0 : i32, i32, i32
  }
  func.func @transform_2(%arg0: i32) -> (i32, i32) {
    %c0_i32 = arith.constant 0 : i32
    %c0_i32_0 = arith.constant 0 : i32
    %c0_i32_1 = arith.constant 0 : i32
    return %c0_i32, %c0_i32_0 : i32, i32
  }
  func.func @transform_3(%arg0: i32) -> (i32, i32) {
    %c0_i32 = arith.constant 0 : i32
    %c0_i32_0 = arith.constant 0 : i32
    %c0_i32_1 = arith.constant 0 : i32
    return %c0_i32, %c0_i32_0 : i32, i32
  }
  func.func @transform_4(%arg0: i32) -> (i32, i32, i32, i32) {
    %c0_i32 = arith.constant 0 : i32
    %c0_i32_0 = arith.constant 0 : i32
    %c0_i32_1 = arith.constant 0 : i32
    %c0_i32_2 = arith.constant 0 : i32
    %c0_i32_3 = arith.constant 0 : i32
    return %c0_i32, %c0_i32_0, %c0_i32_1, %c0_i32_2 : i32, i32, i32, i32
  }
  func.func @transform_5(%arg0: i32) -> (i32, i32, i32, i32) {
    %c0_i32 = arith.constant 0 : i32
    %c0_i32_0 = arith.constant 0 : i32
    %c0_i32_1 = arith.constant 0 : i32
    %c0_i32_2 = arith.constant 0 : i32
    %c0_i32_3 = arith.constant 0 : i32
    return %c0_i32, %c0_i32_0, %c0_i32_1, %c0_i32_2 : i32, i32, i32, i32
  }
  func.func @transform_6(%arg0: i32) -> (i32, i32, i32, i32) {
    %c0_i32 = arith.constant 0 : i32
    %c0_i32_0 = arith.constant 0 : i32
    %c0_i32_1 = arith.constant 0 : i32
    %c0_i32_2 = arith.constant 0 : i32
    %c0_i32_3 = arith.constant 0 : i32
    return %c0_i32, %c0_i32_0, %c0_i32_1, %c0_i32_2 : i32, i32, i32, i32
  }
  func.func @transform_7(%arg0: i32) -> (i32, i32, i32, i32) {
    %c0_i32 = arith.constant 0 : i32
    %c0_i32_0 = arith.constant 0 : i32
    %c0_i32_1 = arith.constant 0 : i32
    %c0_i32_2 = arith.constant 0 : i32
    %c0_i32_3 = arith.constant 0 : i32
    return %c0_i32, %c0_i32_0, %c0_i32_1, %c0_i32_2 : i32, i32, i32, i32
  }
  func.func @transform_8(%arg0: i32) -> (i32, i32, i32, i32) {
    %c0_i32 = arith.constant 0 : i32
    %c0_i32_0 = arith.constant 0 : i32
    %c0_i32_1 = arith.constant 0 : i32
    %c0_i32_2 = arith.constant 0 : i32
    %c0_i32_3 = arith.constant 0 : i32
    return %c0_i32, %c0_i32_0, %c0_i32_1, %c0_i32_2 : i32, i32, i32, i32
  }
  func.func @transform_9(%arg0: i32) -> (i32, i32, i32, i32) {
    %c0_i32 = arith.constant 0 : i32
    %c0_i32_0 = arith.constant 0 : i32
    %c0_i32_1 = arith.constant 0 : i32
    %c0_i32_2 = arith.constant 0 : i32
    %c0_i32_3 = arith.constant 0 : i32
    return %c0_i32, %c0_i32_0, %c0_i32_1, %c0_i32_2 : i32, i32, i32, i32
  }
  func.func @transform_10(%arg0: i32) -> (i32, i32, i32, i32) {
    %c0_i32 = arith.constant 0 : i32
    %c0_i32_0 = arith.constant 0 : i32
    %c0_i32_1 = arith.constant 0 : i32
    %c0_i32_2 = arith.constant 0 : i32
    %c0_i32_3 = arith.constant 0 : i32
    return %c0_i32, %c0_i32_0, %c0_i32_1, %c0_i32_2 : i32, i32, i32, i32
  }
  func.func @transform_11(%arg0: i32) -> (i32, i32, i32) {
    %c0_i32 = arith.constant 0 : i32
    %c0_i32_0 = arith.constant 0 : i32
    %c0_i32_1 = arith.constant 0 : i32
    %c0_i32_2 = arith.constant 0 : i32
    return %c0_i32, %c0_i32_0, %c0_i32_1 : i32, i32, i32
  }
  func.func @transform_12(%arg0: i32) -> (i32, i32, i32) {
    %c0_i32 = arith.constant 0 : i32
    %c0_i32_0 = arith.constant 0 : i32
    %c0_i32_1 = arith.constant 0 : i32
    %c0_i32_2 = arith.constant 0 : i32
    return %c0_i32, %c0_i32_0, %c0_i32_1 : i32, i32, i32
  }
  func.func @transform_13(%arg0: i32) -> (i32, i32, i32) {
    %c0_i32 = arith.constant 0 : i32
    %c0_i32_0 = arith.constant 0 : i32
    %c0_i32_1 = arith.constant 0 : i32
    %c0_i32_2 = arith.constant 0 : i32
    return %c0_i32, %c0_i32_0, %c0_i32_1 : i32, i32, i32
  }
  func.func @transform_14(%arg0: i32) -> (i32, i32, i32) {
    %c0_i32 = arith.constant 0 : i32
    %c0_i32_0 = arith.constant 0 : i32
    %c0_i32_1 = arith.constant 0 : i32
    %c0_i32_2 = arith.constant 0 : i32
    return %c0_i32, %c0_i32_0, %c0_i32_1 : i32, i32, i32
  }
  func.func @transform_15(%arg0: i32) -> (i32, i32, i32) {
    %c0_i32 = arith.constant 0 : i32
    %c0_i32_0 = arith.constant 0 : i32
    %c0_i32_1 = arith.constant 0 : i32
    %c0_i32_2 = arith.constant 0 : i32
    return %c0_i32, %c0_i32_0, %c0_i32_1 : i32, i32, i32
  }
  func.func @transform_16(%arg0: i32) -> (i32, i32, i32) {
    %c0_i32 = arith.constant 0 : i32
    %c0_i32_0 = arith.constant 0 : i32
    %c0_i32_1 = arith.constant 0 : i32
    %c0_i32_2 = arith.constant 0 : i32
    return %c0_i32, %c0_i32_0, %c0_i32_1 : i32, i32, i32
  }
  func.func @transform_17(%arg0: i32) -> (i32, i32, i32) {
    %c0_i32 = arith.constant 0 : i32
    %c0_i32_0 = arith.constant 0 : i32
    %c0_i32_1 = arith.constant 0 : i32
    %c0_i32_2 = arith.constant 0 : i32
    return %c0_i32, %c0_i32_0, %c0_i32_1 : i32, i32, i32
  }
  func.func @transform_18(%arg0: i32) -> (i32, i32, i32) {
    %c0_i32 = arith.constant 0 : i32
    %c0_i32_0 = arith.constant 0 : i32
    %c0_i32_1 = arith.constant 0 : i32
    %c0_i32_2 = arith.constant 0 : i32
    return %c0_i32, %c0_i32_0, %c0_i32_1 : i32, i32, i32
  }
  func.func @transform_19(%arg0: i32) -> (i32, i32, i32) {
    %c0_i32 = arith.constant 0 : i32
    %c0_i32_0 = arith.constant 0 : i32
    %c0_i32_1 = arith.constant 0 : i32
    %c0_i32_2 = arith.constant 0 : i32
    return %c0_i32, %c0_i32_0, %c0_i32_1 : i32, i32, i32
  }
  func.func @transform_20(%arg0: i32) -> (i32, i32) {
    %c0_i32 = arith.constant 0 : i32
    %c0_i32_0 = arith.constant 0 : i32
    %c0_i32_1 = arith.constant 0 : i32
    return %c0_i32, %c0_i32_0 : i32, i32
  }
  func.func @transform_21(%arg0: i32) -> (i32, i32) {
    %c0_i32 = arith.constant 0 : i32
    %c0_i32_0 = arith.constant 0 : i32
    %c0_i32_1 = arith.constant 0 : i32
    return %c0_i32, %c0_i32_0 : i32, i32
  }
  func.func @transform_22(%arg0: i32) -> (i32, i32, i32) {
    %c0_i32 = arith.constant 0 : i32
    %c0_i32_0 = arith.constant 0 : i32
    %c0_i32_1 = arith.constant 0 : i32
    return %arg0, %c0_i32, %c0_i32_0 : i32, i32, i32
  }
}

</mosaic_0001>

<bundles_post_ra>
// kernel: tpu_custom_call.1
= control target key start
LH: loop header
LB: loop body
LE: loop exit
PB: predicated region body
PF: predicated region fallthrough
CT: control target
= control target key end

     0   :  { %s7603_s0 = inlined_call_operand.vmem [shape: f32[2,8,32], index: 0, kind: input, shape index: {}]   ;;  %s7604_s1 = inlined_call_operand.vmem [shape: f32[2,1,8], index: 1, kind: input, shape index: {}]   ;;  %s7605_s2 = inlined_call_operand.vmem [shape: f32[1,32], index: 2, kind: input, shape index: {}]   ;;  %s7606_s3 = inlined_call_operand.vmem [shape: f32[1,32], index: 3, kind: input, shape index: {}]   ;;  %s7607_s4 = inlined_call_operand.vmem [shape: f32[2,4,32,8], index: 4, kind: input, shape index: {}]   ;;  %s7608_s5 = inlined_call_operand.vmem [shape: f32[2,4,1,8], index: 5, kind: input, shape index: {}]   ;;  %s7609_s6 = inlined_call_operand.vmem [shape: f32[2,4,32,8], index: 6, kind: input, shape index: {}]   ;;  %s7610_s7 = inlined_call_operand.vmem [shape: f32[2,4,1,8], index: 7, kind: input, shape index: {}]   ;;  %s7611_s8 = inlined_call_operand.vmem [shape: f32[2,4,32,8], index: 8, kind: input, shape index: {}]   ;;  %s7612_s9 = inlined_call_operand.vmem [shape: f32[2,4,1,8], index: 9, kind: input, shape index: {}]   ;;  %s7613_s10 = inlined_call_operand.vmem [shape: f32[2,4,8,32], index: 10, kind: input, shape index: {}]   ;;  %s7614_s11 = inlined_call_operand.vmem [shape: f32[2,1,32], index: 11, kind: input, shape index: {}]   ;;  %s7615_s12 = inlined_call_operand.vmem [shape: f32[2,1,32], index: 12, kind: input, shape index: {}]   ;;  %s7616_s13 = inlined_call_operand.vmem [shape: f32[2,1,32], index: 13, kind: input, shape index: {}]   ;;  %s7617_s14 = inlined_call_operand.vmem [shape: f32[2,32,64], index: 14, kind: input, shape index: {}]   ;;  %s7618_s15 = inlined_call_operand.vmem [shape: f32[2,1,64], index: 15, kind: input, shape index: {}]   ;;  %s7619_s16 = inlined_call_operand.vmem [shape: f32[2,64,32], index: 16, kind: input, shape index: {}]   ;;  %s7620_s17 = inlined_call_operand.vmem [shape: f32[2,1,32], index: 17, kind: input, shape index: {}]   ;;  %s7621_s18 = inlined_call_operand.vmem [shape: f32[2,1,32], index: 18, kind: input, shape index: {}]   ;;  %s7622_s19 = inlined_call_operand.vmem [shape: f32[2,1,32], index: 19, kind: input, shape index: {}]   ;;  %s7623_s20 = inlined_call_operand.vmem [shape: f32[32,32], index: 20, kind: input, shape index: {}]   ;;  %s7624_s21 = inlined_call_operand.vmem [shape: f32[1,32], index: 21, kind: input, shape index: {}]   ;;  %s7625_s22 = inlined_call_operand.hbm [shape: f32[2,1,32], index: 22, kind: output, shape index: {}]  }
   0x1   :  { %7639 = sst [smem:[#allocation12_spill]] %s7603_s0 }
   0x2   :  { %7640 = sst [smem:[#allocation13_spill]] %s7604_s1 }
   0x3   :  { %7641 = sst [smem:[#allocation14_spill]] %s7605_s2 }
   0x4   :  { %7642 = sst [smem:[#allocation15_spill]] %s7606_s3 }
   0x5   :  { %7643 = sst [smem:[#allocation16_spill]] %s7607_s4 }
   0x6   :  { %7644 = sst [smem:[#allocation17_spill]] %s7608_s5 }
   0x7   :  { %7645 = sst [smem:[#allocation18_spill]] %s7609_s6 }
   0x8   :  { %7646 = sst [smem:[#allocation19_spill]] %s7610_s7 }
   0x9   :  { %7647 = sst [smem:[#allocation20_spill]] %s7625_s22 }
   0xa   :  { %27 = vsyncpa [#allocation3], 0 }
   0xb   :  { %29 = vsyncpa [#allocation3 + $0x1], 0  ;;  %s6646_s3 = smov 0   ;;  %s6648_s28 = smov 0  }
   0xc   :  { %s6650_s29 = smov 0   ;;  %s6652_s30 = smov 0  }
   0xd LB: > { %7648 = sst [smem:[#allocation5_spill]] %s6513_s3  ;;  %s6667_s4 = sadd.s32 4294967295, %s6525_s30   ;;  %s6525_s30 = sphi %s6652_s30, %s7671_s30   ;;  %s6521_s29 = sphi %s6650_s29, %s7673_s29   ;;  %s6517_s28 = sphi %s6648_s28, %s7675_s28   ;;  %s6513_s3 = sphi %s6646_s3, %s7674_s3  }
   0xe   : > { %7649 = sst [smem:[#allocation6_spill]] %s6521_s29  ;;  %s5289_s0 = sadd.s32 4294967294, %s6525_s30  }
   0xf   : > { %7650 = sst [smem:[#allocation7_spill]] %s6525_s30  ;;  %s6671_s23 = sadd.s32 1, %s6525_s30  }
  0x10   : > { %7651 = sst [smem:[#allocation8_spill]] %s6671_s23  ;;  %s514_s1 = sadd.s32 1, %s6521_s29 }
  0x11   : > { %s511_s5 = ssub.s32 %s6525_s30, %s6671_s23  ;;  %p524_p0 = scmp.ne.s32.totalorder %s6521_s29, %s6517_s28 }
  0x12   : > { %p512_p1 = scmp.eq.s32.totalorder %s511_s5, 0  ;;  %p525_p2 = scmp.eq.s32.totalorder %s6667_s4, 1 }
  0x13   : > { %p530_p3 = scmp.ne.s32.totalorder %s6517_s28, %s6513_s3  ;;  %p531_p4 = scmp.eq.s32.totalorder %s5289_s0, 1 }
  0x14   : > { %s6682_s24 = scalar_select %p512_p1, %s6521_s29, %s514_s1  }
  0x15   : > { %p6684_p5 = por %p525_p2, %p524_p0  ;;  %p6688_p6 = por %p531_p4, %p530_p3 }
  0x16   : > { %7652 = sst [smem:[#allocation9_spill]] %s6682_s24  ;;  %p5292_p7 = scmp.ge.s32.totalorder %s6525_s30, 1 }
  0x17   : > { %s7653_s6 = scalar_select %p6684_p5, 1, 0 }
  0x18   : > { %s7655_s25 = scalar_select %p6688_p6, 1, 0 }
  0x19   : > { %7654 = sst [smem:[#allocation10_spill]] %s7653_s6  ;;  %p622_p8 = scmp.lt.s32.totalorder %s6525_s30, 3 }
  0x1a   : > { %7656 = sst [smem:[#allocation11_spill]] %s7655_s25 }
  0x1b   : > { %p623_p9 = pnand %p5292_p7, %p622_p8 }
  0x1c   : > { %p685_p10 = scmp.lt.s32.totalorder (!%p623_p9), %s6667_s4, 1  ;;  %vm696_vm0 = vcmask (!%p623_p9), 261120   ;;  %s7657_s1 = sld [smem:[#allocation12_spill]] (!%p623_p9)  ;;  %v6527_v12 = vmov (!%p623_p9), 0.0|0.0   ;;  %vm6528_vm1 = vmmov (!%p623_p9), 0   ;;  %v6529_v20 = vmov (!%p623_p9), 0.0  }
  0x1d   : > { %626 = sbr.rel (%p623_p9) target bundleno = 10489 (0x28f9), region = 108  ;;  %s7658_s23 = sld [smem:[#allocation16_spill]] (!%p623_p9)  ;;  %6186 = vmatprep.subr.bf16.mxu0 (!%p623_p9), %v6527_v12  ;;  %6192 = vmatprep.subr.bf16.mxu1 (!%p623_p9), %v6527_v12  ;;  %v890_v27 = vld [vmem:[%s7611_s8] sm:$0xff] (!%p623_p9)  ;;  %v891_v28 = vld [vmem:[%s7611_s8 + $0x8] sm:$0xff] (!%p623_p9)  ;;  %v892_v33 = vld [vmem:[%s7611_s8 + $0x10] sm:$0xff] (!%p623_p9)  ;;  %vm971_vm2 = vcmask (!%p623_p9), 64512  }
  0x1e   : > { %s7659_s0 = sld [smem:[#allocation18_spill]] (!%p623_p9)  ;;  %5739 = vmatprep.mubr.msk.f32.mxu0 (!%p623_p9), %vm6528_vm1, %v6529_v20  ;;  %5750 = vmatprep.mubr.msk.f32.mxu1 (!%p623_p9), %vm6528_vm1, %v6529_v20  ;;  %s7660_s24 = sld [smem:[#allocation14_spill]] (!%p623_p9)  ;;  %v6199_v31 = vpack.c.bf16 (!%p623_p9), %v891_v28, %v890_v27  ;;  %v893_v34 = vld [vmem:[%s7611_s8 + $0x18] sm:$0xff] (!%p623_p9)  ;;  %v5320_v42 = vld [vmem:[%s7611_s8 + $0x20] sm:$0xff] (!%p623_p9)  ;;  %v5321_v43 = vld [vmem:[%s7611_s8 + $0x28] sm:$0xff] (!%p623_p9)  ;;  %vm2820_vm3 = vcmask (!%p623_p9), 523264  }
  0x1f   : > { %s7661_s22 = sld [smem:[#allocation15_spill]] (!%p623_p9)  ;;  %v6202_v35 = vpack.c.bf16 (!%p623_p9), %v893_v34, %v892_v33  ;;  %v6217_v44 = vpack.c.bf16 (!%p623_p9), %v5321_v43, %v5320_v42  ;;  %v5322_v45 = vld [vmem:[%s7611_s8 + $0x30] sm:$0xff] (!%p623_p9)  ;;  %v5323_v46 = vld [vmem:[%s7611_s8 + $0x38] sm:$0xff] (!%p623_p9)  ;;  %s7662_s7 = sld [smem:[#allocation19_spill]] (!%p623_p9)  ;;  %v5300_v56 = vld [vmem:[%s7612_s9] ss:$0 sm:$0xff] (!%p623_p9) }
  0x20   : > { %v6220_v47 = vpack.c.bf16 (!%p623_p9), %v5323_v46, %v5322_v45  ;;  %s7663_s29 = sld [smem:[#allocation17_spill]] (!%p623_p9)  ;;  %v5330_v43 = vld [vmem:[%s7613_s10 + $0x8] sm:$0xff] (!%p623_p9)  ;;  %vm5210_vm4 = vcmask (!%p623_p9), 253952  }
  0x23   : > { %v725_v7 = vld [vmem:[%s7658_s23] sm:$0xff] (!%p623_p9)  ;;  %v726_v8 = vld [vmem:[%s7658_s23 + $0x8] sm:$0xff] (!%p623_p9)  ;;  %v727_v14 = vld [vmem:[%s7658_s23 + $0x10] sm:$0xff] (!%p623_p9) }
  0x24   : > { %s6696_s26 = scalar_select %p685_p10, %s6667_s4, 1  ;;  %v6187_v9 = vpack.c.bf16 %v726_v8, %v725_v7  ;;  %v809_v10 = vld [vmem:[%s7659_s0] sm:$0xff]  ;;  %v810_v11 = vld [vmem:[%s7659_s0 + $0x8] sm:$0xff]  ;;  %v728_v15 = vld [vmem:[%s7658_s23 + $0x18] sm:$0xff] }
  0x25   : > { %v6193_v13 = vpack.c.bf16 %v810_v11, %v809_v10  ;;  %v6190_v16 = vpack.c.bf16 %v728_v15, %v727_v14  ;;  %v811_v17 = vld [vmem:[%s7659_s0 + $0x10] sm:$0xff]  ;;  %v812_v18 = vld [vmem:[%s7659_s0 + $0x18] sm:$0xff]  ;;  %v5294_v25 = vld [vmem:[%s7660_s24] ss:$0 sm:$0xff] }
  0x26   : > { %s5293_s2 = sshll.u32 %s6696_s26, 3  ;;  %6188 = vmatpush3.bf16.msra.mxu0 %v6187_v9  ;;  %v6196_v19 = vpack.c.bf16 %v812_v18, %v811_v17  ;;  %v5295_v29 = vld [vmem:[%s7661_s22] ss:$0 sm:$0xff]  ;;  %v5307_v37 = vld [vmem:[%s7658_s23 + $0x28] sm:$0xff]  ;;  %v5308_v39 = vld [vmem:[%s7658_s23 + $0x30] sm:$0xff]  ;;  %s7664_s24 = smov %s7663_s29 }
  0x27   : > { %s688_s5 = scalar_lea.vmem %s7657_s1, %s5293_s2  ;;  %6194 = vmatpush3.bf16.msra.mxu1 %v6193_v13  ;;  %6189 = vmatprep.subr.bf16.mxu0 %v6527_v12  ;;  %v5306_v36 = vld [vmem:[%s7658_s23 + $0x20] sm:$0xff]  ;;  %v5309_v40 = vld [vmem:[%s7658_s23 + $0x38] sm:$0xff]  ;;  %s7665_s2 = sld [smem:[#allocation13_spill]]  ;;  %v5314_v14 = vld [vmem:[%s7659_s0 + $0x28] sm:$0xff] }
  0x28   : > { %v693_v0 = vld [vmem:[%s688_s5] sm:$0xff]  ;;  %6195 = vmatprep.subr.bf16.mxu1 %v6527_v12  ;;  %v6205_v38 = vpack.c.bf16 %v5307_v37, %v5306_v36  ;;  %v6208_v41 = vpack.c.bf16 %v5309_v40, %v5308_v39  ;;  %v5315_v18 = vld [vmem:[%s7659_s0 + $0x30] sm:$0xff]  ;;  %s7667_s22 = sld [smem:[#allocation20_spill]] }
  0x29   : > { %v697_v1 = vsel %vm696_vm0, %v693_v0, 0.0  ;;  %v5298_v48 = vld [vmem:[%s7662_s7] ss:$0 sm:$0xff] }
  0x2a   : > { %698 = vadd.xlane.f32.xlu0 %v697_v1  ;;  %6191 = vmatpush3.bf16.msra.mxu0 %v6190_v16  ;;  %v5296_v51 = vld [vmem:[%s7663_s29] ss:$0 sm:$0xff] }
  0x2b   : > { %6197 = vmatpush3.bf16.msra.mxu1 %v6196_v19  ;;  %6198 = vmatprep.subr.bf16.mxu0 %v6527_v12  ;;  %v5313_v13 = vld [vmem:[%s7659_s0 + $0x20] sm:$0xff]  ;;  %v5316_v19 = vld [vmem:[%s7659_s0 + $0x38] sm:$0xff] }
  0x2c   : > { %5764 = vmatprep.subr.mxu1 %v6529_v20  ;;  %v6211_v16 = vpack.c.bf16 %v5314_v14, %v5313_v13 }
  0x2d   : > { %s6827_s27 = scalar_lea.vmem %s7665_s2, %s6696_s26  ;;  %s683_s2 = sand.u32 1, %s6517_s28  }
  0x2e   : > { %s5527_s26 = sshll.u32 %s6667_s4, 4  ;;  %s684_s1 = scalar_lea.vmem [#allocation2], %s683_s2 }
  0x2f   : > { %s5225_s5 = sshll.u32 %s684_s1, 4  ;;  %s5213_s30 = scalar_lea.sflag [#allocation3], %s683_s2  ;;  %s7563_s5 = int_to_ptr.vmem [resolvable:$true] %s5225_s5 }
  0x30   : > { %s6463_s6 = scalar_lea.vmem %s7563_s5, 16  ;;  %s6530_s4 = smov [#allocation2]  }
  0x31   : > { %p6464_p11 = scmp.ne.s32.totalorder %s7563_s5, %s6463_s6 }
  0x33   : > { %p6465_p12 = pnand %p6464_p11, %p6684_p5 }
  0x35   : > { %p6466_p13 = pneg %p6465_p12 }
  0xb7   : > { %v699_v2 = vpop.xlane.xlu0 %698 }
  0xb8   : > { %v701_v3 = vmul.f32 0.03125, %v699_v2 }
  0xba   : > { %v702_v4 = vsub.f32 %v693_v0, %v701_v3  ;;  %v6830_v0 = vld [vmem:[%s6827_s27] ss:$0 sm:$0xff] }
  0xbc   : > { %v703_v5 = vmul.f32 %v702_v4, %v702_v4 }
  0xbe   : > { %v704_v6 = vsel %vm696_vm0, %v703_v5, 0.0 }
  0xbf   : > { %705 = vadd.xlane.f32.xlu0 %v704_v6 }
 0x14c   : > { %v706_v21 = vpop.xlane.xlu0 %705 }
 0x14d   : > { %v707_v22 = vmul.f32 0.03125, %v706_v21  ;;  %v6214_v21 = vpack.c.bf16 %v5316_v19, %v5315_v18  ;;  %v5352_v19 = vld [vmem:[%s7612_s9 + $0x2] ss:$0 sm:$0xff] }
 0x14f   : > { %v708_v23 = vadd.f32 1e-12, %v707_v22 }
 0x151   : > { %6414 = vrsqrt.f32 %v708_v23 }
 0x15b   : > { %v6415_v24 = vpop.eup %6414 }
 0x15c   : > { %v710_v26 = vmul.f32 %v6415_v24, %v702_v4  ;;  %v5318_v24 = vld [vmem:[%s7662_s7 + $0x1] ss:$0 sm:$0xff] }
 0x15e   : > { %v717_v30 = vmul.f32 %v5294_v25, %v710_v26  ;;  %v5311_v26 = vld [vmem:[%s7664_s24 + $0x1] ss:$0 sm:$0xff] }
 0x160   : > { %v6750_v32 = vadd.f32 %v5295_v29, %v717_v30  ;;  %v5325_v29 = vld [vmem:[%s7612_s9 + $0x1] ss:$0 sm:$0xff] }
 0x162   : > { %5740 = vmatmul.mubr.msk.f32.vlgmr.msra.gmra.mrb[0].mxu0 %vm696_vm0, %v6750_v32  ;;  %5751 = vmatmul.mubr.msk.f32.vlgmr.msra.gmra.mrb[0].mxu1 %vm696_vm0, %v6750_v32 }
 0x163   : > { %6200 = vmatpush3.bf16.msra.mxu0 %v6199_v31  ;;  %5761 = vmatprep.mubr.msk.f32.mxu0 %vm6528_vm1, %v6529_v20 }
 0x164   : > { %6201 = vmatprep.subr.bf16.mxu0 %v6527_v12  ;;  %5766 = vmatprep.mubr.msk.f32.mxu1 %vm6528_vm1, %v6529_v20 }
 0x167   : > { %6203 = vmatpush3.bf16.msra.mxu0 %v6202_v35 }
 0x168   : > { %6204 = vmatprep.subr.bf16.mxu0 %v6527_v12 }
 0x16a   : > { %5762 = vmatmul.mubr.msk.f32.vlgmr.msra.gmra.mrb[2].mxu0 %vm696_vm0, %v6750_v32 }
 0x16b   : > { %6206 = vmatpush3.bf16.msra.mxu0 %v6205_v38  ;;  %5782 = vmatprep.mubr.msk.f32.mxu0 %vm6528_vm1, %v6529_v20 }
 0x16c   : > { %6207 = vmatprep.subr.bf16.mxu0 %v6527_v12 }
 0x16f   : > { %6209 = vmatpush3.bf16.msra.mxu0 %v6208_v41 }
 0x170   : > { %6216 = vmatprep.subr.bf16.mxu0 %v6527_v12 }
 0x172   : > { %5783 = vmatmul.mubr.msk.f32.vlgmr.msra.gmra.mrb[4].mxu0 %vm696_vm0, %v6750_v32 }
 0x173   : > { %6218 = vmatpush3.bf16.msra.mxu0 %v6217_v44  ;;  %5804 = vmatprep.mubr.msk.f32.mxu0 %vm6528_vm1, %v6529_v20 }
 0x174   : > { %6219 = vmatprep.subr.bf16.mxu0 %v6527_v12 }
 0x177   : > { %6221 = vmatpush3.bf16.msra.mxu0 %v6220_v47  ;;  %v1140_v47 = vld [vmem:[%s7613_s10] sm:$0xff] }
 0x178   : > { %5817 = vmatprep.subr.mxu0 %v6529_v20 }
 0x17a   : > { %5805 = vmatmul.mubr.msk.f32.vlgmr.msra.gmra.mrb[6].mxu0 %vm696_vm0, %v6750_v32 }
 0x17b   : > { %5819 = vmatprep.mubr.msk.f32.mxu0 %vm6528_vm1, %v6529_v20  ;;  %5818 = vmatpush3.msra.mxu0 %v5330_v43  ;;  %v5362_v43 = vld [vmem:[%s7658_s23 + $0x78] sm:$0xff] }
 0x17c   : > { %6222 = vmatprep.subr.bf16.mxu0 %v6527_v12 }
 0x235   : > { %v805_v49 = vpop.f32.mrb[0].mxu0  ;;  %v886_v50 = vpop.f32.mrb[0].mxu1 }
 0x236   : > { %v887_v52 = vadd.f32 %v5298_v48, %v886_v50  ;;  %v5741_v53 = vpop.f32.mrb[1].mxu0  ;;  %v5752_v54 = vpop.f32.mrb[1].mxu1  ;;  %v806_v55 = vadd.f32 %v5296_v51, %v805_v49  ;;  %v5340_v48 = vld [vmem:[%s7659_s0 + $0x40] sm:$0xff]  ;;  %v5341_v49 = vld [vmem:[%s7659_s0 + $0x48] sm:$0xff]  ;;  %v5342_v51 = vld [vmem:[%s7659_s0 + $0x50] sm:$0xff] }
 0x237   : > { %v6229_v50 = vpack.c.bf16 %v5341_v49, %v5340_v48  ;;  %v5333_v54 = vld [vmem:[%s7658_s23 + $0x40] sm:$0xff]  ;;  %v5375_v48 = vld [vmem:[%s7611_s8 + $0x70] sm:$0xff]  ;;  %v5376_v49 = vld [vmem:[%s7611_s8 + $0x78] sm:$0xff] }
 0x238   : > { %5765 = vmatpush3.xpose.msk.msra.mxu1 %vm971_vm2, %v887_v52  ;;  %v5343_v52 = vld [vmem:[%s7659_s0 + $0x58] sm:$0xff] }
 0x239   : > { %5769 = vmatprep.subr.mxu1 %v6529_v20  ;;  %v6232_v53 = vpack.c.bf16 %v5343_v52, %v5342_v51  ;;  %v5366_v51 = vld [vmem:[%s7659_s0 + $0x60] sm:$0xff]  ;;  %v5367_v52 = vld [vmem:[%s7659_s0 + $0x68] sm:$0xff] }
 0x23b   : > { %5767 = vmatmul.mubr.msk.f32.vlgmr.msra.gmra.mrb[2].mxu1 %vm971_vm2, %v806_v55  ;;  %v5334_v55 = vld [vmem:[%s7658_s23 + $0x48] sm:$0xff] }
 0x23c   : > { %5771 = vmatprep.mubr.msk.f32.mxu1 %vm6528_vm1, %v6529_v20 }
 0x23d   : > { %v967_v57 = vpop.f32.mrb[2].mxu0 }
 0x23e   : > { %v968_v58 = vadd.f32 %v5300_v56, %v967_v57  ;;  %v5763_v59 = vpop.f32.mrb[3].mxu0  ;;  %v6223_v56 = vpack.c.bf16 %v5334_v55, %v5333_v54  ;;  %v5335_v57 = vld [vmem:[%s7658_s23 + $0x50] sm:$0xff]  ;;  %v5369_v55 = vld [vmem:[%s7659_s0 + $0x78] sm:$0xff] }
 0x23f   : > { %v5368_v54 = vld [vmem:[%s7659_s0 + $0x70] sm:$0xff] }
 0x240   : > { %5770 = vmatpush3.msra.mxu1 %v968_v58  ;;  %v5336_v58 = vld [vmem:[%s7658_s23 + $0x58] sm:$0xff] }
 0x241   : > { %6210 = vmatprep.subr.bf16.mxu1 %v6527_v12 }
 0x245   : > { %v1220_v60 = vpop.f32.mrb[4].mxu0 }
 0x246   : > { %v5784_v61 = vpop.f32.mrb[5].mxu0  ;;  %v1221_v30 = vadd.f32 %v5311_v26, %v1220_v60 }
 0x247   : > { %v6226_v61 = vpack.c.bf16 %v5336_v58, %v5335_v57  ;;  %v6250_v58 = vpack.c.bf16 %v5369_v55, %v5368_v54 }
 0x24d   : > { %v1386_v62 = vpop.f32.mrb[6].mxu0 }
 0x24e   : > { %v5806_v63 = vpop.f32.mrb[7].mxu0  ;;  %v1387_v31 = vadd.f32 %v5325_v29, %v1386_v62  ;;  %v5347_v62 = vld [vmem:[%s7611_s8 + $0x40] sm:$0xff] }
 0x24f   : > { %v5348_v63 = vld [vmem:[%s7611_s8 + $0x48] sm:$0xff] }
 0x30e   : > { %v1044_v1 = vpop.f32.mrb[2].mxu1 }
 0x30f   : > { %v1048_v2 = vmul.f32 0.35355338, %v1044_v1  ;;  %v5768_v3 = vpop.f32.mrb[3].mxu1 }
 0x310   : > { %v6235_v3 = vpack.c.bf16 %v5348_v63, %v5347_v62 }
 0x311   : > { %v1055_v4 = vadd.f32 %v6830_v0, %v1048_v2 }
 0x313   : > { %v1056_v5 = vsel %vm971_vm2, %v1055_v4, -inf }
 0x314   : > { %1057 = vmax.xlane.f32.xlu1 %v1056_v5  ;;  %v5350_v5 = vld [vmem:[%s7611_s8 + $0x58] sm:$0xff] }
 0x3a1   : > { %v1058_v6 = vpop.xlane.xlu1 %1057 }
 0x3a2   : > { %v1059_v7 = vsub.f32 %v1055_v4, %v1058_v6  ;;  %v5349_v4 = vld [vmem:[%s7611_s8 + $0x50] sm:$0xff]  ;;  %v5345_v6 = vld [vmem:[%s7662_s7 + $0x2] ss:$0 sm:$0xff] }
 0x3a4   : > { %v1060_v8 = vmul.f32 1.442695, %v1059_v7  ;;  %v6238_v7 = vpack.c.bf16 %v5350_v5, %v5349_v4  ;;  %v5364_v5 = vld [vmem:[%s7664_s24 + $0x3] ss:$0 sm:$0xff] }
 0x3a6   : > { %6416 = vpow2.f32 %v1060_v8 }
 0x3b0   : > { %v6417_v9 = vpop.eup %6416 }
 0x3b1   : > { %v1062_v10 = vsel %vm971_vm2, %v6417_v9, 0.0 }
 0x3b2   : > { %1063 = vadd.xlane.f32.xlu1 %v1062_v10 }
 0x43f   : > { %v1064_v11 = vpop.xlane.xlu1 %1063 }
 0x440   : > { %6418 = vrcp.f32 %v1064_v11 }
 0x44a   : > { %v6419_v15 = vpop.eup %6418 }
 0x44b   : > { %v1066_v17 = vmul.f32 %v6419_v15, %v6417_v9  ;;  %v5338_v15 = vld [vmem:[%s7664_s24 + $0x2] ss:$0 sm:$0xff] }
 0x44d   : > { %5772 = vmatmul.mubr.msk.f32.vlgmr.msra.gmra.mrb[4].mxu1 %vm971_vm2, %v1066_v17 }
 0x44e   : > { %6212 = vmatpush3.bf16.msra.mxu1 %v6211_v16  ;;  %5793 = vmatprep.mubr.msk.f32.mxu1 %vm6528_vm1, %v6529_v20 }
 0x44f   : > { %6213 = vmatprep.subr.bf16.mxu1 %v6527_v12 }
 0x452   : > { %6215 = vmatpush3.bf16.msra.mxu1 %v6214_v21 }
 0x453   : > { %5807 = vmatprep.subr.mxu1 %v6529_v20 }
 0x455   : > { %5794 = vmatmul.mubr.msk.f32.vlgmr.msra.gmra.mrb[6].mxu1 %vm696_vm0, %v6750_v32 }
 0x456   : > { %5809 = vmatprep.mubr.msk.f32.mxu1 %vm6528_vm1, %v6529_v20 }
 0x520   : > { %v1136_v22 = vpop.f32.mrb[4].mxu1 }
 0x521   : > { %v5773_v23 = vpop.f32.mrb[5].mxu1 }
 0x528   : > { %v1303_v25 = vpop.f32.mrb[6].mxu1 }
 0x529   : > { %v1304_v27 = vadd.f32 %v5318_v24, %v1303_v25  ;;  %v5795_v28 = vpop.f32.mrb[7].mxu1 }
 0x52b   : > { %5808 = vmatpush3.xpose.msk.msra.mxu1 %vm971_vm2, %v1304_v27 }
 0x52c   : > { %5812 = vmatprep.subr.mxu1 %v6529_v20 }
 0x52e   : > { %5810 = vmatmul.mubr.msk.f32.vlgmr.msra.gmra.mrb[8].mxu1 %vm971_vm2, %v1221_v30 }
 0x52f   : > { %5813 = vmatpush3.msra.mxu1 %v1387_v31  ;;  %5814 = vmatprep.mubr.msk.f32.mxu1 %vm6528_vm1, %v6529_v20 }
 0x530   : > { %5822 = vmatprep.subr.mxu1 %v6529_v20 }
 0x601   : > { %v1462_v33 = vpop.f32.mrb[8].mxu1 }
 0x602   : > { %v1466_v34 = vmul.f32 0.35355338, %v1462_v33  ;;  %v5811_v35 = vpop.f32.mrb[9].mxu1 }
 0x603   : > { %v5357_v35 = vld [vmem:[%s7613_s10 + $0x10] sm:$0xff] }
 0x604   : > { %v1467_v36 = vadd.f32 %v6830_v0, %v1466_v34 }
 0x606   : > { %v1468_v37 = vsel %vm971_vm2, %v1467_v36, -inf }
 0x607   : > { %1469 = vmax.xlane.f32.xlu0 %v1468_v37  ;;  %v5359_v37 = vld [vmem:[%s7658_s23 + $0x60] sm:$0xff] }
 0x694   : > { %v1470_v38 = vpop.xlane.xlu0 %1469 }
 0x695   : > { %v1471_v39 = vsub.f32 %v1467_v36, %v1470_v38  ;;  %v5360_v38 = vld [vmem:[%s7658_s23 + $0x68] sm:$0xff] }
 0x697   : > { %v1472_v40 = vmul.f32 1.442695, %v1471_v39 }
 0x699   : > { %6420 = vpow2.f32 %v1472_v40  ;;  %v6241_v40 = vpack.c.bf16 %v5360_v38, %v5359_v37 }
 0x6a3   : > { %v6421_v41 = vpop.eup %6420 }
 0x6a4   : > { %v1474_v42 = vsel %vm971_vm2, %v6421_v41, 0.0 }
 0x6a5   : > { %1475 = vadd.xlane.f32.xlu1 %v1474_v42  ;;  %v5361_v42 = vld [vmem:[%s7658_s23 + $0x70] sm:$0xff] }
 0x732   : > { %v1476_v44 = vpop.xlane.xlu1 %1475 }
 0x733   : > { %6422 = vrcp.f32 %v1476_v44  ;;  %v6244_v44 = vpack.c.bf16 %v5362_v43, %v5361_v42  ;;  %v2712_v42 = vld [vmem:[%s7617_s14] sm:$0xff]  ;;  %v2713_v43 = vld [vmem:[%s7617_s14 + $0x8] sm:$0xff] }
 0x73d   : > { %v6423_v45 = vpop.eup %6422 }
 0x73e   : > { %v1478_v46 = vmul.f32 %v6423_v45, %v6421_v41  ;;  %v5373_v45 = vld [vmem:[%s7611_s8 + $0x60] sm:$0xff] }
 0x740   : > { %5815 = vmatmul.mubr.msk.f32.vlgmr.msra.gmra.mrb[10].mxu1 %vm971_vm2, %v1478_v46  ;;  %v5374_v46 = vld [vmem:[%s7611_s8 + $0x68] sm:$0xff] }
 0x741   : > { %5823 = vmatpush3.msra.mxu1 %v1140_v47  ;;  %5824 = vmatprep.mubr.msk.f32.mxu1 %vm6528_vm1, %v6529_v20  ;;  %v6253_v47 = vpack.c.bf16 %v5374_v46, %v5373_v45  ;;  %v2715_v45 = vld [vmem:[%s7617_s14 + $0x18] sm:$0xff] }
 0x742   : > { %6228 = vmatprep.subr.bf16.mxu1 %v6527_v12 }
 0x744   : > { %5825 = vmatmul.mubr.msk.f32.vlgmr.msra.gmra.mrb[12].mxu1 %vm971_vm2, %v1136_v22 }
 0x745   : > { %6230 = vmatpush3.bf16.msra.mxu1 %v6229_v50  ;;  %5846 = vmatprep.mubr.msk.f32.mxu1 %vm6528_vm1, %v6529_v20  ;;  %v6256_v50 = vpack.c.bf16 %v5376_v49, %v5375_v48 }
 0x746   : > { %6231 = vmatprep.subr.bf16.mxu1 %v6527_v12 }
 0x749   : > { %6233 = vmatpush3.bf16.msra.mxu1 %v6232_v53  ;;  %v6247_v53 = vpack.c.bf16 %v5367_v52, %v5366_v51  ;;  %v5386_v51 = vld [vmem:[%s7615_s12] ss:$0 sm:$0xff] }
 0x74a   : > { %5860 = vmatprep.subr.mxu1 %v6529_v20 }
 0x74c   : > { %5847 = vmatmul.mubr.msk.f32.vlgmr.msra.gmra.mrb[14].mxu1 %vm696_vm0, %v6750_v32 }
 0x74d   : > { %5862 = vmatprep.mubr.msk.f32.mxu1 %vm6528_vm1, %v6529_v20 }
 0x813   : > { %v1548_v59 = vpop.f32.mrb[10].mxu1 }
 0x814   : > { %v5816_v60 = vpop.f32.mrb[11].mxu1  ;;  %5820 = vmatmul.mubr.msk.f32.vlgmr.msra.gmra.mrb[8].mxu0 %vm971_vm2, %v1548_v59 }
 0x815   : > { %6224 = vmatpush3.bf16.msra.mxu0 %v6223_v56  ;;  %5835 = vmatprep.mubr.msk.f32.mxu0 %vm6528_vm1, %v6529_v20 }
 0x816   : > { %6225 = vmatprep.subr.bf16.mxu0 %v6527_v12 }
 0x817   : > { %v1696_v1 = vpop.f32.mrb[12].mxu1 }
 0x818   : > { %v5826_v2 = vpop.f32.mrb[13].mxu1 }
 0x819   : > { %6227 = vmatpush3.bf16.msra.mxu0 %v6226_v61 }
 0x81a   : > { %6234 = vmatprep.subr.bf16.mxu0 %v6527_v12 }
 0x81c   : > { %5836 = vmatmul.mubr.msk.f32.vlgmr.msra.gmra.mrb[10].mxu0 %vm696_vm0, %v6750_v32 }
 0x81d   : > { %6236 = vmatpush3.bf16.msra.mxu0 %v6235_v3  ;;  %5857 = vmatprep.mubr.msk.f32.mxu0 %vm6528_vm1, %v6529_v20  ;;  %v5371_v3 = vld [vmem:[%s7662_s7 + $0x3] ss:$0 sm:$0xff] }
 0x81e   : > { %6237 = vmatprep.subr.bf16.mxu0 %v6527_v12 }
 0x81f   : > { %v1862_v8 = vpop.f32.mrb[14].mxu1 }
 0x820   : > { %v1863_v9 = vadd.f32 %v5345_v6, %v1862_v8  ;;  %v5848_v10 = vpop.f32.mrb[15].mxu1  ;;  %v5378_v8 = vld [vmem:[%s7612_s9 + $0x3] ss:$0 sm:$0xff] }
 0x821   : > { %6239 = vmatpush3.bf16.msra.mxu0 %v6238_v7 }
 0x822   : > { %5861 = vmatpush3.xpose.msk.msra.mxu1 %vm971_vm2, %v1863_v9  ;;  %5870 = vmatprep.subr.mxu0 %v6529_v20 }
 0x823   : > { %5865 = vmatprep.subr.mxu1 %v6529_v20 }
 0x824   : > { %5858 = vmatmul.mubr.msk.f32.vlgmr.msra.gmra.mrb[12].mxu0 %vm696_vm0, %v6750_v32 }
 0x825   : > { %5872 = vmatprep.mubr.msk.f32.mxu0 %vm6528_vm1, %v6529_v20  ;;  %5871 = vmatpush3.msra.mxu0 %v5357_v35 }
 0x826   : > { %6246 = vmatprep.subr.bf16.mxu0 %v6527_v12 }
 0x8e7   : > { %v1623_v11 = vpop.f32.mrb[8].mxu0 }
 0x8e8   : > { %v6950_v13 = vadd.f32 %v1696_v1, %v1623_v11  ;;  %v5821_v14 = vpop.f32.mrb[9].mxu0 }
 0x8ef   : > { %v1779_v16 = vpop.f32.mrb[10].mxu0 }
 0x8f0   : > { %v1780_v17 = vadd.f32 %v5338_v15, %v1779_v16  ;;  %v5837_v18 = vpop.f32.mrb[11].mxu0 }
 0x8f2   : > { %5863 = vmatmul.mubr.msk.f32.vlgmr.msra.gmra.mrb[16].mxu1 %vm971_vm2, %v1780_v17 }
 0x8f3   : > { %5867 = vmatprep.mubr.msk.f32.mxu1 %vm6528_vm1, %v6529_v20 }
 0x8f7   : > { %v1945_v21 = vpop.f32.mrb[12].mxu0 }
 0x8f8   : > { %v1946_v22 = vadd.f32 %v5352_v19, %v1945_v21  ;;  %v5859_v23 = vpop.f32.mrb[13].mxu0 }
 0x8f9   : > { %v5383_v23 = vld [vmem:[%s7613_s10 + $0x18] sm:$0xff] }
 0x8fa   : > { %5866 = vmatpush3.msra.mxu1 %v1946_v22 }
 0x8fb   : > { %6240 = vmatprep.subr.bf16.mxu1 %v6527_v12 }
 0x9c5   : > { %v2021_v24 = vpop.f32.mrb[16].mxu1 }
 0x9c6   : > { %v2025_v25 = vmul.f32 0.35355338, %v2021_v24  ;;  %v5864_v26 = vpop.f32.mrb[17].mxu1 }
 0x9c8   : > { %v2026_v27 = vadd.f32 %v6830_v0, %v2025_v25 }
 0x9ca   : > { %v2027_v28 = vsel %vm971_vm2, %v2026_v27, -inf }
 0x9cb   : > { %2028 = vmax.xlane.f32.xlu0 %v2027_v28 }
 0xa58   : > { %v2029_v29 = vpop.xlane.xlu0 %2028 }
 0xa59   : > { %v2030_v30 = vsub.f32 %v2026_v27, %v2029_v29 }
 0xa5b   : > { %v2031_v31 = vmul.f32 1.442695, %v2030_v30  ;;  %v5385_v30 = vld [vmem:[%s7614_s11] ss:$0 sm:$0xff] }
 0xa5d   : > { %6424 = vpow2.f32 %v2031_v31 }
 0xa67   : > { %v6425_v33 = vpop.eup %6424 }
 0xa68   : > { %v2033_v34 = vsel %vm971_vm2, %v6425_v33, 0.0 }
 0xa69   : > { %2034 = vadd.xlane.f32.xlu1 %v2033_v34 }
 0xaf6   : > { %v2035_v36 = vpop.xlane.xlu1 %2034 }
 0xaf7   : > { %6426 = vrcp.f32 %v2035_v36 }
 0xb01   : > { %v6427_v39 = vpop.eup %6426 }
 0xb02   : > { %v2037_v41 = vmul.f32 %v6427_v39, %v6425_v33 }
 0xb04   : > { %5868 = vmatmul.mubr.msk.f32.vlgmr.msra.gmra.mrb[18].mxu1 %vm971_vm2, %v2037_v41 }
 0xb05   : > { %6242 = vmatpush3.bf16.msra.mxu1 %v6241_v40  ;;  %5883 = vmatprep.mubr.msk.f32.mxu1 %vm6528_vm1, %v6529_v20 }
 0xb06   : > { %6243 = vmatprep.subr.bf16.mxu1 %v6527_v12 }
 0xb09   : > { %6245 = vmatpush3.bf16.msra.mxu1 %v6244_v44  ;;  %v6259_v44 = vpack.c.bf16 %v2713_v43, %v2712_v42  ;;  %v5411_v42 = vld [vmem:[%s7611_s8 + $0x98] sm:$0xff] }
 0xb0a   : > { %6252 = vmatprep.subr.bf16.mxu1 %v6527_v12 }
 0xb0c   : > { %5884 = vmatmul.mubr.msk.f32.vlgmr.msra.gmra.mrb[20].mxu1 %vm696_vm0, %v6750_v32 }
 0xb0d   : > { %6254 = vmatpush3.bf16.msra.mxu1 %v6253_v47  ;;  %5905 = vmatprep.mubr.msk.f32.mxu1 %vm6528_vm1, %v6529_v20 }
 0xb0e   : > { %6255 = vmatprep.subr.bf16.mxu1 %v6527_v12 }
 0xb11   : > { %6257 = vmatpush3.bf16.msra.mxu1 %v6256_v50 }
 0xb12   : > { %5918 = vmatprep.subr.mxu1 %v6529_v20 }
 0xb14   : > { %5906 = vmatmul.mubr.msk.f32.vlgmr.msra.gmra.mrb[22].mxu1 %vm696_vm0, %v6750_v32 }
 0xb15   : > { %5920 = vmatprep.mubr.msk.f32.mxu1 %vm6528_vm1, %v6529_v20  ;;  %5919 = vmatpush3.msra.mxu1 %v5383_v23 }
 0xb16   : > { %6264 = vmatprep.subr.bf16.mxu1 %v6527_v12 }
 0xbd7   : > { %v2107_v56 = vpop.f32.mrb[18].mxu1 }
 0xbd8   : > { %v5869_v57 = vpop.f32.mrb[19].mxu1  ;;  %5873 = vmatmul.mubr.msk.f32.vlgmr.msra.gmra.mrb[14].mxu0 %vm971_vm2, %v2107_v56  ;;  %v2805_v56 = vld [vmem:[%s7619_s16] sm:$0xff] }
 0xbd9   : > { %6248 = vmatpush3.bf16.msra.mxu0 %v6247_v53  ;;  %5894 = vmatprep.mubr.msk.f32.mxu0 %vm6528_vm1, %v6529_v20  ;;  %v5387_v53 = vld [vmem:[%s7616_s13] ss:$0 sm:$0xff]  ;;  %v2806_v57 = vld [vmem:[%s7619_s16 + $0x8] sm:$0xff] }
 0xbda   : > { %6249 = vmatprep.subr.bf16.mxu0 %v6527_v12 }
 0xbdd   : > { %6251 = vmatpush3.bf16.msra.mxu0 %v6250_v58  ;;  %v6265_v58 = vpack.c.bf16 %v2806_v57, %v2805_v56  ;;  %v5404_v56 = vld [vmem:[%s7659_s0 + $0x98] sm:$0xff] }
 0xbde   : > { %5908 = vmatprep.subr.mxu0 %v6529_v20 }
 0xbdf   : > { %v2266_v59 = vpop.f32.mrb[20].mxu1 }
 0xbe0   : > { %v5885_v60 = vpop.f32.mrb[21].mxu1  ;;  %5895 = vmatmul.mubr.msk.f32.vlgmr.msra.gmra.mrb[16].mxu0 %vm696_vm0, %v6750_v32  ;;  %v2267_v9 = vadd.f32 %v5364_v5, %v2266_v59  ;;  %v2807_v59 = vld [vmem:[%s7619_s16 + $0x10] sm:$0xff]  ;;  %v5388_v5 = vld [vmem:[%s7618_s15] ss:$0 sm:$0xff] }
 0xbe1   : > { %5910 = vmatprep.mubr.msk.f32.mxu0 %vm6528_vm1, %v6529_v20  ;;  %v2808_v60 = vld [vmem:[%s7619_s16 + $0x18] sm:$0xff] }
 0xbe7   : > { %v2432_v61 = vpop.f32.mrb[22].mxu1 }
 0xbe8   : > { %v5907_v62 = vpop.f32.mrb[23].mxu1  ;;  %v2433_v10 = vadd.f32 %v5378_v8, %v2432_v61  ;;  %v6268_v61 = vpack.c.bf16 %v2808_v60, %v2807_v59 }
 0xbe9   : > { %v2809_v62 = vld [vmem:[%s7619_s16 + $0x20] sm:$0xff] }
 0xcab   : > { %v2182_v63 = vpop.f32.mrb[14].mxu0 }
 0xcac   : > { %v2186_v1 = vadd.f32 %v2182_v63, %v6950_v13  ;;  %v5874_v2 = vpop.f32.mrb[15].mxu0  ;;  %v2810_v63 = vld [vmem:[%s7619_s16 + $0x28] sm:$0xff] }
 0xcad   : > { %v2811_v2 = vld [vmem:[%s7619_s16 + $0x30] sm:$0xff] }
 0xcb3   : > { %v2349_v4 = vpop.f32.mrb[16].mxu0 }
 0xcb4   : > { %v2350_v6 = vadd.f32 %v5371_v3, %v2349_v4  ;;  %v5896_v7 = vpop.f32.mrb[17].mxu0  ;;  %v2812_v3 = vld [vmem:[%s7619_s16 + $0x38] sm:$0xff] }
 0xcb5   : > { %v6274_v4 = vpack.c.bf16 %v2812_v3, %v2811_v2  ;;  %v5419_v3 = vld [vmem:[%s7658_s23 + $0xa0] sm:$0xff] }
 0xcb6   : > { %5909 = vmatpush3.xpose.msk.msra.mxu0 %vm971_vm2, %v2350_v6 }
 0xcb7   : > { %5913 = vmatprep.subr.mxu0 %v6529_v20 }
 0xcb9   : > { %5911 = vmatmul.mubr.msk.f32.vlgmr.msra.gmra.mrb[18].mxu0 %vm971_vm2, %v2267_v9 }
 0xcba   : > { %5914 = vmatpush3.msra.mxu0 %v2433_v10  ;;  %5915 = vmatprep.mubr.msk.f32.mxu0 %vm6528_vm1, %v6529_v20 }
 0xcbb   : > { %6258 = vmatprep.subr.bf16.mxu0 %v6527_v12 }
 0xd8c   : > { %v2508_v11 = vpop.f32.mrb[18].mxu0 }
 0xd8d   : > { %v2512_v13 = vmul.f32 0.35355338, %v2508_v11  ;;  %v5912_v14 = vpop.f32.mrb[19].mxu0 }
 0xd8f   : > { %v2513_v15 = vadd.f32 %v6830_v0, %v2512_v13 }
 0xd91   : > { %v2514_v16 = vsel %vm971_vm2, %v2513_v15, -inf }
 0xd92   : > { %2515 = vmax.xlane.f32.xlu0 %v2514_v16 }
 0xe1f   : > { %v2516_v17 = vpop.xlane.xlu0 %2515 }
 0xe20   : > { %v2517_v18 = vsub.f32 %v2513_v15, %v2516_v17 }
 0xe22   : > { %v2518_v19 = vmul.f32 1.442695, %v2517_v18 }
 0xe24   : > { %6428 = vpow2.f32 %v2518_v19  ;;  %v5390_v19 = vld [vmem:[%s7620_s17] ss:$0 sm:$0xff] }
 0xe2e   : > { %v6429_v21 = vpop.eup %6428 }
 0xe2f   : > { %v2520_v22 = vsel %vm971_vm2, %v6429_v21, 0.0 }
 0xe30   : > { %2521 = vadd.xlane.f32.xlu1 %v2520_v22 }
 0xebd   : > { %v2522_v24 = vpop.xlane.xlu1 %2521 }
 0xebe   : > { %6430 = vrcp.f32 %v2522_v24 }
 0xec8   : > { %v6431_v25 = vpop.eup %6430 }
 0xec9   : > { %v2524_v26 = vmul.f32 %v6431_v25, %v6429_v21 }
 0xecb   : > { %5916 = vmatmul.mubr.msk.f32.vlgmr.msra.gmra.mrb[20].mxu0 %vm971_vm2, %v2524_v26 }
 0xecc   : > { %5931 = vmatprep.mubr.msk.f32.mxu0 %vm6528_vm1, %v6529_v20  ;;  %6260 = vmatpush3.bf16.msra.mxu0 %v6259_v44 }
 0xecd   : > { %6261 = vmatprep.subr.bf16.mxu0 %v6527_v12 }
 0xf9e   : > { %v2594_v27 = vpop.f32.mrb[20].mxu0 }
 0xf9f   : > { %v5917_v28 = vpop.f32.mrb[21].mxu0  ;;  %5921 = vmatmul.mubr.msk.f32.vlgmr.msra.gmra.mrb[24].mxu1 %vm971_vm2, %v2594_v27 }
 0xfa0   : > { %5950 = vmatprep.mubr.msk.f32.mxu1 %vm6528_vm1, %v6529_v20  ;;  %6266 = vmatpush3.bf16.msra.mxu1 %v6265_v58  ;;  %v5413_v58 = vld [vmem:[%s7612_s9 + $0x4] ss:$0 sm:$0xff] }
 0xfa1   : > { %6267 = vmatprep.subr.bf16.mxu1 %v6527_v12 }
 0xfa4   : > { %6269 = vmatpush3.bf16.msra.mxu1 %v6268_v61 }
 0xfa5   : > { %6270 = vmatprep.subr.bf16.mxu1 %v6527_v12 }
0x1072   : > { %v2669_v29 = vpop.f32.mrb[24].mxu1 }
0x1073   : > { %v2673_v31 = vadd.f32 %v2669_v29, %v2186_v1  ;;  %v5922_v33 = vpop.f32.mrb[25].mxu1  ;;  %v6271_v1 = vpack.c.bf16 %v2810_v63, %v2809_v62 }
0x1074   : > { %v5395_v33 = vld [vmem:[%s7658_s23 + $0x88] sm:$0xff] }
0x1075   : > { %v2681_v34 = vadd.f32 %v5385_v30, %v2673_v31  ;;  %6272 = vmatpush3.bf16.msra.mxu1 %v6271_v1  ;;  %v5394_v31 = vld [vmem:[%s7658_s23 + $0x80] sm:$0xff] }
0x1076   : > { %6273 = vmatprep.subr.bf16.mxu1 %v6527_v12  ;;  %v5406_v1 = vld [vmem:[%s7662_s7 + $0x4] ss:$0 sm:$0xff] }
0x1077   : > { %v2682_v35 = vadd.f32 %v2681_v34, %v6750_v32  ;;  %v2714_v32 = vld [vmem:[%s7617_s14 + $0x10] sm:$0xff]  ;;  %v6277_v34 = vpack.c.bf16 %v5395_v33, %v5394_v31 }
0x1078   : > { %v6262_v46 = vpack.c.bf16 %v2715_v45, %v2714_v32 }
0x1079   : > { %v2685_v36 = vsel %vm696_vm0, %v2682_v35, 0.0  ;;  %6275 = vmatpush3.bf16.msra.mxu1 %v6274_v4  ;;  %v5420_v4 = vld [vmem:[%s7658_s23 + $0xa8] sm:$0xff] }
0x107a   : > { %2686 = vadd.xlane.f32.xlu0 %v2685_v36  ;;  %6263 = vmatpush3.bf16.msra.mxu0 %v6262_v46  ;;  %v5409_v36 = vld [vmem:[%s7611_s8 + $0x88] sm:$0xff] }
0x107b   : > { %6276 = vmatprep.subr.bf16.mxu0 %v6527_v12  ;;  %6288 = vmatprep.subr.bf16.mxu1 %v6527_v12 }
0x1107   : > { %v2687_v37 = vpop.xlane.xlu0 %2686 }
0x1108   : > { %v2688_v38 = vmul.f32 0.03125, %v2687_v37 }
0x110a   : > { %v2689_v39 = vsub.f32 %v2682_v35, %v2688_v38  ;;  %v5408_v35 = vld [vmem:[%s7611_s8 + $0x80] sm:$0xff]  ;;  %v5396_v38 = vld [vmem:[%s7658_s23 + $0x90] sm:$0xff] }
0x110b   : > { %v6289_v37 = vpack.c.bf16 %v5409_v36, %v5408_v35 }
0x110c   : > { %v2690_v40 = vmul.f32 %v2689_v39, %v2689_v39 }
0x110e   : > { %v2691_v41 = vsel %vm696_vm0, %v2690_v40, 0.0 }
0x110f   : > { %2692 = vadd.xlane.f32.xlu1 %v2691_v41  ;;  %v5410_v41 = vld [vmem:[%s7611_s8 + $0x90] sm:$0xff] }
0x1110   : > { %v6292_v43 = vpack.c.bf16 %v5411_v42, %v5410_v41  ;;  %v5428_v42 = vld [vmem:[%s7659_s0 + $0xb0] sm:$0xff] }
0x119c   : > { %v2693_v47 = vpop.xlane.xlu1 %2692 }
0x119d   : > { %v2694_v48 = vmul.f32 0.03125, %v2693_v47  ;;  %v5392_v47 = vld [vmem:[%s7621_s18] ss:$0 sm:$0xff] }
0x119f   : > { %v2695_v49 = vadd.f32 1e-12, %v2694_v48 }
0x11a1   : > { %6432 = vrsqrt.f32 %v2695_v49  ;;  %v5401_v49 = vld [vmem:[%s7659_s0 + $0x80] sm:$0xff] }
0x11ab   : > { %v6433_v50 = vpop.eup %6432 }
0x11ac   : > { %v2697_v52 = vmul.f32 %v6433_v50, %v2689_v39  ;;  %v5397_v39 = vld [vmem:[%s7658_s23 + $0x98] sm:$0xff]  ;;  %v5402_v50 = vld [vmem:[%s7659_s0 + $0x88] sm:$0xff] }
0x11ad   : > { %v6280_v40 = vpack.c.bf16 %v5397_v39, %v5396_v38  ;;  %v5427_v38 = vld [vmem:[%s7659_s0 + $0xa8] sm:$0xff] }
0x11ae   : > { %v2704_v54 = vmul.f32 %v5386_v51, %v2697_v52  ;;  %v5393_v51 = vld [vmem:[%s7622_s19] ss:$0 sm:$0xff] }
0x11b0   : > { %v2711_v55 = vadd.f32 %v5387_v53, %v2704_v54  ;;  %v6283_v53 = vpack.c.bf16 %v5402_v50, %v5401_v49 }
0x11b2   : > { %5932 = vmatmul.mubr.msk.f32.vlgmr.msra.gmra.mrb[22].mxu0 %vm696_vm0, %v2711_v55 }
0x11b3   : > { %5961 = vmatprep.mubr.msk.f32.mxu0 %vm6528_vm1, %v6529_v20  ;;  %6278 = vmatpush3.bf16.msra.mxu0 %v6277_v34 }
0x11b4   : > { %6279 = vmatprep.subr.bf16.mxu0 %v6527_v12 }
0x11b7   : > { %6281 = vmatpush3.bf16.msra.mxu0 %v6280_v40 }
0x11b8   : > { %6282 = vmatprep.subr.bf16.mxu0 %v6527_v12 }
0x1285   : > { %v2792_v6 = vpop.f32.mrb[22].mxu0 }
0x1286   : > { %v2793_v7 = vadd.f32 %v5388_v5, %v2792_v6  ;;  %v5933_v8 = vpop.f32.mrb[23].mxu0  ;;  %v5399_v5 = vld [vmem:[%s7664_s24 + $0x4] ss:$0 sm:$0xff] }
0x1287   : > { %v6295_v8 = vpack.c.bf16 %v5420_v4, %v5419_v3 }
0x1288   : > { %v2797_v9 = vmul.f32 0.044715, %v2793_v7  ;;  %v2796_v16 = vmul.f32 0.5, %v2793_v7 }
0x128a   : > { %v2798_v10 = vmul.f32 %v2797_v9, %v2793_v7 }
0x128c   : > { %v2799_v11 = vmul.f32 %v2798_v10, %v2793_v7  ;;  %v5421_v10 = vld [vmem:[%s7658_s23 + $0xb0] sm:$0xff] }
0x128e   : > { %v2800_v13 = vadd.f32 %v2799_v11, %v2793_v7  ;;  %v5422_v11 = vld [vmem:[%s7658_s23 + $0xb8] sm:$0xff] }
0x1290   : > { %v2801_v14 = vmul.f32 0.7978846, %v2800_v13  ;;  %v6298_v13 = vpack.c.bf16 %v5422_v11, %v5421_v10  ;;  %v5456_v10 = vld [vmem:[%s7659_s0 + $0xd8] sm:$0xff] }
0x1292   : > { %6434 = vtanh.f32 %v2801_v14  ;;  %v5433_v14 = vld [vmem:[%s7611_s8 + $0xa0] sm:$0xff] }
0x129c   : > { %v6435_v15 = vpop.eup %6434 }
0x129d   : > { %v2803_v17 = vadd.f32 1.0, %v6435_v15  ;;  %v5434_v15 = vld [vmem:[%s7611_s8 + $0xa8] sm:$0xff] }
0x129f   : > { %v2804_v18 = vmul.f32 %v2803_v17, %v2796_v16  ;;  %v6307_v16 = vpack.c.bf16 %v5434_v15, %v5433_v14  ;;  %v5435_v17 = vld [vmem:[%s7611_s8 + $0xb0] sm:$0xff]  ;;  %v5447_v14 = vld [vmem:[%s7658_s23 + $0xc8] sm:$0xff] }
0x12a1   : > { %5951 = vmatmul.mubr.msk.f32.vlgmr.msra.gmra.mrb[26].mxu1 %vm2820_vm3, %v2804_v18  ;;  %v5436_v18 = vld [vmem:[%s7611_s8 + $0xb8] sm:$0xff] }
0x12a2   : > { %5983 = vmatprep.mubr.msk.f32.mxu1 %vm6528_vm1, %v6529_v20  ;;  %6290 = vmatpush3.bf16.msra.mxu1 %v6289_v37  ;;  %v5426_v37 = vld [vmem:[%s7659_s0 + $0xa0] sm:$0xff] }
0x12a3   : > { %6291 = vmatprep.subr.bf16.mxu1 %v6527_v12  ;;  %v6301_v40 = vpack.c.bf16 %v5427_v38, %v5426_v37  ;;  %v5451_v38 = vld [vmem:[%s7664_s24 + $0x6] ss:$0 sm:$0xff] }
0x12a6   : > { %6293 = vmatpush3.bf16.msra.mxu1 %v6292_v43  ;;  %v5429_v43 = vld [vmem:[%s7659_s0 + $0xb8] sm:$0xff] }
0x12a7   : > { %5991 = vmatprep.subr.mxu1 %v6529_v20 }
0x1374   : > { %v2890_v21 = vpop.f32.mrb[26].mxu1 }
0x1375   : > { %v2891_v22 = vadd.f32 %v5390_v19, %v2890_v21  ;;  %v5952_v23 = vpop.f32.mrb[27].mxu1  ;;  %v6310_v19 = vpack.c.bf16 %v5436_v18, %v5435_v17  ;;  %v5449_v17 = vld [vmem:[%s7658_s23 + $0xd8] sm:$0xff] }
0x1377   : > { %v2894_v24 = vadd.f32 %v2891_v22, %v2711_v55  ;;  %v5403_v55 = vld [vmem:[%s7659_s0 + $0x90] sm:$0xff] }
0x1378   : > { %v6286_v57 = vpack.c.bf16 %v5404_v56, %v5403_v55 }
0x1379   : > { %v2897_v25 = vsel %vm696_vm0, %v2894_v24, 0.0 }
0x137a   : > { %2898 = vadd.xlane.f32.xlu0 %v2897_v25 }
0x1407   : > { %v2899_v26 = vpop.xlane.xlu0 %2898 }
0x1408   : > { %v2900_v27 = vmul.f32 0.03125, %v2899_v26 }
0x140a   : > { %v2901_v28 = vsub.f32 %v2894_v24, %v2900_v27 }
0x140c   : > { %v2902_v29 = vmul.f32 %v2901_v28, %v2901_v28 }
0x140e   : > { %v2903_v30 = vsel %vm696_vm0, %v2902_v29, 0.0 }
0x140f   : > { %2904 = vadd.xlane.f32.xlu1 %v2903_v30 }
0x149c   : > { %v2905_v44 = vpop.xlane.xlu1 %2904 }
0x149d   : > { %v2906_v32 = vmul.f32 0.03125, %v2905_v44  ;;  %v6304_v44 = vpack.c.bf16 %v5429_v43, %v5428_v42  ;;  %v5465_v42 = vld [vmem:[%s7612_s9 + $0x6] ss:$0 sm:$0xff] }
0x149f   : > { %v2907_v45 = vadd.f32 1e-12, %v2906_v32 }
0x14a1   : > { %6436 = vrsqrt.f32 %v2907_v45 }
0x14ab   : > { %v6437_v46 = vpop.eup %6436 }
0x14ac   : > { %v2909_v48 = vmul.f32 %v6437_v46, %v2901_v28  ;;  %v5431_v46 = vld [vmem:[%s7662_s7 + $0x5] ss:$0 sm:$0xff] }
0x14ae   : > { %v2916_v52 = vmul.f32 %v5392_v47, %v2909_v48  ;;  %v5424_v48 = vld [vmem:[%s7664_s24 + $0x5] ss:$0 sm:$0xff] }
0x14b0   : > { %v7166_v54 = vadd.f32 %v5393_v51, %v2916_v52  ;;  %v5438_v51 = vld [vmem:[%s7612_s9 + $0x5] ss:$0 sm:$0xff] }
0x14b2   : > { %5962 = vmatmul.mubr.msk.f32.vlgmr.msra.gmra.mrb[24].mxu0 %vm696_vm0, %v7166_v54  ;;  %5984 = vmatmul.mubr.msk.f32.vlgmr.msra.gmra.mrb[28].mxu1 %vm696_vm0, %v7166_v54 }
0x14b3   : > { %6284 = vmatpush3.bf16.msra.mxu0 %v6283_v53  ;;  %5972 = vmatprep.mubr.msk.f32.mxu0 %vm6528_vm1, %v6529_v20 }
0x14b4   : > { %6285 = vmatprep.subr.bf16.mxu0 %v6527_v12  ;;  %5993 = vmatprep.mubr.msk.f32.mxu1 %vm6528_vm1, %v6529_v20 }
0x14b7   : > { %6287 = vmatpush3.bf16.msra.mxu0 %v6286_v57 }
0x14b8   : > { %5986 = vmatprep.subr.mxu0 %v6529_v20 }
0x14ba   : > { %5973 = vmatmul.mubr.msk.f32.vlgmr.msra.gmra.mrb[26].mxu0 %vm696_vm0, %v7166_v54 }
0x14bb   : > { %5988 = vmatprep.mubr.msk.f32.mxu0 %vm6528_vm1, %v6529_v20 }
0x1585   : > { %v3006_v59 = vpop.f32.mrb[24].mxu0  ;;  %v3172_v60 = vpop.f32.mrb[28].mxu1 }
0x1586   : > { %v3173_v61 = vadd.f32 %v5413_v58, %v3172_v60  ;;  %v5963_v62 = vpop.f32.mrb[25].mxu0  ;;  %v5985_v63 = vpop.f32.mrb[29].mxu1  ;;  %v3007_v9 = vadd.f32 %v5399_v5, %v3006_v59  ;;  %v5418_v5 = vld [vmem:[%s7613_s10 + $0x20] sm:$0xff] }
0x1588   : > { %5992 = vmatpush3.msra.mxu1 %v3173_v61 }
0x1589   : > { %6300 = vmatprep.subr.bf16.mxu1 %v6527_v12 }
0x158d   : > { %v3089_v2 = vpop.f32.mrb[26].mxu0 }
0x158e   : > { %v3090_v6 = vadd.f32 %v5406_v1, %v3089_v2  ;;  %v5974_v7 = vpop.f32.mrb[27].mxu0  ;;  %v5443_v2 = vld [vmem:[%s7613_s10 + $0x28] sm:$0xff] }
0x158f   : > { %v5454_v7 = vld [vmem:[%s7659_s0 + $0xc8] sm:$0xff] }
0x1590   : > { %5987 = vmatpush3.xpose.msk.msra.mxu0 %vm971_vm2, %v3090_v6  ;;  %v5453_v6 = vld [vmem:[%s7659_s0 + $0xc0] sm:$0xff] }
0x1591   : > { %6294 = vmatprep.subr.bf16.mxu0 %v6527_v12 }
0x1593   : > { %5989 = vmatmul.mubr.msk.f32.vlgmr.msra.gmra.mrb[28].mxu0 %vm971_vm2, %v3007_v9  ;;  %v5455_v9 = vld [vmem:[%s7659_s0 + $0xd0] sm:$0xff] }
0x1594   : > { %6296 = vmatpush3.bf16.msra.mxu0 %v6295_v8  ;;  %6004 = vmatprep.mubr.msk.f32.mxu0 %vm6528_vm1, %v6529_v20  ;;  %v6319_v8 = vpack.c.bf16 %v5454_v7, %v5453_v6  ;;  %v6322_v11 = vpack.c.bf16 %v5456_v10, %v5455_v9  ;;  %v5488_v6 = vld [vmem:[%s7611_s8 + $0xf0] sm:$0xff]  ;;  %v5489_v7 = vld [vmem:[%s7611_s8 + $0xf8] sm:$0xff]  ;;  %v5479_v9 = vld [vmem:[%s7659_s0 + $0xe0] sm:$0xff] }
0x1595   : > { %6297 = vmatprep.subr.bf16.mxu0 %v6527_v12  ;;  %v5480_v10 = vld [vmem:[%s7659_s0 + $0xe8] sm:$0xff] }
0x1598   : > { %6299 = vmatpush3.bf16.msra.mxu0 %v6298_v13  ;;  %v5446_v13 = vld [vmem:[%s7658_s23 + $0xc0] sm:$0xff] }
0x1599   : > { %6306 = vmatprep.subr.bf16.mxu0 %v6527_v12  ;;  %v6313_v15 = vpack.c.bf16 %v5447_v14, %v5446_v13  ;;  %v5481_v13 = vld [vmem:[%s7659_s0 + $0xf0] sm:$0xff]  ;;  %v5482_v14 = vld [vmem:[%s7659_s0 + $0xf8] sm:$0xff]  ;;  %s6467_s0 = sshll.u32 %s6530_s4, 4  ;;  %s6468_s0 = int_to_ptr.vmem [resolvable:$false] %s6467_s0 }
0x159a   : > { %p6470_p0 = scmp.lt.s32.totalorder %s7563_s5, %s6468_s0 }
0x159b   : > { %6005 = vmatmul.mubr.msk.f32.vlgmr.msra.gmra.mrb[30].mxu0 %vm696_vm0, %v7166_v54 }
0x159c   : > { %6308 = vmatpush3.bf16.msra.mxu0 %v6307_v16  ;;  %6026 = vmatprep.mubr.msk.f32.mxu0 %vm6528_vm1, %v6529_v20  ;;  %v5448_v16 = vld [vmem:[%s7658_s23 + $0xd0] sm:$0xff] }
0x159d   : > { %6309 = vmatprep.subr.bf16.mxu0 %v6527_v12 }
0x15a0   : > { %6311 = vmatpush3.bf16.msra.mxu0 %v6310_v19 }
0x15a1   : > { %6039 = vmatprep.subr.mxu0 %v6529_v20 }
0x15a3   : > { %6027 = vmatmul.mubr.msk.f32.vlgmr.msra.gmra.mrb[32].mxu0 %vm696_vm0, %v7166_v54 }
0x15a4   : > { %6041 = vmatprep.mubr.msk.f32.mxu0 %vm6528_vm1, %v6529_v20  ;;  %6040 = vmatpush3.msra.mxu0 %v5443_v2  ;;  %v5475_v2 = vld [vmem:[%s7658_s23 + $0xf8] sm:$0xff] }
0x15a5   : > { %6312 = vmatprep.subr.bf16.mxu0 %v6527_v12 }
0x1666   : > { %v3248_v21 = vpop.f32.mrb[28].mxu0 }
0x1667   : > { %v3252_v22 = vmul.f32 0.35355338, %v3248_v21  ;;  %v5990_v23 = vpop.f32.mrb[29].mxu0  ;;  %v6316_v21 = vpack.c.bf16 %v5449_v17, %v5448_v16  ;;  %v6340_v17 = vpack.c.bf16 %v5482_v14, %v5481_v13  ;;  %v5511_v14 = vld [vmem:[%s7619_s16 + $0x40] sm:$0xff] }
0x1668   : > { %v5461_v23 = vld [vmem:[%s7611_s8 + $0xc8] sm:$0xff] }
0x1669   : > { %v3253_v24 = vadd.f32 %v6830_v0, %v3252_v22  ;;  %v5460_v22 = vld [vmem:[%s7611_s8 + $0xc0] sm:$0xff] }
0x166b   : > { %v3254_v25 = vsel %vm971_vm2, %v3253_v24, -inf }
0x166c   : > { %3255 = vmax.xlane.f32.xlu0 %v3254_v25 }
0x166e   : > { %v3419_v26 = vpop.f32.mrb[30].mxu0 }
0x166f   : > { %v6006_v27 = vpop.f32.mrb[31].mxu0  ;;  %v3420_v52 = vadd.f32 %v5424_v48, %v3419_v26  ;;  %v6325_v26 = vpack.c.bf16 %v5461_v23, %v5460_v22  ;;  %v7370_v48 = vld [vmem:[%s6827_s27] ss:$0 sm:$0xff]  ;;  %s7561_s27 = scalar_lea.hbm %s7667_s22, %s5527_s26 }
0x1670   : > { %v5462_v27 = vld [vmem:[%s7611_s8 + $0xd0] sm:$0xff] }
0x1676   : > { %v3585_v28 = vpop.f32.mrb[32].mxu0 }
0x1677   : > { %v6028_v29 = vpop.f32.mrb[33].mxu0  ;;  %v3586_v53 = vadd.f32 %v5438_v51, %v3585_v28  ;;  %v5463_v28 = vld [vmem:[%s7611_s8 + $0xd8] sm:$0xff] }
0x1678   : > { %v5458_v29 = vld [vmem:[%s7662_s7 + $0x6] ss:$0 sm:$0xff] }
0x16f9   : > { %v3256_v30 = vpop.xlane.xlu0 %3255 }
0x16fa   : > { %v3257_v31 = vsub.f32 %v3253_v24, %v3256_v30  ;;  %v6328_v30 = vpack.c.bf16 %v5463_v28, %v5462_v27  ;;  %v5477_v28 = vld [vmem:[%s7664_s24 + $0x7] ss:$0 sm:$0xff] }
0x16fc   : > { %v3258_v33 = vmul.f32 1.442695, %v3257_v31 }
0x16fe   : > { %6438 = vpow2.f32 %v3258_v33 }
0x1708   : > { %v6439_v34 = vpop.eup %6438 }
0x1709   : > { %v3260_v35 = vsel %vm971_vm2, %v6439_v34, 0.0 }
0x170a   : > { %3261 = vadd.xlane.f32.xlu1 %v3260_v35 }
0x1797   : > { %v3262_v36 = vpop.xlane.xlu1 %3261 }
0x1798   : > { %6440 = vrcp.f32 %v3262_v36 }
0x17a2   : > { %v6441_v39 = vpop.eup %6440 }
0x17a3   : > { %v3264_v41 = vmul.f32 %v6441_v39, %v6439_v34 }
0x17a5   : > { %5994 = vmatmul.mubr.msk.f32.vlgmr.msra.gmra.mrb[30].mxu1 %vm971_vm2, %v3264_v41 }
0x17a6   : > { %6302 = vmatpush3.bf16.msra.mxu1 %v6301_v40  ;;  %6015 = vmatprep.mubr.msk.f32.mxu1 %vm6528_vm1, %v6529_v20 }
0x17a7   : > { %6303 = vmatprep.subr.bf16.mxu1 %v6527_v12 }
0x17aa   : > { %6305 = vmatpush3.bf16.msra.mxu1 %v6304_v44 }
0x17ab   : > { %6029 = vmatprep.subr.mxu1 %v6529_v20 }
0x17ad   : > { %6016 = vmatmul.mubr.msk.f32.vlgmr.msra.gmra.mrb[32].mxu1 %vm696_vm0, %v7166_v54 }
0x17ae   : > { %6031 = vmatprep.mubr.msk.f32.mxu1 %vm6528_vm1, %v6529_v20 }
0x1878   : > { %v3334_v32 = vpop.f32.mrb[30].mxu1 }
0x1879   : > { %v5995_v45 = vpop.f32.mrb[31].mxu1 }
0x1880   : > { %v3502_v47 = vpop.f32.mrb[32].mxu1 }
0x1881   : > { %v3503_v49 = vadd.f32 %v5431_v46, %v3502_v47  ;;  %v6017_v50 = vpop.f32.mrb[33].mxu1 }
0x1883   : > { %6030 = vmatpush3.xpose.msk.msra.mxu1 %vm971_vm2, %v3503_v49 }
0x1884   : > { %6034 = vmatprep.subr.mxu1 %v6529_v20 }
0x1886   : > { %6032 = vmatmul.mubr.msk.f32.vlgmr.msra.gmra.mrb[34].mxu1 %vm971_vm2, %v3420_v52 }
0x1887   : > { %6035 = vmatpush3.msra.mxu1 %v3586_v53  ;;  %6036 = vmatprep.mubr.msk.f32.mxu1 %vm6528_vm1, %v6529_v20 }
0x1888   : > { %6044 = vmatprep.subr.mxu1 %v6529_v20 }
0x1959   : > { %v3661_v55 = vpop.f32.mrb[34].mxu1 }
0x195a   : > { %v3665_v56 = vmul.f32 0.35355338, %v3661_v55  ;;  %v6033_v57 = vpop.f32.mrb[35].mxu1 }
0x195b   : > { %v5470_v57 = vld [vmem:[%s7613_s10 + $0x30] sm:$0xff] }
0x195c   : > { %v3666_v58 = vadd.f32 %v6830_v0, %v3665_v56 }
0x195e   : > { %v3667_v59 = vsel %vm971_vm2, %v3666_v58, -inf }
0x195f   : > { %3668 = vmax.xlane.f32.xlu0 %v3667_v59  ;;  %v5472_v59 = vld [vmem:[%s7658_s23 + $0xe0] sm:$0xff] }
0x19ec   : > { %v3669_v60 = vpop.xlane.xlu0 %3668 }
0x19ed   : > { %v3670_v61 = vsub.f32 %v3666_v58, %v3669_v60  ;;  %v5473_v60 = vld [vmem:[%s7658_s23 + $0xe8] sm:$0xff] }
0x19ef   : > { %v3671_v62 = vmul.f32 1.442695, %v3670_v61 }
0x19f1   : > { %6442 = vpow2.f32 %v3671_v62  ;;  %v6331_v62 = vpack.c.bf16 %v5473_v60, %v5472_v59 }
0x19fb   : > { %v6443_v63 = vpop.eup %6442 }
0x19fc   : > { %v3673_v1 = vsel %vm971_vm2, %v6443_v63, 0.0 }
0x19fd   : > { %3674 = vadd.xlane.f32.xlu1 %v3673_v1  ;;  %v5474_v1 = vld [vmem:[%s7658_s23 + $0xf0] sm:$0xff] }
0x1a8a   : > { %v3675_v3 = vpop.xlane.xlu1 %3674 }
0x1a8b   : > { %6444 = vrcp.f32 %v3675_v3  ;;  %v6334_v3 = vpack.c.bf16 %v5475_v2, %v5474_v1  ;;  %v5505_v1 = vld [vmem:[%s7617_s14 + $0x28] sm:$0xff] }
0x1a95   : > { %v6445_v0 = vpop.eup %6444 }
0x1a96   : > { %v3677_v4 = vmul.f32 %v6445_v0, %v6443_v63  ;;  %v5486_v0 = vld [vmem:[%s7611_s8 + $0xe0] sm:$0xff] }
0x1a98   : > { %6037 = vmatmul.mubr.msk.f32.vlgmr.msra.gmra.mrb[36].mxu1 %vm971_vm2, %v3677_v4  ;;  %v5487_v4 = vld [vmem:[%s7611_s8 + $0xe8] sm:$0xff] }
0x1a99   : > { %6045 = vmatpush3.msra.mxu1 %v5418_v5  ;;  %6046 = vmatprep.mubr.msk.f32.mxu1 %vm6528_vm1, %v6529_v20  ;;  %v6343_v5 = vpack.c.bf16 %v5487_v4, %v5486_v0 }
0x1a9a   : > { %6318 = vmatprep.subr.bf16.mxu1 %v6527_v12 }
0x1a9c   : > { %6047 = vmatmul.mubr.msk.f32.vlgmr.msra.gmra.mrb[38].mxu1 %vm971_vm2, %v3334_v32 }
0x1a9d   : > { %6320 = vmatpush3.bf16.msra.mxu1 %v6319_v8  ;;  %6068 = vmatprep.mubr.msk.f32.mxu1 %vm6528_vm1, %v6529_v20  ;;  %v6346_v8 = vpack.c.bf16 %v5489_v7, %v5488_v6 }
0x1a9e   : > { %6321 = vmatprep.subr.bf16.mxu1 %v6527_v12 }
0x1aa1   : > { %6323 = vmatpush3.bf16.msra.mxu1 %v6322_v11  ;;  %v6337_v11 = vpack.c.bf16 %v5480_v10, %v5479_v9  ;;  %v5503_v10 = vld [vmem:[%s7616_s13 + $0x1] ss:$0 sm:$0xff] }
0x1aa2   : > { %6082 = vmatprep.subr.mxu1 %v6529_v20 }
0x1aa4   : > { %6069 = vmatmul.mubr.msk.f32.vlgmr.msra.gmra.mrb[40].mxu1 %vm696_vm0, %v7166_v54 }
0x1aa5   : > { %6084 = vmatprep.mubr.msk.f32.mxu1 %vm6528_vm1, %v6529_v20 }
0x1b6b   : > { %v3747_v18 = vpop.f32.mrb[36].mxu1 }
0x1b6c   : > { %v6038_v19 = vpop.f32.mrb[37].mxu1  ;;  %6042 = vmatmul.mubr.msk.f32.vlgmr.msra.gmra.mrb[34].mxu0 %vm971_vm2, %v3747_v18 }
0x1b6d   : > { %6314 = vmatpush3.bf16.msra.mxu0 %v6313_v15  ;;  %6057 = vmatprep.mubr.msk.f32.mxu0 %vm6528_vm1, %v6529_v20 }
0x1b6e   : > { %6315 = vmatprep.subr.bf16.mxu0 %v6527_v12 }
0x1b6f   : > { %v3895_v24 = vpop.f32.mrb[38].mxu1 }
0x1b70   : > { %v6048_v25 = vpop.f32.mrb[39].mxu1 }
0x1b71   : > { %6317 = vmatpush3.bf16.msra.mxu0 %v6316_v21 }
0x1b72   : > { %6324 = vmatprep.subr.bf16.mxu0 %v6527_v12 }
0x1b74   : > { %6058 = vmatmul.mubr.msk.f32.vlgmr.msra.gmra.mrb[36].mxu0 %vm696_vm0, %v7166_v54 }
0x1b75   : > { %6326 = vmatpush3.bf16.msra.mxu0 %v6325_v26  ;;  %6079 = vmatprep.mubr.msk.f32.mxu0 %vm6528_vm1, %v6529_v20  ;;  %v5484_v26 = vld [vmem:[%s7662_s7 + $0x7] ss:$0 sm:$0xff]  ;;  %s6469_s7 = scalar_lea.vmem %s6468_s0, 32 }
0x1b76   : > { %6327 = vmatprep.subr.bf16.mxu0 %v6527_v12  ;;  %p6471_p1 = scmp.lt.s32.totalorder %s6469_s7, %s6463_s6 }
0x1b77   : > { %v4061_v31 = vpop.f32.mrb[40].mxu1 }
0x1b78   : > { %v4062_v33 = vadd.f32 %v5458_v29, %v4061_v31  ;;  %v6070_v34 = vpop.f32.mrb[41].mxu1  ;;  %v5491_v31 = vld [vmem:[%s7612_s9 + $0x7] ss:$0 sm:$0xff]  ;;  %p6472_p2 = por %p6471_p1, %p6470_p0 }
0x1b79   : > { %6329 = vmatpush3.bf16.msra.mxu0 %v6328_v30 }
0x1b7a   : > { %6083 = vmatpush3.xpose.msk.msra.mxu1 %vm971_vm2, %v4062_v33  ;;  %6092 = vmatprep.subr.mxu0 %v6529_v20  ;;  %p6473_p3 = pnand %p6472_p2, %p6466_p13 }
0x1b7b   : > { %6087 = vmatprep.subr.mxu1 %v6529_v20 }
0x1b7c   : > { %6080 = vmatmul.mubr.msk.f32.vlgmr.msra.gmra.mrb[38].mxu0 %vm696_vm0, %v7166_v54 }
0x1b7d   : > { %6094 = vmatprep.mubr.msk.f32.mxu0 %vm6528_vm1, %v6529_v20  ;;  %6093 = vmatpush3.msra.mxu0 %v5470_v57 }
0x1b7e   : > { %6336 = vmatprep.subr.bf16.mxu0 %v6527_v12 }
0x1c3f   : > { %v3822_v35 = vpop.f32.mrb[34].mxu0 }
0x1c40   : > { %v7357_v36 = vadd.f32 %v3895_v24, %v3822_v35  ;;  %v6043_v37 = vpop.f32.mrb[35].mxu0 }
0x1c47   : > { %v3978_v39 = vpop.f32.mrb[36].mxu0 }
0x1c48   : > { %v3979_v40 = vadd.f32 %v5451_v38, %v3978_v39  ;;  %v6059_v41 = vpop.f32.mrb[37].mxu0 }
0x1c4a   : > { %6085 = vmatmul.mubr.msk.f32.vlgmr.msra.gmra.mrb[42].mxu1 %vm971_vm2, %v3979_v40 }
0x1c4b   : > { %6089 = vmatprep.mubr.msk.f32.mxu1 %vm6528_vm1, %v6529_v20 }
0x1c4f   : > { %v4144_v43 = vpop.f32.mrb[38].mxu0 }
0x1c50   : > { %v4145_v44 = vadd.f32 %v5465_v42, %v4144_v43  ;;  %v6081_v32 = vpop.f32.mrb[39].mxu0 }
0x1c51   : > { %v5496_v32 = vld [vmem:[%s7613_s10 + $0x38] sm:$0xff] }
0x1c52   : > { %6088 = vmatpush3.msra.mxu1 %v4145_v44 }
0x1c53   : > { %6330 = vmatprep.subr.bf16.mxu1 %v6527_v12 }
0x1d1d   : > { %v4220_v45 = vpop.f32.mrb[42].mxu1 }
0x1d1e   : > { %v4224_v46 = vmul.f32 0.35355338, %v4220_v45  ;;  %v6086_v47 = vpop.f32.mrb[43].mxu1 }
0x1d20   : > { %v4225_v49 = vadd.f32 %v7370_v48, %v4224_v46 }
0x1d22   : > { %v4226_v50 = vsel %vm971_vm2, %v4225_v49, -inf }
0x1d23   : > { %4227 = vmax.xlane.f32.xlu0 %v4226_v50 }
0x1db0   : > { %v4228_v51 = vpop.xlane.xlu0 %4227 }
0x1db1   : > { %v4229_v52 = vsub.f32 %v4225_v49, %v4228_v51  ;;  %v5499_v51 = vld [vmem:[%s7614_s11 + $0x1] ss:$0 sm:$0xff] }
0x1db3   : > { %v4230_v53 = vmul.f32 1.442695, %v4229_v52 }
0x1db5   : > { %6446 = vpow2.f32 %v4230_v53 }
0x1dbf   : > { %v6447_v55 = vpop.eup %6446 }
0x1dc0   : > { %v4232_v56 = vsel %vm971_vm2, %v6447_v55, 0.0 }
0x1dc1   : > { %4233 = vadd.xlane.f32.xlu1 %v4232_v56 }
0x1e4e   : > { %v4234_v58 = vpop.xlane.xlu1 %4233 }
0x1e4f   : > { %6448 = vrcp.f32 %v4234_v58 }
0x1e59   : > { %v6449_v61 = vpop.eup %6448 }
0x1e5a   : > { %v4236_v63 = vmul.f32 %v6449_v61, %v6447_v55 }
0x1e5c   : > { %6090 = vmatmul.mubr.msk.f32.vlgmr.msra.gmra.mrb[44].mxu1 %vm971_vm2, %v4236_v63  ;;  %v5504_v63 = vld [vmem:[%s7617_s14 + $0x20] sm:$0xff] }
0x1e5d   : > { %6332 = vmatpush3.bf16.msra.mxu1 %v6331_v62  ;;  %6105 = vmatprep.mubr.msk.f32.mxu1 %vm6528_vm1, %v6529_v20  ;;  %v6349_v2 = vpack.c.bf16 %v5505_v1, %v5504_v63 }
0x1e5e   : > { %6333 = vmatprep.subr.bf16.mxu1 %v6527_v12 }
0x1e61   : > { %6335 = vmatpush3.bf16.msra.mxu1 %v6334_v3  ;;  %v5507_v3 = vld [vmem:[%s7617_s14 + $0x38] sm:$0xff] }
0x1e62   : > { %6342 = vmatprep.subr.bf16.mxu1 %v6527_v12 }
0x1e64   : > { %6106 = vmatmul.mubr.msk.f32.vlgmr.msra.gmra.mrb[46].mxu1 %vm696_vm0, %v7166_v54 }
0x1e65   : > { %6344 = vmatpush3.bf16.msra.mxu1 %v6343_v5  ;;  %6127 = vmatprep.mubr.msk.f32.mxu1 %vm6528_vm1, %v6529_v20 }
0x1e66   : > { %6345 = vmatprep.subr.bf16.mxu1 %v6527_v12 }
0x1e69   : > { %6347 = vmatpush3.bf16.msra.mxu1 %v6346_v8  ;;  %v5502_v8 = vld [vmem:[%s7615_s12 + $0x1] ss:$0 sm:$0xff] }
0x1e6a   : > { %6140 = vmatprep.subr.mxu1 %v6529_v20 }
0x1e6c   : > { %6128 = vmatmul.mubr.msk.f32.vlgmr.msra.gmra.mrb[48].mxu1 %vm696_vm0, %v7166_v54 }
0x1e6d   : > { %6142 = vmatprep.mubr.msk.f32.mxu1 %vm6528_vm1, %v6529_v20  ;;  %6141 = vmatpush3.msra.mxu1 %v5496_v32 }
0x1e6e   : > { %6354 = vmatprep.subr.bf16.mxu1 %v6527_v12 }
0x1f2f   : > { %v4306_v15 = vpop.f32.mrb[44].mxu1 }
0x1f30   : > { %v6091_v16 = vpop.f32.mrb[45].mxu1  ;;  %6095 = vmatmul.mubr.msk.f32.vlgmr.msra.gmra.mrb[40].mxu0 %vm971_vm2, %v4306_v15  ;;  %v5512_v15 = vld [vmem:[%s7619_s16 + $0x48] sm:$0xff] }
0x1f31   : > { %6338 = vmatpush3.bf16.msra.mxu0 %v6337_v11  ;;  %6116 = vmatprep.mubr.msk.f32.mxu0 %vm6528_vm1, %v6529_v20  ;;  %v6355_v16 = vpack.c.bf16 %v5512_v15, %v5511_v14 }
0x1f32   : > { %6339 = vmatprep.subr.bf16.mxu0 %v6527_v12 }
0x1f35   : > { %6341 = vmatpush3.bf16.msra.mxu0 %v6340_v17  ;;  %v5513_v17 = vld [vmem:[%s7619_s16 + $0x50] sm:$0xff] }
0x1f36   : > { %6130 = vmatprep.subr.mxu0 %v6529_v20 }
0x1f37   : > { %v4465_v18 = vpop.f32.mrb[46].mxu1 }
0x1f38   : > { %v6107_v19 = vpop.f32.mrb[47].mxu1  ;;  %6117 = vmatmul.mubr.msk.f32.vlgmr.msra.gmra.mrb[42].mxu0 %vm696_vm0, %v7166_v54  ;;  %v4466_v33 = vadd.f32 %v5477_v28, %v4465_v18  ;;  %v5514_v18 = vld [vmem:[%s7619_s16 + $0x58] sm:$0xff] }
0x1f39   : > { %6132 = vmatprep.mubr.msk.f32.mxu0 %vm6528_vm1, %v6529_v20  ;;  %v5515_v19 = vld [vmem:[%s7619_s16 + $0x60] sm:$0xff] }
0x1f3f   : > { %v4631_v21 = vpop.f32.mrb[48].mxu1 }
0x1f40   : > { %v6129_v22 = vpop.f32.mrb[49].mxu1  ;;  %v4632_v34 = vadd.f32 %v5491_v31, %v4631_v21  ;;  %v5516_v21 = vld [vmem:[%s7619_s16 + $0x68] sm:$0xff] }
0x1f41   : > { %v6361_v22 = vpack.c.bf16 %v5516_v21, %v5515_v19 }
0x2003   : > { %v4381_v23 = vpop.f32.mrb[40].mxu0 }
0x2004   : > { %v4385_v24 = vadd.f32 %v4381_v23, %v7357_v36  ;;  %v6096_v25 = vpop.f32.mrb[41].mxu0  ;;  %v5517_v23 = vld [vmem:[%s7619_s16 + $0x70] sm:$0xff] }
0x200b   : > { %v4548_v27 = vpop.f32.mrb[42].mxu0 }
0x200c   : > { %v4549_v29 = vadd.f32 %v5484_v26, %v4548_v27  ;;  %v6118_v30 = vpop.f32.mrb[43].mxu0  ;;  %v5509_v26 = vld [vmem:[%s7618_s15 + $0x1] ss:$0 sm:$0xff] }
0x200e   : > { %6131 = vmatpush3.xpose.msk.msra.mxu0 %vm971_vm2, %v4549_v29 }
0x200f   : > { %6135 = vmatprep.subr.mxu0 %v6529_v20 }
0x2011   : > { %6133 = vmatmul.mubr.msk.f32.vlgmr.msra.gmra.mrb[44].mxu0 %vm971_vm2, %v4466_v33 }
0x2012   : > { %6136 = vmatpush3.msra.mxu0 %v4632_v34  ;;  %6137 = vmatprep.mubr.msk.f32.mxu0 %vm6528_vm1, %v6529_v20 }
0x2013   : > { %6348 = vmatprep.subr.bf16.mxu0 %v6527_v12 }
0x20e4   : > { %v4707_v35 = vpop.f32.mrb[44].mxu0 }
0x20e5   : > { %v4711_v36 = vmul.f32 0.35355338, %v4707_v35  ;;  %v6134_v37 = vpop.f32.mrb[45].mxu0 }
0x20e7   : > { %v4712_v38 = vadd.f32 %v7370_v48, %v4711_v36 }
0x20e9   : > { %v4713_v39 = vsel %vm971_vm2, %v4712_v38, -inf }
0x20ea   : > { %4714 = vmax.xlane.f32.xlu0 %v4713_v39 }
0x2177   : > { %v4715_v40 = vpop.xlane.xlu0 %4714 }
0x2178   : > { %v4716_v41 = vsub.f32 %v4712_v38, %v4715_v40  ;;  %v5520_v40 = vld [vmem:[%s7620_s17 + $0x1] ss:$0 sm:$0xff] }
0x217a   : > { %v4717_v42 = vmul.f32 1.442695, %v4716_v41 }
0x217c   : > { %6450 = vpow2.f32 %v4717_v42 }
0x2186   : > { %v6451_v43 = vpop.eup %6450 }
0x2187   : > { %v4719_v44 = vsel %vm971_vm2, %v6451_v43, 0.0 }
0x2188   : > { %4720 = vadd.xlane.f32.xlu1 %v4719_v44 }
0x2215   : > { %v4721_v45 = vpop.xlane.xlu1 %4720 }
0x2216   : > { %6452 = vrcp.f32 %v4721_v45 }
0x2220   : > { %v6453_v46 = vpop.eup %6452 }
0x2221   : > { %v4723_v47 = vmul.f32 %v6453_v46, %v6451_v43 }
0x2223   : > { %6138 = vmatmul.mubr.msk.f32.vlgmr.msra.gmra.mrb[46].mxu0 %vm971_vm2, %v4723_v47 }
0x2224   : > { %6153 = vmatprep.mubr.msk.f32.mxu0 %vm6528_vm1, %v6529_v20  ;;  %6350 = vmatpush3.bf16.msra.mxu0 %v6349_v2  ;;  %v5135_v2 = vld [vmem:[%s7624_s21] sm:$0x1] }
0x2225   : > { %6351 = vmatprep.subr.bf16.mxu0 %v6527_v12 }
0x22f6   : > { %v4793_v48 = vpop.f32.mrb[46].mxu0 }
0x22f7   : > { %v6139_v49 = vpop.f32.mrb[47].mxu0  ;;  %6143 = vmatmul.mubr.msk.f32.vlgmr.msra.gmra.mrb[50].mxu1 %vm971_vm2, %v4793_v48 }
0x22f8   : > { %6172 = vmatprep.mubr.msk.f32.mxu1 %vm6528_vm1, %v6529_v20  ;;  %6356 = vmatpush3.bf16.msra.mxu1 %v6355_v16 }
0x22f9   : > { %6357 = vmatprep.subr.bf16.mxu1 %v6527_v12 }
0x23ca   : > { %v4868_v50 = vpop.f32.mrb[50].mxu1 }
0x23cb   : > { %v4872_v52 = vadd.f32 %v4868_v50, %v4385_v24  ;;  %v6144_v53 = vpop.f32.mrb[51].mxu1  ;;  %v5518_v24 = vld [vmem:[%s7619_s16 + $0x78] sm:$0xff]  ;;  %v5131_v50 = vld [vmem:[%s7623_s20] sm:$0xff] }
0x23cc   : > { %v6364_v25 = vpack.c.bf16 %v5518_v24, %v5517_v23  ;;  %v5133_v53 = vld [vmem:[%s7623_s20 + $0x10] sm:$0xff] }
0x23cd   : > { %v4881_v55 = vadd.f32 %v5499_v51, %v4872_v52  ;;  %v5132_v51 = vld [vmem:[%s7623_s20 + $0x8] sm:$0xff] }
0x23ce   : > { %v6367_v52 = vpack.c.bf16 %v5132_v51, %v5131_v50 }
0x23cf   : > { %v4882_v56 = vadd.f32 %v4881_v55, %v7166_v54  ;;  %v5506_v54 = vld [vmem:[%s7617_s14 + $0x30] sm:$0xff]  ;;  %v5134_v55 = vld [vmem:[%s7623_s20 + $0x18] sm:$0xff] }
0x23d0   : > { %v6352_v0 = vpack.c.bf16 %v5507_v3, %v5506_v54 }
0x23d1   : > { %v4887_v57 = vsel %vm696_vm0, %v4882_v56, 0.0 }
0x23d2   : > { %4888 = vadd.xlane.f32.xlu0 %v4887_v57  ;;  %6353 = vmatpush3.bf16.msra.mxu0 %v6352_v0 }
0x23d3   : > { %6366 = vmatprep.subr.bf16.mxu0 %v6527_v12 }
0x245f   : > { %v4889_v58 = vpop.xlane.xlu0 %4888 }
0x2460   : > { %v4890_v59 = vmul.f32 0.03125, %v4889_v58 }
0x2462   : > { %v4891_v60 = vsub.f32 %v4882_v56, %v4890_v59  ;;  %v6370_v56 = vpack.c.bf16 %v5134_v55, %v5133_v53 }
0x2464   : > { %v4892_v61 = vmul.f32 %v4891_v60, %v4891_v60 }
0x2466   : > { %v4893_v62 = vsel %vm696_vm0, %v4892_v61, 0.0 }
0x2467   : > { %4894 = vadd.xlane.f32.xlu1 %v4893_v62  ;;  %v5525_v62 = vld [vmem:[%s7622_s19 + $0x1] ss:$0 sm:$0xff] }
0x24f4   : > { %v4895_v4 = vpop.xlane.xlu1 %4894 }
0x24f5   : > { %v4896_v5 = vmul.f32 0.03125, %v4895_v4 }
0x24f7   : > { %v4897_v6 = vadd.f32 1e-12, %v4896_v5 }
0x24f9   : > { %6454 = vrsqrt.f32 %v4897_v6 }
0x2503   : > { %v6455_v7 = vpop.eup %6454 }
0x2504   : > { %v4899_v9 = vmul.f32 %v6455_v7, %v4891_v60 }
0x2506   : > { %v4906_v11 = vmul.f32 %v5502_v8, %v4899_v9 }
0x2508   : > { %v4913_v13 = vadd.f32 %v5503_v10, %v4906_v11 }
0x250a   : > { %6154 = vmatmul.mubr.msk.f32.vlgmr.msra.gmra.mrb[48].mxu0 %vm696_vm0, %v4913_v13 }
0x250b   : > { %6183 = vmatprep.mubr.msk.f32.mxu0 %vm6528_vm1, %v6529_v20  ;;  %v6358_v20 = vpack.c.bf16 %v5514_v18, %v5513_v17  ;;  %6368 = vmatpush3.bf16.msra.mxu0 %v6367_v52 }
0x250c   : > { %6369 = vmatprep.subr.bf16.mxu0 %v6527_v12 }
0x250d   : > { %6359 = vmatpush3.bf16.msra.mxu1 %v6358_v20 }
0x250e   : > { %6360 = vmatprep.subr.bf16.mxu1 %v6527_v12 }
0x250f   : > { %6371 = vmatpush3.bf16.msra.mxu0 %v6370_v56 }
0x2511   : > { %6362 = vmatpush3.bf16.msra.mxu1 %v6361_v22 }
0x2512   : > { %6363 = vmatprep.subr.bf16.mxu1 %v6527_v12  ;;  %v5524_v12 = vld [vmem:[%s7621_s18 + $0x1] ss:$0 sm:$0xff] }
0x2515   : > { %6365 = vmatpush3.bf16.msra.mxu1 %v6364_v25 }
0x25dd   : > { %v4996_v27 = vpop.f32.mrb[48].mxu0 }
0x25de   : > { %v4997_v28 = vadd.f32 %v5509_v26, %v4996_v27  ;;  %v6155_v29 = vpop.f32.mrb[49].mxu0 }
0x25e0   : > { %v5001_v30 = vmul.f32 0.044715, %v4997_v28  ;;  %v5000_v37 = vmul.f32 0.5, %v4997_v28 }
0x25e2   : > { %v5002_v31 = vmul.f32 %v5001_v30, %v4997_v28 }
0x25e4   : > { %v5003_v33 = vmul.f32 %v5002_v31, %v4997_v28 }
0x25e6   : > { %v5004_v34 = vadd.f32 %v5003_v33, %v4997_v28 }
0x25e8   : > { %v5005_v35 = vmul.f32 0.7978846, %v5004_v34 }
0x25ea   : > { %6456 = vtanh.f32 %v5005_v35 }
0x25f4   : > { %v6457_v36 = vpop.eup %6456 }
0x25f5   : > { %v5007_v38 = vadd.f32 1.0, %v6457_v36 }
0x25f7   : > { %v5008_v39 = vmul.f32 %v5007_v38, %v5000_v37 }
0x25f9   : > { %6173 = vmatmul.mubr.msk.f32.vlgmr.msra.gmra.mrb[52].mxu1 %vm2820_vm3, %v5008_v39 }
0x26cc   : > { %v5095_v41 = vpop.f32.mrb[52].mxu1 }
0x26cd   : > { %v5096_v42 = vadd.f32 %v5520_v40, %v5095_v41  ;;  %v6174_v43 = vpop.f32.mrb[53].mxu1 }
0x26cf   : > { %v5099_v44 = vadd.f32 %v5096_v42, %v4913_v13 }
0x26d1   : > { %v5104_v32 = vsel %vm696_vm0, %v5099_v44, 0.0 }
0x26d2   : > { %5105 = vadd.xlane.f32.xlu0 %v5104_v32 }
0x275f   : > { %v5106_v45 = vpop.xlane.xlu0 %5105 }
0x2760   : > { %v5107_v46 = vmul.f32 0.03125, %v5106_v45 }
0x2762   : > { %v5108_v47 = vsub.f32 %v5099_v44, %v5107_v46 }
0x2764   : > { %v5109_v48 = vmul.f32 %v5108_v47, %v5108_v47 }
0x2766   : > { %v5110_v49 = vsel %vm696_vm0, %v5109_v48, 0.0 }
0x2767   : > { %5111 = vadd.xlane.f32.xlu1 %v5110_v49 }
0x27f4   : > { %v5112_v57 = vpop.xlane.xlu1 %5111 }
0x27f5   : > { %v5113_v58 = vmul.f32 0.03125, %v5112_v57 }
0x27f7   : > { %v5114_v59 = vadd.f32 1e-12, %v5113_v58 }
0x27f9   : > { %6458 = vrsqrt.f32 %v5114_v59 }
0x2803   : > { %v6459_v60 = vpop.eup %6458 }
0x2804   : > { %v5116_v61 = vmul.f32 %v6459_v60, %v5108_v47 }
0x2806   : > { %v5123_v63 = vmul.f32 %v5524_v12, %v5116_v61 }
0x2808   : > { %v5130_v1 = vadd.f32 %v5525_v62, %v5123_v63 }
0x280a   : > { %6184 = vmatmul.mubr.msk.f32.vlgmr.msra.gmra.mrb[50].mxu0 %vm696_vm0, %v5130_v1 }
0x28dd   : > { %v5205_v54 = vpop.f32.mrb[50].mxu0 }
0x28de   : > { %v5206_v3 = vadd.f32 %v5205_v54, %v5135_v2  ;;  %v6185_v0 = vpop.f32.mrb[51].mxu0 }
0x28e0   : > { %6460 = vtanh.f32 %v5206_v3 }
0x28ea   : > { %v6461_v4 = vpop.eup %6460 }
0x28eb   : > { %5211 = vst.msk [vmem:[%s684_s1] sm:$0x1] %vm5210_vm4, %v6461_v4 }
0x28ec   : > { %6476 = shalt.err (!%p6473_p3)
}
0x28ed   : > { %s6477_s2 = scalar_lea.hbm %s7561_s27, 16  ;;  %s6481_s3 = scalar_lea.hbm %s7667_s22, 32 }
0x28ee   : > { %p6478_p4 = scmp.ne.s32.totalorder %s7561_s27, %s6477_s2  ;;  %p6482_p9 = scmp.lt.u32.totalorder %s7561_s27, %s7667_s22 }
0x28ef   : > { %p6483_p10 = scmp.lt.u32.totalorder %s6481_s3, %s6477_s2  ;;  %p6485_p12 = scmp.lt.u32.totalorder %s6477_s2, %s7561_s27 }
0x28f0   : > { %p6479_p7 = pnand %p6478_p4, %p6684_p5 }
0x28f1   : > { %p6484_p11 = por %p6483_p10, %p6482_p9 }
0x28f2   : > { %p6480_p8 = pneg %p6479_p7 }
0x28f3   : > { %p6486_p13 = por %p6485_p12, %p6484_p11 }
0x28f5   : > { %p6487_p0 = pnand %p6486_p13, %p6480_p8 }
0x28f7   : > { %6490 = shalt.err (!%p6487_p0)
}
0x28f8   : > { %6372 = dma.vmem_to_hbm [thread:$0]  (%p6684_p5), %s7563_s5, 16, %s7561_s27, %s5213_s30  }
0x28f9 PF: > { %s7668_s7 = sld [smem:[#allocation7_spill]]  ;;  %s7669_s6 = sld [smem:[#allocation5_spill]] }
0x28ff   : > { %p6378_p1 = scmp.ge.s32.totalorder %s7668_s7, 2  ;;  %s5237_s26 = sand.u32 1, %s7669_s6  }
0x2900   : > { %s5238_s1 = scalar_lea.sflag [#allocation3], %s5237_s26 }
0x2901   : > { %p6375_p2 = pnand %p6378_p1, %p6688_p6 }
0x2903   : > { %6508 = dma.done.wait (!%p6375_p2), %s5238_s1, 16  }
0x2904   : > { %6510 = vsyncadd (!%p6375_p2), %s5238_s1, 4294967280  ;;  %s7671_s30 = sld [smem:[#allocation8_spill]]  ;;  %s7672_s2 = sld [smem:[#allocation6_spill]] }
0x2905   : > { %s7673_s29 = sld [smem:[#allocation9_spill]]  ;;  %s7674_s3 = smov %s6517_s28 }
0x290a   : > { %p32_p3 = scmp.ge.s32.totalorder %s7671_s30, 4   ;;  %s7675_s28 = smov %s7672_s2 }
0x290c   :  { %34 = sbr.rel (!%p32_p3) target bundleno = 13 (0xd), region = 204 }
0x2913   :  { %5242 = vsyncpa [#allocation3], 1 }
0x2914   :  { %5244 = vsyncpa [#allocation3 + $0x1], 1 }

</bundles_post_ra>
